<compile_context>
chip_gen: v7x
topology: tpu7x:2x2x1
jax: 0.10.0
libtpu: 0.0.40
codegen_flags: <defaults>
</compile_context>

<pallas_src>
import functools

import jax
import jax.numpy as jnp
from jax import lax
from jax.experimental import pallas as pl
from jax.experimental.pallas import tpu as pltpu


def _round_up(x, m):
    return (x + m - 1) // m * m


# ----------------------------------------------------------------------------
# Fused bidirectional LSTM kernel: grid iterates over TT-step time blocks.
# ----------------------------------------------------------------------------
def _pblstm_kernel(lens_ref, xf_ref, xb_ref,
                   wihf_hbm, wihb_hbm, whhf_hbm, whhb_hbm,
                   bf_ref, bb_ref,
                   yf_ref, yb_ref, hn_ref, cn_ref,
                   wihf_sc, wihb_sc, whhf_sc, whhb_sc, wsem,
                   gxf_sc, gxb_sc,
                   hf_sc, cf_sc, hb_sc, cb_sc,
                   *, tt, nblk, hp, bp, f2, wdt):
    i = pl.program_id(0)
    G = 4 * hp

    @pl.when(i == 0)
    def _init():
        # Copy resident weights HBM -> VMEM once (single-buffered, persists in
        # scratch across the whole grid).
        copies = (
            pltpu.make_async_copy(wihf_hbm, wihf_sc, wsem.at[0]),
            pltpu.make_async_copy(wihb_hbm, wihb_sc, wsem.at[1]),
            pltpu.make_async_copy(whhf_hbm, whhf_sc, wsem.at[2]),
            pltpu.make_async_copy(whhb_hbm, whhb_sc, wsem.at[3]),
        )
        for cp in copies:
            cp.start()
        for cp in copies:
            cp.wait()
        hf_sc[...] = jnp.zeros_like(hf_sc)
        cf_sc[...] = jnp.zeros_like(cf_sc)
        hb_sc[...] = jnp.zeros_like(hb_sc)
        cb_sc[...] = jnp.zeros_like(cb_sc)

    lens = lens_ref[...]                      # (Bp, 1) int32

    # Hoisted input projection: one big MXU matmul per direction per block
    # instead of TT tiny per-step matmuls.  Bias is folded in here.
    xf2 = xf_ref[...].reshape(tt * bp, f2)
    xb2 = xb_ref[...].reshape(tt * bp, f2)
    gxf = jnp.dot(xf2, wihf_sc[...], preferred_element_type=jnp.float32) + bf_ref[...]
    gxb = jnp.dot(xb2, wihb_sc[...], preferred_element_type=jnp.float32) + bb_ref[...]
    gxf_sc[...] = gxf.reshape(tt, bp, G)
    gxb_sc[...] = gxb.reshape(tt, bp, G)

    h_f = hf_sc[...]
    c_f = cf_sc[...]
    h_b = hb_sc[...]
    c_b = cb_sc[...]

    # Hoist the scalar block bases out of the unrolled loop.
    base_f = i * tt
    base_b = (nblk - 1 - i) * tt

    # Statically unrolled recurrent loop over the TT timesteps of this block.
    # The two directions are interleaved per step so their small recurrent
    # matmuls / EUP gate math overlap.
    for t in range(tt):
        # -------- forward direction: global time i*tt + t ---------------
        tf = base_f + t
        g = gxf_sc[t] + jnp.dot(h_f.astype(wdt), whhf_sc[...],
                                preferred_element_type=jnp.float32)
        ig = jax.nn.sigmoid(g[:, 0 * hp:1 * hp])
        fg = jax.nn.sigmoid(g[:, 1 * hp:2 * hp])
        gg = jnp.tanh(g[:, 2 * hp:3 * hp])
        og = jax.nn.sigmoid(g[:, 3 * hp:4 * hp])
        c_new = fg * c_f + ig * gg
        h_new = og * jnp.tanh(c_new)
        m = tf < lens                         # (Bp, 1) bool
        h_f = jnp.where(m, h_new, h_f)
        c_f = jnp.where(m, c_new, c_f)
        yf_ref[t] = jnp.where(m, h_new, jnp.zeros_like(h_new)).astype(yf_ref.dtype)

        # -------- backward direction: block nblk-1-i, local index tt-1-t --
        tl = tt - 1 - t
        tb = base_b + tl
        g = gxb_sc[tl] + jnp.dot(h_b.astype(wdt), whhb_sc[...],
                                 preferred_element_type=jnp.float32)
        ig = jax.nn.sigmoid(g[:, 0 * hp:1 * hp])
        fg = jax.nn.sigmoid(g[:, 1 * hp:2 * hp])
        gg = jnp.tanh(g[:, 2 * hp:3 * hp])
        og = jax.nn.sigmoid(g[:, 3 * hp:4 * hp])
        c_new = fg * c_b + ig * gg
        h_new = og * jnp.tanh(c_new)
        m = tb < lens
        h_b = jnp.where(m, h_new, h_b)
        c_b = jnp.where(m, c_new, c_b)
        yb_ref[tl] = jnp.where(m, h_new, jnp.zeros_like(h_new)).astype(yb_ref.dtype)

    hf_sc[...] = h_f
    cf_sc[...] = c_f
    hb_sc[...] = h_b
    cb_sc[...] = c_b

    @pl.when(i == nblk - 1)
    def _finalize():
        hn_ref[0] = h_f.astype(hn_ref.dtype)
        hn_ref[1] = h_b.astype(hn_ref.dtype)
        cn_ref[0] = c_f.astype(cn_ref.dtype)
        cn_ref[1] = c_b.astype(cn_ref.dtype)


# ----------------------------------------------------------------------------
# Weight preparation: transpose to x@W layout, pad hidden to a lane multiple.
# ----------------------------------------------------------------------------
def _prep_dir_weights(p, hidden, hp, wdt):
    """torch layout (4H, D)/(4H, H)/(4H,) -> (D, 4Hp), (Hp, 4Hp), (1, 4Hp)."""
    wih, whh, b = p["wih"], p["whh"], p["b"]
    d_in = wih.shape[1]
    h = hidden
    wih_t = wih.T.reshape(d_in, 4, h)
    wih_p = jnp.zeros((d_in, 4, hp), wih.dtype).at[:, :, :h].set(wih_t)
    whh_t = whh.T.reshape(h, 4, h)
    whh_p = jnp.zeros((hp, 4, hp), whh.dtype).at[:h, :, :h].set(whh_t)
    b_p = jnp.zeros((4, hp), jnp.float32).at[:, :h].set(b.reshape(4, h))
    return (wih_p.reshape(d_in, 4 * hp).astype(wdt),
            whh_p.reshape(hp, 4 * hp).astype(wdt),
            b_p.reshape(1, 4 * hp))


# ----------------------------------------------------------------------------
# pBLSTM wrapper.
# ----------------------------------------------------------------------------
def init_pblstm_params(key, input_dim, hidden_size):
    """Same shapes as nn.LSTM(input_dim*2, hidden_size, bidirectional=True)."""
    d2 = input_dim * 2
    k = 1.0 / float(hidden_size) ** 0.5
    keys = jax.random.split(key, 8)
    params = {}
    idx = 0
    for direction in ("fwd", "bwd"):
        wih = jax.random.uniform(keys[idx], (4 * hidden_size, d2),
                                 jnp.float32, -k, k); idx += 1
        whh = jax.random.uniform(keys[idx], (4 * hidden_size, hidden_size),
                                 jnp.float32, -k, k); idx += 1
        bih = jax.random.uniform(keys[idx], (4 * hidden_size,),
                                 jnp.float32, -k, k); idx += 1
        bhh = jax.random.uniform(keys[idx], (4 * hidden_size,),
                                 jnp.float32, -k, k); idx += 1
        params[direction] = dict(wih=wih, whh=whh, b=bih + bhh)
    return params


def pblstm_forward(x, lens, params, *, time_block=16, compute_dtype=None):
    """x: (L, B, F) zero-padded, lens: (B,) int32.
    Returns (y:(L//2, B, 2H) zero-padded, (h_n, c_n), new_lens)."""
    L, B, F = x.shape
    H = params["fwd"]["whh"].shape[1]
    wdt = compute_dtype if compute_dtype is not None else x.dtype
    out_dtype = x.dtype

    L2 = (L // 2) * 2
    T = L2 // 2
    lens_half = (lens // 2).astype(jnp.int32)

    # Pyramid reshape, time-major (single cheap transpose of the (2, B) axes):
    # out[t, b] = concat(x[2t, b], x[2t+1, b])  -- same as the torch permute/view.
    xp = x[:L2].reshape(T, 2, B, F).transpose(0, 2, 1, 3).reshape(T, B, 2 * F)

    F2 = 2 * F
    TT = min(time_block, T)
    Tp = _round_up(T, TT)
    Bp = _round_up(B, 8)          # full sublanes
    Hp = _round_up(H, 128)        # lane-aligned gates / stores
    G = 4 * Hp
    nblk = Tp // TT

    xp = jnp.pad(xp, ((0, Tp - T), (0, Bp - B), (0, 0))).astype(wdt)
    lens_p = jnp.pad(lens_half, (0, Bp - B)).reshape(Bp, 1)

    wih_f, whh_f, b_f = _prep_dir_weights(params["fwd"], H, Hp, wdt)
    wih_b, whh_b, b_b = _prep_dir_weights(params["bwd"], H, Hp, wdt)

    kernel = functools.partial(_pblstm_kernel, tt=TT, nblk=nblk, hp=Hp,
                               bp=Bp, f2=F2, wdt=wdt)

    yf, yb, hn, cn = pl.pallas_call(
        kernel,
        out_shape=(
            jax.ShapeDtypeStruct((Tp, Bp, Hp), out_dtype),
            jax.ShapeDtypeStruct((Tp, Bp, Hp), out_dtype),
            jax.ShapeDtypeStruct((2, Bp, Hp), out_dtype),
            jax.ShapeDtypeStruct((2, Bp, Hp), out_dtype),
        ),
        grid_spec=pltpu.PrefetchScalarGridSpec(
            num_scalar_prefetch=0,
            grid=(nblk,),
            in_specs=[
                pl.BlockSpec((Bp, 1), lambda i: (0, 0)),                     # lens
                pl.BlockSpec((TT, Bp, F2), lambda i: (i, 0, 0)),             # x, fwd walk
                pl.BlockSpec((TT, Bp, F2), lambda i: (nblk - 1 - i, 0, 0)),  # x, bwd walk
                pl.BlockSpec(memory_space=pl.ANY),                           # W_ih fwd (HBM)
                pl.BlockSpec(memory_space=pl.ANY),                           # W_ih bwd
                pl.BlockSpec(memory_space=pl.ANY),                           # W_hh fwd
                pl.BlockSpec(memory_space=pl.ANY),                           # W_hh bwd
                pl.BlockSpec((1, G), lambda i: (0, 0)),                      # bias fwd
                pl.BlockSpec((1, G), lambda i: (0, 0)),                      # bias bwd
            ],
            out_specs=(
                pl.BlockSpec((TT, Bp, Hp), lambda i: (i, 0, 0)),             # y fwd
                pl.BlockSpec((TT, Bp, Hp), lambda i: (nblk - 1 - i, 0, 0)),  # y bwd
                pl.BlockSpec((2, Bp, Hp), lambda i: (0, 0, 0)),              # h_n
                pl.BlockSpec((2, Bp, Hp), lambda i: (0, 0, 0)),              # c_n
            ),
            scratch_shapes=[
                pltpu.VMEM((F2, G), wdt), pltpu.VMEM((F2, G), wdt),          # W_ih f/b
                pltpu.VMEM((Hp, G), wdt), pltpu.VMEM((Hp, G), wdt),          # W_hh f/b
                pltpu.SemaphoreType.DMA((4,)),
                pltpu.VMEM((TT, Bp, G), jnp.float32),                        # gates_x fwd
                pltpu.VMEM((TT, Bp, G), jnp.float32),                        # gates_x bwd
                pltpu.VMEM((Bp, Hp), jnp.float32), pltpu.VMEM((Bp, Hp), jnp.float32),
                pltpu.VMEM((Bp, Hp), jnp.float32), pltpu.VMEM((Bp, Hp), jnp.float32),
            ],
        ),
        compiler_params=pltpu.CompilerParams(
            dimension_semantics=("arbitrary",),        # sequential recurrence
            vmem_limit_bytes=32 * 1024 * 1024,
        ),
    )(lens_p, xp, xp, wih_f, wih_b, whh_f, whh_b, b_f, b_b)

    y = jnp.concatenate([yf[:T, :B, :H], yb[:T, :B, :H]], axis=-1)
    h_n = hn[:, :B, :H]
    c_n = cn[:, :B, :H]
    return y, (h_n, c_n), lens_half


# ----------------------------------------------------------------------------
# Pure-JAX reference (same packed-sequence masking semantics) for validation.
# ----------------------------------------------------------------------------
def _lstm_ref(x, lens, wih, whh, b, reverse):
    T, B, _ = x.shape
    H = whh.shape[1]
    wih_t, whh_t = wih.T, whh.T

    def step(carry, inp):
        h, c = carry
        x_t, time = inp
        gates = x_t @ wih_t + h @ whh_t + b
        i = jax.nn.sigmoid(gates[:, :H])
        f = jax.nn.sigmoid(gates[:, H:2 * H])
        g = jnp.tanh(gates[:, 2 * H:3 * H])
        o = jax.nn.sigmoid(gates[:, 3 * H:])
        c_new = f * c + i * g
        h_new = o * jnp.tanh(c_new)
        mask = (time < lens)[:, None]
        h = jnp.where(mask, h_new, h)
        c = jnp.where(mask, c_new, c)
        y = jnp.where(mask, h_new, 0.0)
        return (h, c), y

    times = jnp.arange(T)
    xs, ts = (x[::-1], times[::-1]) if reverse else (x, times)
    init = (jnp.zeros((B, H), jnp.float32), jnp.zeros((B, H), jnp.float32))
    (h, c), ys = lax.scan(step, init, (xs, ts))
    if reverse:
        ys = ys[::-1]
    return ys, h, c


def pblstm_ref(x, lens, params):
    L, B, F = x.shape
    L2 = (L // 2) * 2
    T = L2 // 2
    lens_half = lens // 2
    xp = x[:L2].reshape(T, 2, B, F).transpose(0, 2, 1, 3).reshape(T, B, 2 * F)
    pf, pb = params["fwd"], params["bwd"]
    yf, hf, cf = _lstm_ref(xp, lens_half, pf["wih"], pf["whh"], pf["b"], False)
    yb, hb, cb = _lstm_ref(xp, lens_half, pb["wih"], pb["whh"], pb["b"], True)
    y = jnp.concatenate([yf, yb], axis=-1)
    return y, (jnp.stack([hf, hb]), jnp.stack([cf, cb])), lens_half


# ----------------------------------------------------------------------------
if __name__ == "__main__":
    # TODO(synk): PackedSequence has no Pallas equivalent; it is emulated with a
    # zero-padded tensor + lengths (identical numerical semantics).
    input_dim, hidden_size = 16, 32
    L, B = 8, 2
    lens = jnp.array([8, 6], dtype=jnp.int32)   # sorted descending, like packed

    key = jax.random.PRNGKey(0)
    kx, kp = jax.random.split(key)
    x = jax.random.normal(kx, (L, B, input_dim), jnp.float32)
    # zero out padded positions, as pad_packed_sequence would produce
    tmask = (jnp.arange(L)[:, None] < lens[None, :])[:, :, None]
    x = x * tmask.astype(x.dtype)

    params = init_pblstm_params(kp, input_dim, hidden_size)

    # f32 path: tight validation against the pure-JAX reference.
    y, (h_n, c_n), new_lens = pblstm_forward(x, lens, params)
    jax.block_until_ready(y)
    jax.block_until_ready(h_n)
    jax.block_until_ready(c_n)

    y_r, (h_r, c_r), lens_r = pblstm_ref(x, lens, params)
    assert y.shape == (L // 2, B, 2 * hidden_size)
    assert h_n.shape == (2, B, hidden_size) and c_n.shape == (2, B, hidden_size)
    assert jnp.allclose(y, y_r, rtol=1e-4, atol=1e-4)
    assert jnp.allclose(h_n, h_r, rtol=1e-4, atol=1e-4)
    assert jnp.allclose(c_n, c_r, rtol=1e-4, atol=1e-4)
    assert jnp.array_equal(new_lens, lens_r)

    # bf16 compute path (bf16 MXU operands, f32 accumulation + f32 h/c state).
    y16, (h16, c16), _ = pblstm_forward(x, lens, params,
                                        compute_dtype=jnp.bfloat16)
    jax.block_until_ready(y16)
    assert jnp.allclose(y16, y_r, rtol=1e-1, atol=1e-1)

    print("KERNEL_OK")
</pallas_src>

<mosaic_0001>
module attributes {stable_mosaic.version = 11 : i64} {
  func.func @_pblstm_kernel(%arg0: i32, %arg1: memref<8x1xi32, #tpu.memory_space<vmem>>, %arg2: memref<4x8x32xf32, #tpu.memory_space<vmem>>, %arg3: memref<4x8x32xf32, #tpu.memory_space<vmem>>, %arg4: memref<32x512xf32, #tpu.memory_space<any>>, %arg5: memref<32x512xf32, #tpu.memory_space<any>>, %arg6: memref<128x512xf32, #tpu.memory_space<any>>, %arg7: memref<128x512xf32, #tpu.memory_space<any>>, %arg8: memref<1x512xf32, #tpu.memory_space<vmem>>, %arg9: memref<1x512xf32, #tpu.memory_space<vmem>>, %arg10: memref<4x8x128xf32, #tpu.memory_space<vmem>>, %arg11: memref<4x8x128xf32, #tpu.memory_space<vmem>>, %arg12: memref<2x8x128xf32, #tpu.memory_space<vmem>>, %arg13: memref<2x8x128xf32, #tpu.memory_space<vmem>>, %arg14: memref<32x512xf32, #tpu.memory_space<vmem>>, %arg15: memref<32x512xf32, #tpu.memory_space<vmem>>, %arg16: memref<128x512xf32, #tpu.memory_space<vmem>>, %arg17: memref<128x512xf32, #tpu.memory_space<vmem>>, %arg18: memref<4x!tpu.dma_semaphore, #tpu.memory_space<semaphore_mem>>, %arg19: memref<4x8x512xf32, #tpu.memory_space<vmem>>, %arg20: memref<4x8x512xf32, #tpu.memory_space<vmem>>, %arg21: memref<8x128xf32, #tpu.memory_space<vmem>>, %arg22: memref<8x128xf32, #tpu.memory_space<vmem>>, %arg23: memref<8x128xf32, #tpu.memory_space<vmem>>, %arg24: memref<8x128xf32, #tpu.memory_space<vmem>>) attributes {dimension_semantics = [#tpu.dimension_semantics<arbitrary>], iteration_bounds = array<i64: 1>, scalar_prefetch = 0 : i64, scratch_operands = 11 : i64, tpu.core_type = #tpu.core_type<tc>, window_params = [{pipeline_mode = #tpu.pipeline_mode<synchronous>, transform_indices = @transform_0, window_bounds = array<i64: 8, 1>}, {transform_indices = @transform_1, window_bounds = array<i64: 4, 8, 32>}, {transform_indices = @transform_2, window_bounds = array<i64: 4, 8, 32>}, {}, {}, {}, {}, {pipeline_mode = #tpu.pipeline_mode<synchronous>, transform_indices = @transform_7, window_bounds = array<i64: 1, 512>}, {pipeline_mode = #tpu.pipeline_mode<synchronous>, transform_indices = @transform_8, window_bounds = array<i64: 1, 512>}, {transform_indices = @transform_9, window_bounds = array<i64: 4, 8, 128>}, {transform_indices = @transform_10, window_bounds = array<i64: 4, 8, 128>}, {pipeline_mode = #tpu.pipeline_mode<synchronous>, transform_indices = @transform_11, window_bounds = array<i64: 2, 8, 128>}, {pipeline_mode = #tpu.pipeline_mode<synchronous>, transform_indices = @transform_12, window_bounds = array<i64: 2, 8, 128>}]} {
    %c0_i32 = arith.constant 0 : i32
    %0 = arith.cmpi eq, %arg0, %c0_i32 : i32
    %1 = arith.extui %0 : i1 to i32
    %c0_i32_0 = arith.constant 0 : i32
    %2 = arith.cmpi ne, %1, %c0_i32_0 : i32
    scf.if %2 {
      %c0_i32_149 = arith.constant 0 : i32
      %404 = tpu.memref_slice %arg18[%c0_i32_149] : memref<4x!tpu.dma_semaphore, #tpu.memory_space<semaphore_mem>> -> memref<1x!tpu.dma_semaphore, #tpu.memory_space<semaphore_mem>>
      %405 = tpu.memref_squeeze %404 : memref<1x!tpu.dma_semaphore, #tpu.memory_space<semaphore_mem>> -> memref<!tpu.dma_semaphore, #tpu.memory_space<semaphore_mem>>
      tpu.enqueue_dma source(%arg4 : memref<32x512xf32, #tpu.memory_space<any>>) target(%arg14 : memref<32x512xf32, #tpu.memory_space<vmem>>) target_semaphore(%405 : memref<!tpu.dma_semaphore, #tpu.memory_space<semaphore_mem>>)
      %c1_i32_150 = arith.constant 1 : i32
      %406 = tpu.memref_slice %arg18[%c1_i32_150] : memref<4x!tpu.dma_semaphore, #tpu.memory_space<semaphore_mem>> -> memref<1x!tpu.dma_semaphore, #tpu.memory_space<semaphore_mem>>
      %407 = tpu.memref_squeeze %406 : memref<1x!tpu.dma_semaphore, #tpu.memory_space<semaphore_mem>> -> memref<!tpu.dma_semaphore, #tpu.memory_space<semaphore_mem>>
      tpu.enqueue_dma source(%arg5 : memref<32x512xf32, #tpu.memory_space<any>>) target(%arg15 : memref<32x512xf32, #tpu.memory_space<vmem>>) target_semaphore(%407 : memref<!tpu.dma_semaphore, #tpu.memory_space<semaphore_mem>>)
      %c2_i32_151 = arith.constant 2 : i32
      %408 = tpu.memref_slice %arg18[%c2_i32_151] : memref<4x!tpu.dma_semaphore, #tpu.memory_space<semaphore_mem>> -> memref<1x!tpu.dma_semaphore, #tpu.memory_space<semaphore_mem>>
      %409 = tpu.memref_squeeze %408 : memref<1x!tpu.dma_semaphore, #tpu.memory_space<semaphore_mem>> -> memref<!tpu.dma_semaphore, #tpu.memory_space<semaphore_mem>>
      tpu.enqueue_dma source(%arg6 : memref<128x512xf32, #tpu.memory_space<any>>) target(%arg16 : memref<128x512xf32, #tpu.memory_space<vmem>>) target_semaphore(%409 : memref<!tpu.dma_semaphore, #tpu.memory_space<semaphore_mem>>)
      %c3_i32_152 = arith.constant 3 : i32
      %410 = tpu.memref_slice %arg18[%c3_i32_152] : memref<4x!tpu.dma_semaphore, #tpu.memory_space<semaphore_mem>> -> memref<1x!tpu.dma_semaphore, #tpu.memory_space<semaphore_mem>>
      %411 = tpu.memref_squeeze %410 : memref<1x!tpu.dma_semaphore, #tpu.memory_space<semaphore_mem>> -> memref<!tpu.dma_semaphore, #tpu.memory_space<semaphore_mem>>
      tpu.enqueue_dma source(%arg7 : memref<128x512xf32, #tpu.memory_space<any>>) target(%arg17 : memref<128x512xf32, #tpu.memory_space<vmem>>) target_semaphore(%411 : memref<!tpu.dma_semaphore, #tpu.memory_space<semaphore_mem>>)
      %c0_i32_153 = arith.constant 0 : i32
      %412 = tpu.memref_slice %arg18[%c0_i32_153] : memref<4x!tpu.dma_semaphore, #tpu.memory_space<semaphore_mem>> -> memref<1x!tpu.dma_semaphore, #tpu.memory_space<semaphore_mem>>
      %413 = tpu.memref_squeeze %412 : memref<1x!tpu.dma_semaphore, #tpu.memory_space<semaphore_mem>> -> memref<!tpu.dma_semaphore, #tpu.memory_space<semaphore_mem>>
      tpu.wait_dma2 semaphore(%413 : memref<!tpu.dma_semaphore, #tpu.memory_space<semaphore_mem>>) src(%arg4 : memref<32x512xf32, #tpu.memory_space<any>>) dst(%arg14 : memref<32x512xf32, #tpu.memory_space<vmem>>)
      %c1_i32_154 = arith.constant 1 : i32
      %414 = tpu.memref_slice %arg18[%c1_i32_154] : memref<4x!tpu.dma_semaphore, #tpu.memory_space<semaphore_mem>> -> memref<1x!tpu.dma_semaphore, #tpu.memory_space<semaphore_mem>>
      %415 = tpu.memref_squeeze %414 : memref<1x!tpu.dma_semaphore, #tpu.memory_space<semaphore_mem>> -> memref<!tpu.dma_semaphore, #tpu.memory_space<semaphore_mem>>
      tpu.wait_dma2 semaphore(%415 : memref<!tpu.dma_semaphore, #tpu.memory_space<semaphore_mem>>) src(%arg5 : memref<32x512xf32, #tpu.memory_space<any>>) dst(%arg15 : memref<32x512xf32, #tpu.memory_space<vmem>>)
      %c2_i32_155 = arith.constant 2 : i32
      %416 = tpu.memref_slice %arg18[%c2_i32_155] : memref<4x!tpu.dma_semaphore, #tpu.memory_space<semaphore_mem>> -> memref<1x!tpu.dma_semaphore, #tpu.memory_space<semaphore_mem>>
      %417 = tpu.memref_squeeze %416 : memref<1x!tpu.dma_semaphore, #tpu.memory_space<semaphore_mem>> -> memref<!tpu.dma_semaphore, #tpu.memory_space<semaphore_mem>>
      tpu.wait_dma2 semaphore(%417 : memref<!tpu.dma_semaphore, #tpu.memory_space<semaphore_mem>>) src(%arg6 : memref<128x512xf32, #tpu.memory_space<any>>) dst(%arg16 : memref<128x512xf32, #tpu.memory_space<vmem>>)
      %c3_i32_156 = arith.constant 3 : i32
      %418 = tpu.memref_slice %arg18[%c3_i32_156] : memref<4x!tpu.dma_semaphore, #tpu.memory_space<semaphore_mem>> -> memref<1x!tpu.dma_semaphore, #tpu.memory_space<semaphore_mem>>
      %419 = tpu.memref_squeeze %418 : memref<1x!tpu.dma_semaphore, #tpu.memory_space<semaphore_mem>> -> memref<!tpu.dma_semaphore, #tpu.memory_space<semaphore_mem>>
      tpu.wait_dma2 semaphore(%419 : memref<!tpu.dma_semaphore, #tpu.memory_space<semaphore_mem>>) src(%arg7 : memref<128x512xf32, #tpu.memory_space<any>>) dst(%arg17 : memref<128x512xf32, #tpu.memory_space<vmem>>)
      %cst_157 = arith.constant 0.000000e+00 : f32
      %420 = vector.broadcast %cst_157 : f32 to vector<8x128xf32>
      %c0_158 = arith.constant 0 : index
      %c0_159 = arith.constant 0 : index
      %421 = vector.load %arg21[%c0_158, %c0_159] : memref<8x128xf32, #tpu.memory_space<vmem>>, vector<8x128xf32>
      tpu.vector_store %arg21[%c0_158, %c0_159], %420 {strides = array<i32>} : memref<8x128xf32, #tpu.memory_space<vmem>>, vector<8x128xf32>,
      %cst_160 = arith.constant 0.000000e+00 : f32
      %422 = vector.broadcast %cst_160 : f32 to vector<8x128xf32>
      %c0_161 = arith.constant 0 : index
      %c0_162 = arith.constant 0 : index
      %423 = vector.load %arg22[%c0_161, %c0_162] : memref<8x128xf32, #tpu.memory_space<vmem>>, vector<8x128xf32>
      tpu.vector_store %arg22[%c0_161, %c0_162], %422 {strides = array<i32>} : memref<8x128xf32, #tpu.memory_space<vmem>>, vector<8x128xf32>,
      %cst_163 = arith.constant 0.000000e+00 : f32
      %424 = vector.broadcast %cst_163 : f32 to vector<8x128xf32>
      %c0_164 = arith.constant 0 : index
      %c0_165 = arith.constant 0 : index
      %425 = vector.load %arg23[%c0_164, %c0_165] : memref<8x128xf32, #tpu.memory_space<vmem>>, vector<8x128xf32>
      tpu.vector_store %arg23[%c0_164, %c0_165], %424 {strides = array<i32>} : memref<8x128xf32, #tpu.memory_space<vmem>>, vector<8x128xf32>,
      %cst_166 = arith.constant 0.000000e+00 : f32
      %426 = vector.broadcast %cst_166 : f32 to vector<8x128xf32>
      %c0_167 = arith.constant 0 : index
      %c0_168 = arith.constant 0 : index
      %427 = vector.load %arg24[%c0_167, %c0_168] : memref<8x128xf32, #tpu.memory_space<vmem>>, vector<8x128xf32>
      tpu.vector_store %arg24[%c0_167, %c0_168], %426 {strides = array<i32>} : memref<8x128xf32, #tpu.memory_space<vmem>>, vector<8x128xf32>,
    } else {
    }
    %c0 = arith.constant 0 : index
    %c0_1 = arith.constant 0 : index
    %3 = vector.load %arg1[%c0, %c0_1] : memref<8x1xi32, #tpu.memory_space<vmem>>, vector<8x1xi32>
    %c0_2 = arith.constant 0 : index
    %c0_3 = arith.constant 0 : index
    %c0_4 = arith.constant 0 : index
    %4 = vector.load %arg2[%c0_2, %c0_3, %c0_4] : memref<4x8x32xf32, #tpu.memory_space<vmem>>, vector<4x8x32xf32>
    %5 = vector.shape_cast %4 : vector<4x8x32xf32> to vector<32x32xf32>
    %c0_5 = arith.constant 0 : index
    %c0_6 = arith.constant 0 : index
    %c0_7 = arith.constant 0 : index
    %6 = vector.load %arg3[%c0_5, %c0_6, %c0_7] : memref<4x8x32xf32, #tpu.memory_space<vmem>>, vector<4x8x32xf32>
    %7 = vector.shape_cast %6 : vector<4x8x32xf32> to vector<32x32xf32>
    %c0_8 = arith.constant 0 : index
    %c0_9 = arith.constant 0 : index
    %8 = vector.load %arg14[%c0_8, %c0_9] : memref<32x512xf32, #tpu.memory_space<vmem>>, vector<32x512xf32>
    %cst = arith.constant dense<0.000000e+00> : vector<32x512xf32>
    %9 = tpu.matmul %5, %8, %cst {dimension_numbers = #tpu.dot_dimension_numbers<[1], [0], [0], [1], [0, 0, 1, 1], [], []>} : vector<32x32xf32>, vector<32x512xf32>, vector<32x512xf32> -> vector<32x512xf32>
    %c0_10 = arith.constant 0 : index
    %c0_11 = arith.constant 0 : index
    %10 = vector.load %arg8[%c0_10, %c0_11] : memref<1x512xf32, #tpu.memory_space<vmem>>, vector<1x512xf32>
    %11 = vector.broadcast %10 : vector<1x512xf32> to vector<32x512xf32>
    %12 = arith.addf %9, %11 : vector<32x512xf32>
    %c0_12 = arith.constant 0 : index
    %c0_13 = arith.constant 0 : index
    %13 = vector.load %arg15[%c0_12, %c0_13] : memref<32x512xf32, #tpu.memory_space<vmem>>, vector<32x512xf32>
    %cst_14 = arith.constant dense<0.000000e+00> : vector<32x512xf32>
    %14 = tpu.matmul %7, %13, %cst_14 {dimension_numbers = #tpu.dot_dimension_numbers<[1], [0], [0], [1], [0, 0, 1, 1], [], []>} : vector<32x32xf32>, vector<32x512xf32>, vector<32x512xf32> -> vector<32x512xf32>
    %c0_15 = arith.constant 0 : index
    %c0_16 = arith.constant 0 : index
    %15 = vector.load %arg9[%c0_15, %c0_16] : memref<1x512xf32, #tpu.memory_space<vmem>>, vector<1x512xf32>
    %16 = vector.broadcast %15 : vector<1x512xf32> to vector<32x512xf32>
    %17 = arith.addf %14, %16 : vector<32x512xf32>
    %18 = vector.shape_cast %12 : vector<32x512xf32> to vector<4x8x512xf32>
    %c0_17 = arith.constant 0 : index
    %c0_18 = arith.constant 0 : index
    %c0_19 = arith.constant 0 : index
    %19 = vector.load %arg19[%c0_17, %c0_18, %c0_19] : memref<4x8x512xf32, #tpu.memory_space<vmem>>, vector<4x8x512xf32>
    tpu.vector_store %arg19[%c0_17, %c0_18, %c0_19], %18 {strides = array<i32>} : memref<4x8x512xf32, #tpu.memory_space<vmem>>, vector<4x8x512xf32>,
    %20 = vector.shape_cast %17 : vector<32x512xf32> to vector<4x8x512xf32>
    %c0_20 = arith.constant 0 : index
    %c0_21 = arith.constant 0 : index
    %c0_22 = arith.constant 0 : index
    %21 = vector.load %arg20[%c0_20, %c0_21, %c0_22] : memref<4x8x512xf32, #tpu.memory_space<vmem>>, vector<4x8x512xf32>
    tpu.vector_store %arg20[%c0_20, %c0_21, %c0_22], %20 {strides = array<i32>} : memref<4x8x512xf32, #tpu.memory_space<vmem>>, vector<4x8x512xf32>,
    %c0_23 = arith.constant 0 : index
    %c0_24 = arith.constant 0 : index
    %22 = vector.load %arg21[%c0_23, %c0_24] : memref<8x128xf32, #tpu.memory_space<vmem>>, vector<8x128xf32>
    %c0_25 = arith.constant 0 : index
    %c0_26 = arith.constant 0 : index
    %23 = vector.load %arg22[%c0_25, %c0_26] : memref<8x128xf32, #tpu.memory_space<vmem>>, vector<8x128xf32>
    %c0_27 = arith.constant 0 : index
    %c0_28 = arith.constant 0 : index
    %24 = vector.load %arg23[%c0_27, %c0_28] : memref<8x128xf32, #tpu.memory_space<vmem>>, vector<8x128xf32>
    %c0_29 = arith.constant 0 : index
    %c0_30 = arith.constant 0 : index
    %25 = vector.load %arg24[%c0_29, %c0_30] : memref<8x128xf32, #tpu.memory_space<vmem>>, vector<8x128xf32>
    %c4_i32 = arith.constant 4 : i32
    %26 = arith.muli %arg0, %c4_i32 : i32
    %c0_i32_31 = arith.constant 0 : i32
    %27 = arith.subi %c0_i32_31, %arg0 : i32
    %c4_i32_32 = arith.constant 4 : i32
    %28 = arith.muli %27, %c4_i32_32 : i32
    %c0_i32_33 = arith.constant 0 : i32
    %29 = arith.addi %26, %c0_i32_33 : i32
    %c0_34 = arith.constant 0 : index
    %c0_35 = arith.constant 0 : index
    %c0_36 = arith.constant 0 : index
    %30 = vector.load %arg19[%c0_34, %c0_35, %c0_36] : memref<4x8x512xf32, #tpu.memory_space<vmem>>, vector<1x8x512xf32>
    %31 = vector.shape_cast %30 : vector<1x8x512xf32> to vector<8x512xf32>
    %c0_37 = arith.constant 0 : index
    %c0_38 = arith.constant 0 : index
    %32 = vector.load %arg16[%c0_37, %c0_38] : memref<128x512xf32, #tpu.memory_space<vmem>>, vector<128x512xf32>
    %cst_39 = arith.constant dense<0.000000e+00> : vector<8x512xf32>
    %33 = tpu.matmul %22, %32, %cst_39 {dimension_numbers = #tpu.dot_dimension_numbers<[1], [0], [0], [1], [0, 0, 1, 1], [], []>} : vector<8x128xf32>, vector<128x512xf32>, vector<8x512xf32> -> vector<8x512xf32>
    %34 = arith.addf %31, %33 : vector<8x512xf32>
    %35 = vector.extract_strided_slice %34 {offsets = [0, 0], sizes = [8, 128], strides = [1, 1]} : vector<8x512xf32> to vector<8x128xf32>
    %36 = arith.negf %35 : vector<8x128xf32>
    %37 = math.exp %36 : vector<8x128xf32>
    %cst_40 = arith.constant 1.000000e+00 : f32
    %38 = vector.broadcast %cst_40 : f32 to vector<8x128xf32>
    %39 = arith.addf %38, %37 : vector<8x128xf32>
    %40 = arith.divf %38, %39 : vector<8x128xf32>
    %41 = vector.extract_strided_slice %34 {offsets = [0, 128], sizes = [8, 128], strides = [1, 1]} : vector<8x512xf32> to vector<8x128xf32>
    %42 = arith.negf %41 : vector<8x128xf32>
    %43 = math.exp %42 : vector<8x128xf32>
    %cst_41 = arith.constant 1.000000e+00 : f32
    %44 = vector.broadcast %cst_41 : f32 to vector<8x128xf32>
    %45 = arith.addf %44, %43 : vector<8x128xf32>
    %46 = arith.divf %44, %45 : vector<8x128xf32>
    %47 = vector.extract_strided_slice %34 {offsets = [0, 256], sizes = [8, 128], strides = [1, 1]} : vector<8x512xf32> to vector<8x128xf32>
    %48 = math.tanh %47 : vector<8x128xf32>
    %49 = vector.extract_strided_slice %34 {offsets = [0, 384], sizes = [8, 128], strides = [1, 1]} : vector<8x512xf32> to vector<8x128xf32>
    %50 = arith.negf %49 : vector<8x128xf32>
    %51 = math.exp %50 : vector<8x128xf32>
    %cst_42 = arith.constant 1.000000e+00 : f32
    %52 = vector.broadcast %cst_42 : f32 to vector<8x128xf32>
    %53 = arith.addf %52, %51 : vector<8x128xf32>
    %54 = arith.divf %52, %53 : vector<8x128xf32>
    %55 = arith.mulf %46, %23 : vector<8x128xf32>
    %56 = arith.mulf %40, %48 : vector<8x128xf32>
    %57 = arith.addf %55, %56 : vector<8x128xf32>
    %58 = math.tanh %57 : vector<8x128xf32>
    %59 = arith.mulf %54, %58 : vector<8x128xf32>
    %60 = vector.broadcast %29 : i32 to vector<8x1xi32>
    %61 = arith.cmpi slt, %60, %3 : vector<8x1xi32>
    %62 = vector.shape_cast %61 : vector<8x1xi1> to vector<8x1xi1>
    %63 = vector.broadcast %62 : vector<8x1xi1> to vector<8x128xi1>
    %64 = arith.select %63, %59, %22 : vector<8x128xi1>, vector<8x128xf32>
    %65 = vector.shape_cast %61 : vector<8x1xi1> to vector<8x1xi1>
    %66 = vector.broadcast %65 : vector<8x1xi1> to vector<8x128xi1>
    %67 = arith.select %66, %57, %23 : vector<8x128xi1>, vector<8x128xf32>
    %cst_43 = arith.constant 0.000000e+00 : f32
    %68 = vector.broadcast %cst_43 : f32 to vector<8x128xf32>
    %69 = vector.shape_cast %61 : vector<8x1xi1> to vector<8x1xi1>
    %70 = vector.broadcast %69 : vector<8x1xi1> to vector<8x128xi1>
    %71 = arith.select %70, %59, %68 : vector<8x128xi1>, vector<8x128xf32>
    %c0_44 = arith.constant 0 : index
    %c0_45 = arith.constant 0 : index
    %c0_46 = arith.constant 0 : index
    %72 = vector.load %arg10[%c0_44, %c0_45, %c0_46] : memref<4x8x128xf32, #tpu.memory_space<vmem>>, vector<1x8x128xf32>
    %73 = vector.shape_cast %72 : vector<1x8x128xf32> to vector<8x128xf32>
    %74 = vector.shape_cast %71 : vector<8x128xf32> to vector<1x8x128xf32>
    tpu.vector_store %arg10[%c0_44, %c0_45, %c0_46], %74 {strides = array<i32>} : memref<4x8x128xf32, #tpu.memory_space<vmem>>, vector<1x8x128xf32>,
    %c3_i32 = arith.constant 3 : i32
    %75 = arith.addi %28, %c3_i32 : i32
    %c3 = arith.constant 3 : index
    %c0_47 = arith.constant 0 : index
    %c0_48 = arith.constant 0 : index
    %76 = vector.load %arg20[%c3, %c0_47, %c0_48] : memref<4x8x512xf32, #tpu.memory_space<vmem>>, vector<1x8x512xf32>
    %77 = vector.shape_cast %76 : vector<1x8x512xf32> to vector<8x512xf32>
    %c0_49 = arith.constant 0 : index
    %c0_50 = arith.constant 0 : index
    %78 = vector.load %arg17[%c0_49, %c0_50] : memref<128x512xf32, #tpu.memory_space<vmem>>, vector<128x512xf32>
    %cst_51 = arith.constant dense<0.000000e+00> : vector<8x512xf32>
    %79 = tpu.matmul %24, %78, %cst_51 {dimension_numbers = #tpu.dot_dimension_numbers<[1], [0], [0], [1], [0, 0, 1, 1], [], []>} : vector<8x128xf32>, vector<128x512xf32>, vector<8x512xf32> -> vector<8x512xf32>
    %80 = arith.addf %77, %79 : vector<8x512xf32>
    %81 = vector.extract_strided_slice %80 {offsets = [0, 0], sizes = [8, 128], strides = [1, 1]} : vector<8x512xf32> to vector<8x128xf32>
    %82 = arith.negf %81 : vector<8x128xf32>
    %83 = math.exp %82 : vector<8x128xf32>
    %cst_52 = arith.constant 1.000000e+00 : f32
    %84 = vector.broadcast %cst_52 : f32 to vector<8x128xf32>
    %85 = arith.addf %84, %83 : vector<8x128xf32>
    %86 = arith.divf %84, %85 : vector<8x128xf32>
    %87 = vector.extract_strided_slice %80 {offsets = [0, 128], sizes = [8, 128], strides = [1, 1]} : vector<8x512xf32> to vector<8x128xf32>
    %88 = arith.negf %87 : vector<8x128xf32>
    %89 = math.exp %88 : vector<8x128xf32>
    %cst_53 = arith.constant 1.000000e+00 : f32
    %90 = vector.broadcast %cst_53 : f32 to vector<8x128xf32>
    %91 = arith.addf %90, %89 : vector<8x128xf32>
    %92 = arith.divf %90, %91 : vector<8x128xf32>
    %93 = vector.extract_strided_slice %80 {offsets = [0, 256], sizes = [8, 128], strides = [1, 1]} : vector<8x512xf32> to vector<8x128xf32>
    %94 = math.tanh %93 : vector<8x128xf32>
    %95 = vector.extract_strided_slice %80 {offsets = [0, 384], sizes = [8, 128], strides = [1, 1]} : vector<8x512xf32> to vector<8x128xf32>
    %96 = arith.negf %95 : vector<8x128xf32>
    %97 = math.exp %96 : vector<8x128xf32>
    %cst_54 = arith.constant 1.000000e+00 : f32
    %98 = vector.broadcast %cst_54 : f32 to vector<8x128xf32>
    %99 = arith.addf %98, %97 : vector<8x128xf32>
    %100 = arith.divf %98, %99 : vector<8x128xf32>
    %101 = arith.mulf %92, %25 : vector<8x128xf32>
    %102 = arith.mulf %86, %94 : vector<8x128xf32>
    %103 = arith.addf %101, %102 : vector<8x128xf32>
    %104 = math.tanh %103 : vector<8x128xf32>
    %105 = arith.mulf %100, %104 : vector<8x128xf32>
    %106 = vector.broadcast %75 : i32 to vector<8x1xi32>
    %107 = arith.cmpi slt, %106, %3 : vector<8x1xi32>
    %108 = vector.shape_cast %107 : vector<8x1xi1> to vector<8x1xi1>
    %109 = vector.broadcast %108 : vector<8x1xi1> to vector<8x128xi1>
    %110 = arith.select %109, %105, %24 : vector<8x128xi1>, vector<8x128xf32>
    %111 = vector.shape_cast %107 : vector<8x1xi1> to vector<8x1xi1>
    %112 = vector.broadcast %111 : vector<8x1xi1> to vector<8x128xi1>
    %113 = arith.select %112, %103, %25 : vector<8x128xi1>, vector<8x128xf32>
    %cst_55 = arith.constant 0.000000e+00 : f32
    %114 = vector.broadcast %cst_55 : f32 to vector<8x128xf32>
    %115 = vector.shape_cast %107 : vector<8x1xi1> to vector<8x1xi1>
    %116 = vector.broadcast %115 : vector<8x1xi1> to vector<8x128xi1>
    %117 = arith.select %116, %105, %114 : vector<8x128xi1>, vector<8x128xf32>
    %c3_56 = arith.constant 3 : index
    %c0_57 = arith.constant 0 : index
    %c0_58 = arith.constant 0 : index
    %118 = vector.load %arg11[%c3_56, %c0_57, %c0_58] : memref<4x8x128xf32, #tpu.memory_space<vmem>>, vector<1x8x128xf32>
    %119 = vector.shape_cast %118 : vector<1x8x128xf32> to vector<8x128xf32>
    %120 = vector.shape_cast %117 : vector<8x128xf32> to vector<1x8x128xf32>
    tpu.vector_store %arg11[%c3_56, %c0_57, %c0_58], %120 {strides = array<i32>} : memref<4x8x128xf32, #tpu.memory_space<vmem>>, vector<1x8x128xf32>,
    %c1_i32 = arith.constant 1 : i32
    %121 = arith.addi %26, %c1_i32 : i32
    %c1 = arith.constant 1 : index
    %c0_59 = arith.constant 0 : index
    %c0_60 = arith.constant 0 : index
    %122 = vector.load %arg19[%c1, %c0_59, %c0_60] : memref<4x8x512xf32, #tpu.memory_space<vmem>>, vector<1x8x512xf32>
    %123 = vector.shape_cast %122 : vector<1x8x512xf32> to vector<8x512xf32>
    %c0_61 = arith.constant 0 : index
    %c0_62 = arith.constant 0 : index
    %124 = vector.load %arg16[%c0_61, %c0_62] : memref<128x512xf32, #tpu.memory_space<vmem>>, vector<128x512xf32>
    %cst_63 = arith.constant dense<0.000000e+00> : vector<8x512xf32>
    %125 = tpu.matmul %64, %124, %cst_63 {dimension_numbers = #tpu.dot_dimension_numbers<[1], [0], [0], [1], [0, 0, 1, 1], [], []>} : vector<8x128xf32>, vector<128x512xf32>, vector<8x512xf32> -> vector<8x512xf32>
    %126 = arith.addf %123, %125 : vector<8x512xf32>
    %127 = vector.extract_strided_slice %126 {offsets = [0, 0], sizes = [8, 128], strides = [1, 1]} : vector<8x512xf32> to vector<8x128xf32>
    %128 = arith.negf %127 : vector<8x128xf32>
    %129 = math.exp %128 : vector<8x128xf32>
    %cst_64 = arith.constant 1.000000e+00 : f32
    %130 = vector.broadcast %cst_64 : f32 to vector<8x128xf32>
    %131 = arith.addf %130, %129 : vector<8x128xf32>
    %132 = arith.divf %130, %131 : vector<8x128xf32>
    %133 = vector.extract_strided_slice %126 {offsets = [0, 128], sizes = [8, 128], strides = [1, 1]} : vector<8x512xf32> to vector<8x128xf32>
    %134 = arith.negf %133 : vector<8x128xf32>
    %135 = math.exp %134 : vector<8x128xf32>
    %cst_65 = arith.constant 1.000000e+00 : f32
    %136 = vector.broadcast %cst_65 : f32 to vector<8x128xf32>
    %137 = arith.addf %136, %135 : vector<8x128xf32>
    %138 = arith.divf %136, %137 : vector<8x128xf32>
    %139 = vector.extract_strided_slice %126 {offsets = [0, 256], sizes = [8, 128], strides = [1, 1]} : vector<8x512xf32> to vector<8x128xf32>
    %140 = math.tanh %139 : vector<8x128xf32>
    %141 = vector.extract_strided_slice %126 {offsets = [0, 384], sizes = [8, 128], strides = [1, 1]} : vector<8x512xf32> to vector<8x128xf32>
    %142 = arith.negf %141 : vector<8x128xf32>
    %143 = math.exp %142 : vector<8x128xf32>
    %cst_66 = arith.constant 1.000000e+00 : f32
    %144 = vector.broadcast %cst_66 : f32 to vector<8x128xf32>
    %145 = arith.addf %144, %143 : vector<8x128xf32>
    %146 = arith.divf %144, %145 : vector<8x128xf32>
    %147 = arith.mulf %138, %67 : vector<8x128xf32>
    %148 = arith.mulf %132, %140 : vector<8x128xf32>
    %149 = arith.addf %147, %148 : vector<8x128xf32>
    %150 = math.tanh %149 : vector<8x128xf32>
    %151 = arith.mulf %146, %150 : vector<8x128xf32>
    %152 = vector.broadcast %121 : i32 to vector<8x1xi32>
    %153 = arith.cmpi slt, %152, %3 : vector<8x1xi32>
    %154 = vector.shape_cast %153 : vector<8x1xi1> to vector<8x1xi1>
    %155 = vector.broadcast %154 : vector<8x1xi1> to vector<8x128xi1>
    %156 = arith.select %155, %151, %64 : vector<8x128xi1>, vector<8x128xf32>
    %157 = vector.shape_cast %153 : vector<8x1xi1> to vector<8x1xi1>
    %158 = vector.broadcast %157 : vector<8x1xi1> to vector<8x128xi1>
    %159 = arith.select %158, %149, %67 : vector<8x128xi1>, vector<8x128xf32>
    %cst_67 = arith.constant 0.000000e+00 : f32
    %160 = vector.broadcast %cst_67 : f32 to vector<8x128xf32>
    %161 = vector.shape_cast %153 : vector<8x1xi1> to vector<8x1xi1>
    %162 = vector.broadcast %161 : vector<8x1xi1> to vector<8x128xi1>
    %163 = arith.select %162, %151, %160 : vector<8x128xi1>, vector<8x128xf32>
    %c1_68 = arith.constant 1 : index
    %c0_69 = arith.constant 0 : index
    %c0_70 = arith.constant 0 : index
    %164 = vector.load %arg10[%c1_68, %c0_69, %c0_70] : memref<4x8x128xf32, #tpu.memory_space<vmem>>, vector<1x8x128xf32>
    %165 = vector.shape_cast %164 : vector<1x8x128xf32> to vector<8x128xf32>
    %166 = vector.shape_cast %163 : vector<8x128xf32> to vector<1x8x128xf32>
    tpu.vector_store %arg10[%c1_68, %c0_69, %c0_70], %166 {strides = array<i32>} : memref<4x8x128xf32, #tpu.memory_space<vmem>>, vector<1x8x128xf32>,
    %c2_i32 = arith.constant 2 : i32
    %167 = arith.addi %28, %c2_i32 : i32
    %c2 = arith.constant 2 : index
    %c0_71 = arith.constant 0 : index
    %c0_72 = arith.constant 0 : index
    %168 = vector.load %arg20[%c2, %c0_71, %c0_72] : memref<4x8x512xf32, #tpu.memory_space<vmem>>, vector<1x8x512xf32>
    %169 = vector.shape_cast %168 : vector<1x8x512xf32> to vector<8x512xf32>
    %c0_73 = arith.constant 0 : index
    %c0_74 = arith.constant 0 : index
    %170 = vector.load %arg17[%c0_73, %c0_74] : memref<128x512xf32, #tpu.memory_space<vmem>>, vector<128x512xf32>
    %cst_75 = arith.constant dense<0.000000e+00> : vector<8x512xf32>
    %171 = tpu.matmul %110, %170, %cst_75 {dimension_numbers = #tpu.dot_dimension_numbers<[1], [0], [0], [1], [0, 0, 1, 1], [], []>} : vector<8x128xf32>, vector<128x512xf32>, vector<8x512xf32> -> vector<8x512xf32>
    %172 = arith.addf %169, %171 : vector<8x512xf32>
    %173 = vector.extract_strided_slice %172 {offsets = [0, 0], sizes = [8, 128], strides = [1, 1]} : vector<8x512xf32> to vector<8x128xf32>
    %174 = arith.negf %173 : vector<8x128xf32>
    %175 = math.exp %174 : vector<8x128xf32>
    %cst_76 = arith.constant 1.000000e+00 : f32
    %176 = vector.broadcast %cst_76 : f32 to vector<8x128xf32>
    %177 = arith.addf %176, %175 : vector<8x128xf32>
    %178 = arith.divf %176, %177 : vector<8x128xf32>
    %179 = vector.extract_strided_slice %172 {offsets = [0, 128], sizes = [8, 128], strides = [1, 1]} : vector<8x512xf32> to vector<8x128xf32>
    %180 = arith.negf %179 : vector<8x128xf32>
    %181 = math.exp %180 : vector<8x128xf32>
    %cst_77 = arith.constant 1.000000e+00 : f32
    %182 = vector.broadcast %cst_77 : f32 to vector<8x128xf32>
    %183 = arith.addf %182, %181 : vector<8x128xf32>
    %184 = arith.divf %182, %183 : vector<8x128xf32>
    %185 = vector.extract_strided_slice %172 {offsets = [0, 256], sizes = [8, 128], strides = [1, 1]} : vector<8x512xf32> to vector<8x128xf32>
    %186 = math.tanh %185 : vector<8x128xf32>
    %187 = vector.extract_strided_slice %172 {offsets = [0, 384], sizes = [8, 128], strides = [1, 1]} : vector<8x512xf32> to vector<8x128xf32>
    %188 = arith.negf %187 : vector<8x128xf32>
    %189 = math.exp %188 : vector<8x128xf32>
    %cst_78 = arith.constant 1.000000e+00 : f32
    %190 = vector.broadcast %cst_78 : f32 to vector<8x128xf32>
    %191 = arith.addf %190, %189 : vector<8x128xf32>
    %192 = arith.divf %190, %191 : vector<8x128xf32>
    %193 = arith.mulf %184, %113 : vector<8x128xf32>
    %194 = arith.mulf %178, %186 : vector<8x128xf32>
    %195 = arith.addf %193, %194 : vector<8x128xf32>
    %196 = math.tanh %195 : vector<8x128xf32>
    %197 = arith.mulf %192, %196 : vector<8x128xf32>
    %198 = vector.broadcast %167 : i32 to vector<8x1xi32>
    %199 = arith.cmpi slt, %198, %3 : vector<8x1xi32>
    %200 = vector.shape_cast %199 : vector<8x1xi1> to vector<8x1xi1>
    %201 = vector.broadcast %200 : vector<8x1xi1> to vector<8x128xi1>
    %202 = arith.select %201, %197, %110 : vector<8x128xi1>, vector<8x128xf32>
    %203 = vector.shape_cast %199 : vector<8x1xi1> to vector<8x1xi1>
    %204 = vector.broadcast %203 : vector<8x1xi1> to vector<8x128xi1>
    %205 = arith.select %204, %195, %113 : vector<8x128xi1>, vector<8x128xf32>
    %cst_79 = arith.constant 0.000000e+00 : f32
    %206 = vector.broadcast %cst_79 : f32 to vector<8x128xf32>
    %207 = vector.shape_cast %199 : vector<8x1xi1> to vector<8x1xi1>
    %208 = vector.broadcast %207 : vector<8x1xi1> to vector<8x128xi1>
    %209 = arith.select %208, %197, %206 : vector<8x128xi1>, vector<8x128xf32>
    %c2_80 = arith.constant 2 : index
    %c0_81 = arith.constant 0 : index
    %c0_82 = arith.constant 0 : index
    %210 = vector.load %arg11[%c2_80, %c0_81, %c0_82] : memref<4x8x128xf32, #tpu.memory_space<vmem>>, vector<1x8x128xf32>
    %211 = vector.shape_cast %210 : vector<1x8x128xf32> to vector<8x128xf32>
    %212 = vector.shape_cast %209 : vector<8x128xf32> to vector<1x8x128xf32>
    tpu.vector_store %arg11[%c2_80, %c0_81, %c0_82], %212 {strides = array<i32>} : memref<4x8x128xf32, #tpu.memory_space<vmem>>, vector<1x8x128xf32>,
    %c2_i32_83 = arith.constant 2 : i32
    %213 = arith.addi %26, %c2_i32_83 : i32
    %c2_84 = arith.constant 2 : index
    %c0_85 = arith.constant 0 : index
    %c0_86 = arith.constant 0 : index
    %214 = vector.load %arg19[%c2_84, %c0_85, %c0_86] : memref<4x8x512xf32, #tpu.memory_space<vmem>>, vector<1x8x512xf32>
    %215 = vector.shape_cast %214 : vector<1x8x512xf32> to vector<8x512xf32>
    %c0_87 = arith.constant 0 : index
    %c0_88 = arith.constant 0 : index
    %216 = vector.load %arg16[%c0_87, %c0_88] : memref<128x512xf32, #tpu.memory_space<vmem>>, vector<128x512xf32>
    %cst_89 = arith.constant dense<0.000000e+00> : vector<8x512xf32>
    %217 = tpu.matmul %156, %216, %cst_89 {dimension_numbers = #tpu.dot_dimension_numbers<[1], [0], [0], [1], [0, 0, 1, 1], [], []>} : vector<8x128xf32>, vector<128x512xf32>, vector<8x512xf32> -> vector<8x512xf32>
    %218 = arith.addf %215, %217 : vector<8x512xf32>
    %219 = vector.extract_strided_slice %218 {offsets = [0, 0], sizes = [8, 128], strides = [1, 1]} : vector<8x512xf32> to vector<8x128xf32>
    %220 = arith.negf %219 : vector<8x128xf32>
    %221 = math.exp %220 : vector<8x128xf32>
    %cst_90 = arith.constant 1.000000e+00 : f32
    %222 = vector.broadcast %cst_90 : f32 to vector<8x128xf32>
    %223 = arith.addf %222, %221 : vector<8x128xf32>
    %224 = arith.divf %222, %223 : vector<8x128xf32>
    %225 = vector.extract_strided_slice %218 {offsets = [0, 128], sizes = [8, 128], strides = [1, 1]} : vector<8x512xf32> to vector<8x128xf32>
    %226 = arith.negf %225 : vector<8x128xf32>
    %227 = math.exp %226 : vector<8x128xf32>
    %cst_91 = arith.constant 1.000000e+00 : f32
    %228 = vector.broadcast %cst_91 : f32 to vector<8x128xf32>
    %229 = arith.addf %228, %227 : vector<8x128xf32>
    %230 = arith.divf %228, %229 : vector<8x128xf32>
    %231 = vector.extract_strided_slice %218 {offsets = [0, 256], sizes = [8, 128], strides = [1, 1]} : vector<8x512xf32> to vector<8x128xf32>
    %232 = math.tanh %231 : vector<8x128xf32>
    %233 = vector.extract_strided_slice %218 {offsets = [0, 384], sizes = [8, 128], strides = [1, 1]} : vector<8x512xf32> to vector<8x128xf32>
    %234 = arith.negf %233 : vector<8x128xf32>
    %235 = math.exp %234 : vector<8x128xf32>
    %cst_92 = arith.constant 1.000000e+00 : f32
    %236 = vector.broadcast %cst_92 : f32 to vector<8x128xf32>
    %237 = arith.addf %236, %235 : vector<8x128xf32>
    %238 = arith.divf %236, %237 : vector<8x128xf32>
    %239 = arith.mulf %230, %159 : vector<8x128xf32>
    %240 = arith.mulf %224, %232 : vector<8x128xf32>
    %241 = arith.addf %239, %240 : vector<8x128xf32>
    %242 = math.tanh %241 : vector<8x128xf32>
    %243 = arith.mulf %238, %242 : vector<8x128xf32>
    %244 = vector.broadcast %213 : i32 to vector<8x1xi32>
    %245 = arith.cmpi slt, %244, %3 : vector<8x1xi32>
    %246 = vector.shape_cast %245 : vector<8x1xi1> to vector<8x1xi1>
    %247 = vector.broadcast %246 : vector<8x1xi1> to vector<8x128xi1>
    %248 = arith.select %247, %243, %156 : vector<8x128xi1>, vector<8x128xf32>
    %249 = vector.shape_cast %245 : vector<8x1xi1> to vector<8x1xi1>
    %250 = vector.broadcast %249 : vector<8x1xi1> to vector<8x128xi1>
    %251 = arith.select %250, %241, %159 : vector<8x128xi1>, vector<8x128xf32>
    %cst_93 = arith.constant 0.000000e+00 : f32
    %252 = vector.broadcast %cst_93 : f32 to vector<8x128xf32>
    %253 = vector.shape_cast %245 : vector<8x1xi1> to vector<8x1xi1>
    %254 = vector.broadcast %253 : vector<8x1xi1> to vector<8x128xi1>
    %255 = arith.select %254, %243, %252 : vector<8x128xi1>, vector<8x128xf32>
    %c2_94 = arith.constant 2 : index
    %c0_95 = arith.constant 0 : index
    %c0_96 = arith.constant 0 : index
    %256 = vector.load %arg10[%c2_94, %c0_95, %c0_96] : memref<4x8x128xf32, #tpu.memory_space<vmem>>, vector<1x8x128xf32>
    %257 = vector.shape_cast %256 : vector<1x8x128xf32> to vector<8x128xf32>
    %258 = vector.shape_cast %255 : vector<8x128xf32> to vector<1x8x128xf32>
    tpu.vector_store %arg10[%c2_94, %c0_95, %c0_96], %258 {strides = array<i32>} : memref<4x8x128xf32, #tpu.memory_space<vmem>>, vector<1x8x128xf32>,
    %c1_i32_97 = arith.constant 1 : i32
    %259 = arith.addi %28, %c1_i32_97 : i32
    %c1_98 = arith.constant 1 : index
    %c0_99 = arith.constant 0 : index
    %c0_100 = arith.constant 0 : index
    %260 = vector.load %arg20[%c1_98, %c0_99, %c0_100] : memref<4x8x512xf32, #tpu.memory_space<vmem>>, vector<1x8x512xf32>
    %261 = vector.shape_cast %260 : vector<1x8x512xf32> to vector<8x512xf32>
    %c0_101 = arith.constant 0 : index
    %c0_102 = arith.constant 0 : index
    %262 = vector.load %arg17[%c0_101, %c0_102] : memref<128x512xf32, #tpu.memory_space<vmem>>, vector<128x512xf32>
    %cst_103 = arith.constant dense<0.000000e+00> : vector<8x512xf32>
    %263 = tpu.matmul %202, %262, %cst_103 {dimension_numbers = #tpu.dot_dimension_numbers<[1], [0], [0], [1], [0, 0, 1, 1], [], []>} : vector<8x128xf32>, vector<128x512xf32>, vector<8x512xf32> -> vector<8x512xf32>
    %264 = arith.addf %261, %263 : vector<8x512xf32>
    %265 = vector.extract_strided_slice %264 {offsets = [0, 0], sizes = [8, 128], strides = [1, 1]} : vector<8x512xf32> to vector<8x128xf32>
    %266 = arith.negf %265 : vector<8x128xf32>
    %267 = math.exp %266 : vector<8x128xf32>
    %cst_104 = arith.constant 1.000000e+00 : f32
    %268 = vector.broadcast %cst_104 : f32 to vector<8x128xf32>
    %269 = arith.addf %268, %267 : vector<8x128xf32>
    %270 = arith.divf %268, %269 : vector<8x128xf32>
    %271 = vector.extract_strided_slice %264 {offsets = [0, 128], sizes = [8, 128], strides = [1, 1]} : vector<8x512xf32> to vector<8x128xf32>
    %272 = arith.negf %271 : vector<8x128xf32>
    %273 = math.exp %272 : vector<8x128xf32>
    %cst_105 = arith.constant 1.000000e+00 : f32
    %274 = vector.broadcast %cst_105 : f32 to vector<8x128xf32>
    %275 = arith.addf %274, %273 : vector<8x128xf32>
    %276 = arith.divf %274, %275 : vector<8x128xf32>
    %277 = vector.extract_strided_slice %264 {offsets = [0, 256], sizes = [8, 128], strides = [1, 1]} : vector<8x512xf32> to vector<8x128xf32>
    %278 = math.tanh %277 : vector<8x128xf32>
    %279 = vector.extract_strided_slice %264 {offsets = [0, 384], sizes = [8, 128], strides = [1, 1]} : vector<8x512xf32> to vector<8x128xf32>
    %280 = arith.negf %279 : vector<8x128xf32>
    %281 = math.exp %280 : vector<8x128xf32>
    %cst_106 = arith.constant 1.000000e+00 : f32
    %282 = vector.broadcast %cst_106 : f32 to vector<8x128xf32>
    %283 = arith.addf %282, %281 : vector<8x128xf32>
    %284 = arith.divf %282, %283 : vector<8x128xf32>
    %285 = arith.mulf %276, %205 : vector<8x128xf32>
    %286 = arith.mulf %270, %278 : vector<8x128xf32>
    %287 = arith.addf %285, %286 : vector<8x128xf32>
    %288 = math.tanh %287 : vector<8x128xf32>
    %289 = arith.mulf %284, %288 : vector<8x128xf32>
    %290 = vector.broadcast %259 : i32 to vector<8x1xi32>
    %291 = arith.cmpi slt, %290, %3 : vector<8x1xi32>
    %292 = vector.shape_cast %291 : vector<8x1xi1> to vector<8x1xi1>
    %293 = vector.broadcast %292 : vector<8x1xi1> to vector<8x128xi1>
    %294 = arith.select %293, %289, %202 : vector<8x128xi1>, vector<8x128xf32>
    %295 = vector.shape_cast %291 : vector<8x1xi1> to vector<8x1xi1>
    %296 = vector.broadcast %295 : vector<8x1xi1> to vector<8x128xi1>
    %297 = arith.select %296, %287, %205 : vector<8x128xi1>, vector<8x128xf32>
    %cst_107 = arith.constant 0.000000e+00 : f32
    %298 = vector.broadcast %cst_107 : f32 to vector<8x128xf32>
    %299 = vector.shape_cast %291 : vector<8x1xi1> to vector<8x1xi1>
    %300 = vector.broadcast %299 : vector<8x1xi1> to vector<8x128xi1>
    %301 = arith.select %300, %289, %298 : vector<8x128xi1>, vector<8x128xf32>
    %c1_108 = arith.constant 1 : index
    %c0_109 = arith.constant 0 : index
    %c0_110 = arith.constant 0 : index
    %302 = vector.load %arg11[%c1_108, %c0_109, %c0_110] : memref<4x8x128xf32, #tpu.memory_space<vmem>>, vector<1x8x128xf32>
    %303 = vector.shape_cast %302 : vector<1x8x128xf32> to vector<8x128xf32>
    %304 = vector.shape_cast %301 : vector<8x128xf32> to vector<1x8x128xf32>
    tpu.vector_store %arg11[%c1_108, %c0_109, %c0_110], %304 {strides = array<i32>} : memref<4x8x128xf32, #tpu.memory_space<vmem>>, vector<1x8x128xf32>,
    %c3_i32_111 = arith.constant 3 : i32
    %305 = arith.addi %26, %c3_i32_111 : i32
    %c3_112 = arith.constant 3 : index
    %c0_113 = arith.constant 0 : index
    %c0_114 = arith.constant 0 : index
    %306 = vector.load %arg19[%c3_112, %c0_113, %c0_114] : memref<4x8x512xf32, #tpu.memory_space<vmem>>, vector<1x8x512xf32>
    %307 = vector.shape_cast %306 : vector<1x8x512xf32> to vector<8x512xf32>
    %c0_115 = arith.constant 0 : index
    %c0_116 = arith.constant 0 : index
    %308 = vector.load %arg16[%c0_115, %c0_116] : memref<128x512xf32, #tpu.memory_space<vmem>>, vector<128x512xf32>
    %cst_117 = arith.constant dense<0.000000e+00> : vector<8x512xf32>
    %309 = tpu.matmul %248, %308, %cst_117 {dimension_numbers = #tpu.dot_dimension_numbers<[1], [0], [0], [1], [0, 0, 1, 1], [], []>} : vector<8x128xf32>, vector<128x512xf32>, vector<8x512xf32> -> vector<8x512xf32>
    %310 = arith.addf %307, %309 : vector<8x512xf32>
    %311 = vector.extract_strided_slice %310 {offsets = [0, 0], sizes = [8, 128], strides = [1, 1]} : vector<8x512xf32> to vector<8x128xf32>
    %312 = arith.negf %311 : vector<8x128xf32>
    %313 = math.exp %312 : vector<8x128xf32>
    %cst_118 = arith.constant 1.000000e+00 : f32
    %314 = vector.broadcast %cst_118 : f32 to vector<8x128xf32>
    %315 = arith.addf %314, %313 : vector<8x128xf32>
    %316 = arith.divf %314, %315 : vector<8x128xf32>
    %317 = vector.extract_strided_slice %310 {offsets = [0, 128], sizes = [8, 128], strides = [1, 1]} : vector<8x512xf32> to vector<8x128xf32>
    %318 = arith.negf %317 : vector<8x128xf32>
    %319 = math.exp %318 : vector<8x128xf32>
    %cst_119 = arith.constant 1.000000e+00 : f32
    %320 = vector.broadcast %cst_119 : f32 to vector<8x128xf32>
    %321 = arith.addf %320, %319 : vector<8x128xf32>
    %322 = arith.divf %320, %321 : vector<8x128xf32>
    %323 = vector.extract_strided_slice %310 {offsets = [0, 256], sizes = [8, 128], strides = [1, 1]} : vector<8x512xf32> to vector<8x128xf32>
    %324 = math.tanh %323 : vector<8x128xf32>
    %325 = vector.extract_strided_slice %310 {offsets = [0, 384], sizes = [8, 128], strides = [1, 1]} : vector<8x512xf32> to vector<8x128xf32>
    %326 = arith.negf %325 : vector<8x128xf32>
    %327 = math.exp %326 : vector<8x128xf32>
    %cst_120 = arith.constant 1.000000e+00 : f32
    %328 = vector.broadcast %cst_120 : f32 to vector<8x128xf32>
    %329 = arith.addf %328, %327 : vector<8x128xf32>
    %330 = arith.divf %328, %329 : vector<8x128xf32>
    %331 = arith.mulf %322, %251 : vector<8x128xf32>
    %332 = arith.mulf %316, %324 : vector<8x128xf32>
    %333 = arith.addf %331, %332 : vector<8x128xf32>
    %334 = math.tanh %333 : vector<8x128xf32>
    %335 = arith.mulf %330, %334 : vector<8x128xf32>
    %336 = vector.broadcast %305 : i32 to vector<8x1xi32>
    %337 = arith.cmpi slt, %336, %3 : vector<8x1xi32>
    %338 = vector.shape_cast %337 : vector<8x1xi1> to vector<8x1xi1>
    %339 = vector.broadcast %338 : vector<8x1xi1> to vector<8x128xi1>
    %340 = arith.select %339, %335, %248 : vector<8x128xi1>, vector<8x128xf32>
    %341 = vector.shape_cast %337 : vector<8x1xi1> to vector<8x1xi1>
    %342 = vector.broadcast %341 : vector<8x1xi1> to vector<8x128xi1>
    %343 = arith.select %342, %333, %251 : vector<8x128xi1>, vector<8x128xf32>
    %cst_121 = arith.constant 0.000000e+00 : f32
    %344 = vector.broadcast %cst_121 : f32 to vector<8x128xf32>
    %345 = vector.shape_cast %337 : vector<8x1xi1> to vector<8x1xi1>
    %346 = vector.broadcast %345 : vector<8x1xi1> to vector<8x128xi1>
    %347 = arith.select %346, %335, %344 : vector<8x128xi1>, vector<8x128xf32>
    %c3_122 = arith.constant 3 : index
    %c0_123 = arith.constant 0 : index
    %c0_124 = arith.constant 0 : index
    %348 = vector.load %arg10[%c3_122, %c0_123, %c0_124] : memref<4x8x128xf32, #tpu.memory_space<vmem>>, vector<1x8x128xf32>
    %349 = vector.shape_cast %348 : vector<1x8x128xf32> to vector<8x128xf32>
    %350 = vector.shape_cast %347 : vector<8x128xf32> to vector<1x8x128xf32>
    tpu.vector_store %arg10[%c3_122, %c0_123, %c0_124], %350 {strides = array<i32>} : memref<4x8x128xf32, #tpu.memory_space<vmem>>, vector<1x8x128xf32>,
    %c0_i32_125 = arith.constant 0 : i32
    %351 = arith.addi %28, %c0_i32_125 : i32
    %c0_126 = arith.constant 0 : index
    %c0_127 = arith.constant 0 : index
    %c0_128 = arith.constant 0 : index
    %352 = vector.load %arg20[%c0_126, %c0_127, %c0_128] : memref<4x8x512xf32, #tpu.memory_space<vmem>>, vector<1x8x512xf32>
    %353 = vector.shape_cast %352 : vector<1x8x512xf32> to vector<8x512xf32>
    %c0_129 = arith.constant 0 : index
    %c0_130 = arith.constant 0 : index
    %354 = vector.load %arg17[%c0_129, %c0_130] : memref<128x512xf32, #tpu.memory_space<vmem>>, vector<128x512xf32>
    %cst_131 = arith.constant dense<0.000000e+00> : vector<8x512xf32>
    %355 = tpu.matmul %294, %354, %cst_131 {dimension_numbers = #tpu.dot_dimension_numbers<[1], [0], [0], [1], [0, 0, 1, 1], [], []>} : vector<8x128xf32>, vector<128x512xf32>, vector<8x512xf32> -> vector<8x512xf32>
    %356 = arith.addf %353, %355 : vector<8x512xf32>
    %357 = vector.extract_strided_slice %356 {offsets = [0, 0], sizes = [8, 128], strides = [1, 1]} : vector<8x512xf32> to vector<8x128xf32>
    %358 = arith.negf %357 : vector<8x128xf32>
    %359 = math.exp %358 : vector<8x128xf32>
    %cst_132 = arith.constant 1.000000e+00 : f32
    %360 = vector.broadcast %cst_132 : f32 to vector<8x128xf32>
    %361 = arith.addf %360, %359 : vector<8x128xf32>
    %362 = arith.divf %360, %361 : vector<8x128xf32>
    %363 = vector.extract_strided_slice %356 {offsets = [0, 128], sizes = [8, 128], strides = [1, 1]} : vector<8x512xf32> to vector<8x128xf32>
    %364 = arith.negf %363 : vector<8x128xf32>
    %365 = math.exp %364 : vector<8x128xf32>
    %cst_133 = arith.constant 1.000000e+00 : f32
    %366 = vector.broadcast %cst_133 : f32 to vector<8x128xf32>
    %367 = arith.addf %366, %365 : vector<8x128xf32>
    %368 = arith.divf %366, %367 : vector<8x128xf32>
    %369 = vector.extract_strided_slice %356 {offsets = [0, 256], sizes = [8, 128], strides = [1, 1]} : vector<8x512xf32> to vector<8x128xf32>
    %370 = math.tanh %369 : vector<8x128xf32>
    %371 = vector.extract_strided_slice %356 {offsets = [0, 384], sizes = [8, 128], strides = [1, 1]} : vector<8x512xf32> to vector<8x128xf32>
    %372 = arith.negf %371 : vector<8x128xf32>
    %373 = math.exp %372 : vector<8x128xf32>
    %cst_134 = arith.constant 1.000000e+00 : f32
    %374 = vector.broadcast %cst_134 : f32 to vector<8x128xf32>
    %375 = arith.addf %374, %373 : vector<8x128xf32>
    %376 = arith.divf %374, %375 : vector<8x128xf32>
    %377 = arith.mulf %368, %297 : vector<8x128xf32>
    %378 = arith.mulf %362, %370 : vector<8x128xf32>
    %379 = arith.addf %377, %378 : vector<8x128xf32>
    %380 = math.tanh %379 : vector<8x128xf32>
    %381 = arith.mulf %376, %380 : vector<8x128xf32>
    %382 = vector.broadcast %351 : i32 to vector<8x1xi32>
    %383 = arith.cmpi slt, %382, %3 : vector<8x1xi32>
    %384 = vector.shape_cast %383 : vector<8x1xi1> to vector<8x1xi1>
    %385 = vector.broadcast %384 : vector<8x1xi1> to vector<8x128xi1>
    %386 = arith.select %385, %381, %294 : vector<8x128xi1>, vector<8x128xf32>
    %387 = vector.shape_cast %383 : vector<8x1xi1> to vector<8x1xi1>
    %388 = vector.broadcast %387 : vector<8x1xi1> to vector<8x128xi1>
    %389 = arith.select %388, %379, %297 : vector<8x128xi1>, vector<8x128xf32>
    %cst_135 = arith.constant 0.000000e+00 : f32
    %390 = vector.broadcast %cst_135 : f32 to vector<8x128xf32>
    %391 = vector.shape_cast %383 : vector<8x1xi1> to vector<8x1xi1>
    %392 = vector.broadcast %391 : vector<8x1xi1> to vector<8x128xi1>
    %393 = arith.select %392, %381, %390 : vector<8x128xi1>, vector<8x128xf32>
    %c0_136 = arith.constant 0 : index
    %c0_137 = arith.constant 0 : index
    %c0_138 = arith.constant 0 : index
    %394 = vector.load %arg11[%c0_136, %c0_137, %c0_138] : memref<4x8x128xf32, #tpu.memory_space<vmem>>, vector<1x8x128xf32>
    %395 = vector.shape_cast %394 : vector<1x8x128xf32> to vector<8x128xf32>
    %396 = vector.shape_cast %393 : vector<8x128xf32> to vector<1x8x128xf32>
    tpu.vector_store %arg11[%c0_136, %c0_137, %c0_138], %396 {strides = array<i32>} : memref<4x8x128xf32, #tpu.memory_space<vmem>>, vector<1x8x128xf32>,
    %c0_139 = arith.constant 0 : index
    %c0_140 = arith.constant 0 : index
    %397 = vector.load %arg21[%c0_139, %c0_140] : memref<8x128xf32, #tpu.memory_space<vmem>>, vector<8x128xf32>
    tpu.vector_store %arg21[%c0_139, %c0_140], %340 {strides = array<i32>} : memref<8x128xf32, #tpu.memory_space<vmem>>, vector<8x128xf32>,
    %c0_141 = arith.constant 0 : index
    %c0_142 = arith.constant 0 : index
    %398 = vector.load %arg22[%c0_141, %c0_142] : memref<8x128xf32, #tpu.memory_space<vmem>>, vector<8x128xf32>
    tpu.vector_store %arg22[%c0_141, %c0_142], %343 {strides = array<i32>} : memref<8x128xf32, #tpu.memory_space<vmem>>, vector<8x128xf32>,
    %c0_143 = arith.constant 0 : index
    %c0_144 = arith.constant 0 : index
    %399 = vector.load %arg23[%c0_143, %c0_144] : memref<8x128xf32, #tpu.memory_space<vmem>>, vector<8x128xf32>
    tpu.vector_store %arg23[%c0_143, %c0_144], %386 {strides = array<i32>} : memref<8x128xf32, #tpu.memory_space<vmem>>, vector<8x128xf32>,
    %c0_145 = arith.constant 0 : index
    %c0_146 = arith.constant 0 : index
    %400 = vector.load %arg24[%c0_145, %c0_146] : memref<8x128xf32, #tpu.memory_space<vmem>>, vector<8x128xf32>
    tpu.vector_store %arg24[%c0_145, %c0_146], %389 {strides = array<i32>} : memref<8x128xf32, #tpu.memory_space<vmem>>, vector<8x128xf32>,
    %c0_i32_147 = arith.constant 0 : i32
    %401 = arith.cmpi eq, %arg0, %c0_i32_147 : i32
    %402 = arith.extui %401 : i1 to i32
    %c0_i32_148 = arith.constant 0 : i32
    %403 = arith.cmpi ne, %402, %c0_i32_148 : i32
    scf.if %403 {
      %c0_149 = arith.constant 0 : index
      %c0_150 = arith.constant 0 : index
      %c0_151 = arith.constant 0 : index
      %404 = vector.load %arg12[%c0_149, %c0_150, %c0_151] : memref<2x8x128xf32, #tpu.memory_space<vmem>>, vector<1x8x128xf32>
      %405 = vector.shape_cast %404 : vector<1x8x128xf32> to vector<8x128xf32>
      %406 = vector.shape_cast %340 : vector<8x128xf32> to vector<1x8x128xf32>
      tpu.vector_store %arg12[%c0_149, %c0_150, %c0_151], %406 {strides = array<i32>} : memref<2x8x128xf32, #tpu.memory_space<vmem>>, vector<1x8x128xf32>,
      %c1_152 = arith.constant 1 : index
      %c0_153 = arith.constant 0 : index
      %c0_154 = arith.constant 0 : index
      %407 = vector.load %arg12[%c1_152, %c0_153, %c0_154] : memref<2x8x128xf32, #tpu.memory_space<vmem>>, vector<1x8x128xf32>
      %408 = vector.shape_cast %407 : vector<1x8x128xf32> to vector<8x128xf32>
      %409 = vector.shape_cast %386 : vector<8x128xf32> to vector<1x8x128xf32>
      tpu.vector_store %arg12[%c1_152, %c0_153, %c0_154], %409 {strides = array<i32>} : memref<2x8x128xf32, #tpu.memory_space<vmem>>, vector<1x8x128xf32>,
      %c0_155 = arith.constant 0 : index
      %c0_156 = arith.constant 0 : index
      %c0_157 = arith.constant 0 : index
      %410 = vector.load %arg13[%c0_155, %c0_156, %c0_157] : memref<2x8x128xf32, #tpu.memory_space<vmem>>, vector<1x8x128xf32>
      %411 = vector.shape_cast %410 : vector<1x8x128xf32> to vector<8x128xf32>
      %412 = vector.shape_cast %343 : vector<8x128xf32> to vector<1x8x128xf32>
      tpu.vector_store %arg13[%c0_155, %c0_156, %c0_157], %412 {strides = array<i32>} : memref<2x8x128xf32, #tpu.memory_space<vmem>>, vector<1x8x128xf32>,
      %c1_158 = arith.constant 1 : index
      %c0_159 = arith.constant 0 : index
      %c0_160 = arith.constant 0 : index
      %413 = vector.load %arg13[%c1_158, %c0_159, %c0_160] : memref<2x8x128xf32, #tpu.memory_space<vmem>>, vector<1x8x128xf32>
      %414 = vector.shape_cast %413 : vector<1x8x128xf32> to vector<8x128xf32>
      %415 = vector.shape_cast %389 : vector<8x128xf32> to vector<1x8x128xf32>
      tpu.vector_store %arg13[%c1_158, %c0_159, %c0_160], %415 {strides = array<i32>} : memref<2x8x128xf32, #tpu.memory_space<vmem>>, vector<1x8x128xf32>,
    } else {
    }
    return
  }
  func.func @transform_0(%arg0: i32) -> (i32, i32) {
    %c0_i32 = arith.constant 0 : i32
    %c0_i32_0 = arith.constant 0 : i32
    %c0_i32_1 = arith.constant 0 : i32
    return %c0_i32, %c0_i32_0 : i32, i32
  }
  func.func @transform_1(%arg0: i32) -> (i32, i32, i32) {
    %c0_i32 = arith.constant 0 : i32
    %c0_i32_0 = arith.constant 0 : i32
    %c0_i32_1 = arith.constant 0 : i32
    return %arg0, %c0_i32, %c0_i32_0 : i32, i32, i32
  }
  func.func @transform_2(%arg0: i32) -> (i32, i32, i32) {
    %c0_i32 = arith.constant 0 : i32
    %0 = arith.subi %c0_i32, %arg0 : i32
    %c0_i32_0 = arith.constant 0 : i32
    %c0_i32_1 = arith.constant 0 : i32
    %c0_i32_2 = arith.constant 0 : i32
    return %0, %c0_i32_0, %c0_i32_1 : i32, i32, i32
  }
  func.func @transform_7(%arg0: i32) -> (i32, i32) {
    %c0_i32 = arith.constant 0 : i32
    %c0_i32_0 = arith.constant 0 : i32
    %c0_i32_1 = arith.constant 0 : i32
    return %c0_i32, %c0_i32_0 : i32, i32
  }
  func.func @transform_8(%arg0: i32) -> (i32, i32) {
    %c0_i32 = arith.constant 0 : i32
    %c0_i32_0 = arith.constant 0 : i32
    %c0_i32_1 = arith.constant 0 : i32
    return %c0_i32, %c0_i32_0 : i32, i32
  }
  func.func @transform_9(%arg0: i32) -> (i32, i32, i32) {
    %c0_i32 = arith.constant 0 : i32
    %c0_i32_0 = arith.constant 0 : i32
    %c0_i32_1 = arith.constant 0 : i32
    return %arg0, %c0_i32, %c0_i32_0 : i32, i32, i32
  }
  func.func @transform_10(%arg0: i32) -> (i32, i32, i32) {
    %c0_i32 = arith.constant 0 : i32
    %0 = arith.subi %c0_i32, %arg0 : i32
    %c0_i32_0 = arith.constant 0 : i32
    %c0_i32_1 = arith.constant 0 : i32
    %c0_i32_2 = arith.constant 0 : i32
    return %0, %c0_i32_0, %c0_i32_1 : i32, i32, i32
  }
  func.func @transform_11(%arg0: i32) -> (i32, i32, i32) {
    %c0_i32 = arith.constant 0 : i32
    %c0_i32_0 = arith.constant 0 : i32
    %c0_i32_1 = arith.constant 0 : i32
    %c0_i32_2 = arith.constant 0 : i32
    return %c0_i32, %c0_i32_0, %c0_i32_1 : i32, i32, i32
  }
  func.func @transform_12(%arg0: i32) -> (i32, i32, i32) {
    %c0_i32 = arith.constant 0 : i32
    %c0_i32_0 = arith.constant 0 : i32
    %c0_i32_1 = arith.constant 0 : i32
    %c0_i32_2 = arith.constant 0 : i32
    return %c0_i32, %c0_i32_0, %c0_i32_1 : i32, i32, i32
  }
}

</mosaic_0001>

<bundles_post_ra>
// kernel: tpu_custom_call.1
= control target key start
LH: loop header
LB: loop body
LE: loop exit
PB: predicated region body
PF: predicated region fallthrough
CT: control target
= control target key end

     0   :  { %18 = vsyncpa [#allocation14], 0  ;;  %s4751_s0 = inlined_call_operand.vmem [shape: s32[8,1], index: 0, kind: input, shape index: {}]   ;;  %s4752_s1 = inlined_call_operand.hbm [shape: f32[4,8,32], index: 1, kind: input, shape index: {}]   ;;  %s4753_s2 = inlined_call_operand.hbm [shape: f32[4,8,32], index: 2, kind: input, shape index: {}]   ;;  %s4754_s3 = inlined_call_operand.hbm [shape: f32[32,512], index: 3, kind: input, shape index: {}]   ;;  %s4755_s4 = inlined_call_operand.hbm [shape: f32[32,512], index: 4, kind: input, shape index: {}]   ;;  %s4756_s5 = inlined_call_operand.hbm [shape: f32[128,512], index: 5, kind: input, shape index: {}]   ;;  %s4757_s6 = inlined_call_operand.hbm [shape: f32[128,512], index: 6, kind: input, shape index: {}]   ;;  %s4758_s7 = inlined_call_operand.vmem [shape: f32[1,512], index: 7, kind: input, shape index: {}]   ;;  %s4759_s8 = inlined_call_operand.vmem [shape: f32[1,512], index: 8, kind: input, shape index: {}]   ;;  %s4760_s9 = inlined_call_operand.hbm [shape: f32[4,8,128], index: 9, kind: output, shape index: {0}]   ;;  %s4761_s10 = inlined_call_operand.hbm [shape: f32[4,8,128], index: 10, kind: output, shape index: {1}]   ;;  %s4762_s11 = inlined_call_operand.hbm [shape: f32[2,8,128], index: 11, kind: output, shape index: {2}]   ;;  %s4763_s12 = inlined_call_operand.hbm [shape: f32[2,8,128], index: 12, kind: output, shape index: {3}]  }
   0x1   :  { %19 = vsyncpa [#allocation17], 0 }
   0x2   :  { %20 = vsyncpa [#allocation15], 0 }
   0x3   :  { %21 = vsyncpa [#allocation20], 0 }
   0x4   :  { %22 = vsyncpa [#allocation23], 0  ;;  %s3808_s21 = smov [#allocation13]   ;;  %s3570_s25 = scalar_lea.hbm %s4752_s1, 512 }
   0x5   :  { %s30_s22 = sshll.u32 %s3808_s21, 4  ;;  %p3571_p0 = scmp.ne.s32.totalorder %s4752_s1, %s3570_s25  ;;  %s31_s22 = int_to_ptr.vmem [resolvable:$true] %s30_s22 }
   0x6   :  { %p3574_p1 = scmp.lt.u32.totalorder %s3570_s25, %s4752_s1 }
   0x8   :  { %p3576_p2 = pnand %p3574_p1, %p3571_p0 }
   0xa   :  { %3579 = shalt.err (!%p3576_p2)
}
   0xb   :  { %s3580_s30 = scalar_lea.vmem %s31_s22, 512  ;;  %p3585_p4 = scmp.lt.s32.totalorder %s31_s22, %s31_s22 }
   0xc   :  { %p3581_p3 = scmp.ne.s32.totalorder %s31_s22, %s3580_s30  ;;  %p3586_p5 = scmp.lt.s32.totalorder %s3580_s30, %s3580_s30 }
   0xe   :  { %p3587_p6 = por %p3586_p5, %p3585_p4 }
  0x10   :  { %p3588_p7 = pnand %p3587_p6, %p3581_p3 }
  0x12   :  { %3591 = shalt.err (!%p3588_p7)
}
  0x13   :  { %s3809_s13 = smov 128   ;;  %s3810_s14 = smov 8  }
  0x14   :  { %36 = dma.hbm_to_vmem [thread:$0]  %s4752_s1, 512, %s31_s22, [#allocation14], %s3809_s13, %s3809_s13, %s3810_s14  }
  0x15   :  { %s3811_s17 = smov [#allocation16]   ;;  %s3592_s21 = scalar_lea.hbm %s4753_s2, 512 }
  0x16   :  { %s46_s18 = sshll.u32 %s3811_s17, 4  ;;  %p3593_p8 = scmp.ne.s32.totalorder %s4753_s2, %s3592_s21  ;;  %s47_s18 = int_to_ptr.vmem [resolvable:$true] %s46_s18 }
  0x17   :  { %p3596_p9 = scmp.lt.u32.totalorder %s3592_s21, %s4753_s2 }
  0x19   :  { %p3598_p10 = pnand %p3596_p9, %p3593_p8 }
  0x1b   :  { %3601 = shalt.err (!%p3598_p10)
}
  0x1c   :  { %s3602_s27 = scalar_lea.vmem %s47_s18, 512  ;;  %p3607_p12 = scmp.lt.s32.totalorder %s47_s18, %s47_s18 }
  0x1d   :  { %p3603_p11 = scmp.ne.s32.totalorder %s47_s18, %s3602_s27  ;;  %p3608_p13 = scmp.lt.s32.totalorder %s3602_s27, %s3602_s27 }
  0x1f   :  { %p3609_p0 = por %p3608_p13, %p3607_p12 }
  0x21   :  { %p3610_p1 = pnand %p3609_p0, %p3603_p11 }
  0x23   :  { %3613 = shalt.err (!%p3610_p1)
}
  0x24   :  { %52 = dma.hbm_to_vmem [thread:$0]  %s4753_s2, 512, %s47_s18, [#allocation17], %s3809_s13, %s3809_s13, %s3810_s14  }
  0x25   :  { %3790 = dma.done.wait [#allocation14], 512  }
  0x26   :  { %3791 = vsyncadd [#allocation14], 4294966784 }
  0x27   :  { %3792 = dma.done.wait [#allocation17], 512  }
  0x28   :  { %3793 = vsyncadd [#allocation17], 4294966784  ;;  %s3812_s28 = smov [#allocation2]   ;;  %s3813_s30 = smov [#allocation3]  }
  0x29   :  { %s78_s29 = sshll.u32 %s3812_s28, 4  ;;  %s90_s15 = sshll.u32 %s3813_s30, 4  ;;  %s79_s29 = int_to_ptr.vmem [resolvable:$true] %s78_s29  ;;  %s91_s15 = int_to_ptr.vmem [resolvable:$true] %s90_s15 }
  0x2a   :  { %s3614_s19 = scalar_lea.hbm %s4754_s3, 2048 }
  0x2b   :  { %p3615_p2 = scmp.ne.s32.totalorder %s4754_s3, %s3614_s19  ;;  %p3618_p3 = scmp.lt.u32.totalorder %s3614_s19, %s4754_s3 }
  0x2d   :  { %p3620_p4 = pnand %p3618_p3, %p3615_p2 }
  0x2f   :  { %3623 = shalt.err (!%p3620_p4)  }
  0x30   :  { %s3624_s18 = scalar_lea.vmem %s79_s29, 2048  ;;  %p3629_p6 = scmp.lt.s32.totalorder %s79_s29, %s79_s29 }
  0x31   :  { %p3625_p5 = scmp.ne.s32.totalorder %s79_s29, %s3624_s18  ;;  %p3630_p7 = scmp.lt.s32.totalorder %s3624_s18, %s3624_s18 }
  0x33   :  { %p3631_p8 = por %p3630_p7, %p3629_p6 }
  0x35   :  { %p3632_p9 = pnand %p3631_p8, %p3625_p5 }
  0x37   :  { %3635 = shalt.err (!%p3632_p9)  }
  0x38   :  { %81 = dma.hbm_to_vmem [thread:$0]  %s4754_s3, 2048, %s79_s29, [#allocation6] }
  0x39   :  { %s3636_s1 = scalar_lea.hbm %s4755_s4, 2048 }
  0x3a   :  { %p3637_p10 = scmp.ne.s32.totalorder %s4755_s4, %s3636_s1  ;;  %p3640_p11 = scmp.lt.u32.totalorder %s3636_s1, %s4755_s4 }
  0x3c   :  { %p3642_p12 = pnand %p3640_p11, %p3637_p10 }
  0x3e   :  { %3645 = shalt.err (!%p3642_p12)  }
  0x3f   :  { %s3646_s17 = scalar_lea.vmem %s91_s15, 2048  ;;  %p3651_p0 = scmp.lt.s32.totalorder %s91_s15, %s91_s15 }
  0x40   :  { %p3647_p13 = scmp.ne.s32.totalorder %s91_s15, %s3646_s17  ;;  %p3652_p1 = scmp.lt.s32.totalorder %s3646_s17, %s3646_s17 }
  0x42   :  { %p3653_p2 = por %p3652_p1, %p3651_p0 }
  0x44   :  { %p3654_p3 = pnand %p3653_p2, %p3647_p13 }
  0x46   :  { %3657 = shalt.err (!%p3654_p3)  }
  0x47   :  { %93 = dma.hbm_to_vmem [thread:$0]  %s4755_s4, 2048, %s91_s15, [#allocation6 + $0x1] }
  0x48   :  { %s3814_s19 = smov [#allocation4]   ;;  %s3815_s21 = smov [#allocation5]  }
  0x49   :  { %s102_s20 = sshll.u32 %s3814_s19, 4  ;;  %s114_s23 = sshll.u32 %s3815_s21, 4  ;;  %s103_s20 = int_to_ptr.vmem [resolvable:$true] %s102_s20  ;;  %s115_s23 = int_to_ptr.vmem [resolvable:$true] %s114_s23 }
  0x4a   :  { %s3658_s24 = scalar_lea.hbm %s4756_s5, 8192 }
  0x4b   :  { %p3659_p4 = scmp.ne.s32.totalorder %s4756_s5, %s3658_s24  ;;  %p3662_p5 = scmp.lt.u32.totalorder %s3658_s24, %s4756_s5 }
  0x4d   :  { %p3664_p6 = pnand %p3662_p5, %p3659_p4 }
  0x4f   :  { %3667 = shalt.err (!%p3664_p6)  }
  0x50   :  { %s3668_s4 = scalar_lea.vmem %s103_s20, 8192  ;;  %p3673_p8 = scmp.lt.s32.totalorder %s103_s20, %s103_s20 }
  0x51   :  { %p3669_p7 = scmp.ne.s32.totalorder %s103_s20, %s3668_s4  ;;  %p3674_p9 = scmp.lt.s32.totalorder %s3668_s4, %s3668_s4 }
  0x53   :  { %p3675_p10 = por %p3674_p9, %p3673_p8 }
  0x55   :  { %p3676_p11 = pnand %p3675_p10, %p3669_p7 }
  0x57   :  { %3679 = shalt.err (!%p3676_p11)  }
  0x58   :  { %105 = dma.hbm_to_vmem [thread:$0]  %s4756_s5, 8192, %s103_s20, [#allocation6 + $0x2] }
  0x59   :  { %s3680_s16 = scalar_lea.hbm %s4757_s6, 8192 }
  0x5a   :  { %p3681_p12 = scmp.ne.s32.totalorder %s4757_s6, %s3680_s16  ;;  %p3684_p13 = scmp.lt.u32.totalorder %s3680_s16, %s4757_s6 }
  0x5c   :  { %p3686_p0 = pnand %p3684_p13, %p3681_p12 }
  0x5e   :  { %3689 = shalt.err (!%p3686_p0)  }
  0x5f   :  { %s3690_s21 = scalar_lea.vmem %s115_s23, 8192  ;;  %p3695_p2 = scmp.lt.s32.totalorder %s115_s23, %s115_s23 }
  0x60   :  { %p3691_p1 = scmp.ne.s32.totalorder %s115_s23, %s3690_s21  ;;  %p3696_p3 = scmp.lt.s32.totalorder %s3690_s21, %s3690_s21 }
  0x62   :  { %p3697_p4 = por %p3696_p3, %p3695_p2 }
  0x64   :  { %p3698_p5 = pnand %p3697_p4, %p3691_p1 }
  0x66   :  { %3701 = shalt.err (!%p3698_p5)  }
  0x67   :  { %117 = dma.hbm_to_vmem [thread:$0]  %s4757_s6, 8192, %s115_s23, [#allocation6 + $0x3] }
  0x68   :  { %3794 = dma.done.wait [#allocation6], 2048 }
  0x69   :  { %3795 = vsyncadd [#allocation6], 4294965248 }
  0x6a   :  { %3796 = dma.done.wait [#allocation6 + $0x1], 2048 }
  0x6b   :  { %3797 = vsyncadd [#allocation6 + $0x1], 4294965248 }
  0x6c   :  { %3798 = dma.done.wait [#allocation6 + $0x2], 8192 }
  0x6d   :  { %3799 = vsyncadd [#allocation6 + $0x2], 4294959104 }
  0x6e   :  { %3800 = dma.done.wait [#allocation6 + $0x3], 8192 }
  0x6f   :  { %3801 = vsyncadd [#allocation6 + $0x3], 4294959104  ;;  %v4765_v0 = vmov 0.0   ;;  %v4764_v1 = vmov 0   ;;  %v144_v2 = vld [vmem:[#allocation2 + $0x8] sm:$0xff]  ;;  %v146_v4 = vld [vmem:[#allocation2 + $0x18] sm:$0xff] }
  0x70   :  { %258 = vmatprep.mubr.f32.mxu0 %v4765_v0  ;;  %347 = vmatprep.mubr.f32.mxu1 %v4765_v0  ;;  %v148_v3 = vld [vmem:[#allocation2 + $0x28] sm:$0xff]  ;;  %v150_v6 = vld [vmem:[#allocation2 + $0x38] sm:$0xff]  ;;  %v143_v7 = vld [vmem:[#allocation2] sm:$0xff]  ;;  %vm181_vm0 = vcmask 261120  }
  0x71   :  { %3440 = vset.pattern.permute.xlu0 %v4764_v1  ;;  %3441 = vset.pattern.permute.xlu1 %v4764_v1  ;;  %v2818_v5 = vpack.c.bf16 %v148_v3, %v144_v2  ;;  %v147_v8 = vld [vmem:[#allocation2 + $0x20] sm:$0xff]  ;;  %v2826_v9 = vpack.c.bf16 %v150_v6, %v146_v4  ;;  %v145_v11 = vld [vmem:[#allocation2 + $0x10] sm:$0xff]  ;;  %v152_v13 = vld [vmem:[#allocation2 + $0x48] sm:$0xff] }
  0x72   :  { %v2820_v10 = vpack.c.bf16 %v147_v8, %v143_v7  ;;  %v149_v12 = vld [vmem:[#allocation2 + $0x30] sm:$0xff]  ;;  %v156_v15 = vld [vmem:[#allocation2 + $0x68] sm:$0xff]  ;;  %v154_v16 = vld [vmem:[#allocation2 + $0x58] sm:$0xff] }
  0x73   :  { %2819 = vmatprep.subr.bf16.mxu0 %v2818_v5  ;;  %v2828_v14 = vpack.c.bf16 %v149_v12, %v145_v11  ;;  %v158_v17 = vld [vmem:[#allocation2 + $0x78] sm:$0xff]  ;;  %2827 = vmatprep.subr.bf16.mxu1 %v2826_v9  ;;  %v2822_v18 = vpack.c.bf16 %v156_v15, %v152_v13  ;;  %v151_v20 = vld [vmem:[#allocation2 + $0x40] sm:$0xff]  ;;  %v153_v22 = vld [vmem:[#allocation2 + $0x50] sm:$0xff] }
  0x74   :  { %2821 = vmatpush1.bf16.msra.mxu0 %v2820_v10  ;;  %v2830_v19 = vpack.c.bf16 %v158_v17, %v154_v16  ;;  %v155_v21 = vld [vmem:[#allocation2 + $0x60] sm:$0xff]  ;;  %v157_v24 = vld [vmem:[#allocation2 + $0x70] sm:$0xff]  ;;  %v373_v25 = vld [vmem:[#allocation3 + $0x8] sm:$0xff] }
  0x75   :  { %2829 = vmatpush1.bf16.msra.mxu1 %v2828_v14  ;;  %v2824_v23 = vpack.c.bf16 %v155_v21, %v151_v20  ;;  %2823 = vmatprep.subr.bf16.mxu0 %v2822_v18  ;;  %v2832_v26 = vpack.c.bf16 %v157_v24, %v153_v22  ;;  %v377_v27 = vld [vmem:[#allocation3 + $0x28] sm:$0xff]  ;;  %v372_v28 = vld [vmem:[#allocation3] sm:$0xff]  ;;  %v375_v31 = vld [vmem:[#allocation3 + $0x18] sm:$0xff] }
  0x76   :  { %2831 = vmatprep.subr.bf16.mxu1 %v2830_v19  ;;  %v376_v29 = vld [vmem:[#allocation3 + $0x20] sm:$0xff]  ;;  %v2834_v30 = vpack.c.bf16 %v377_v27, %v373_v25  ;;  %v379_v32 = vld [vmem:[#allocation3 + $0x38] sm:$0xff]  ;;  %v381_v36 = vld [vmem:[#allocation3 + $0x48] sm:$0xff] }
  0x77   :  { %v135_v33 = vld [vmem:[#allocation13] sm:$0xff]  ;;  %v2836_v34 = vpack.c.bf16 %v376_v29, %v372_v28  ;;  %v2842_v35 = vpack.c.bf16 %v379_v32, %v375_v31  ;;  %v385_v37 = vld [vmem:[#allocation3 + $0x68] sm:$0xff]  ;;  %v374_v38 = vld [vmem:[#allocation3 + $0x10] sm:$0xff] }
  0x78   :  { %2825 = vmatpush1.bf16.msra.mxu0 %v2824_v23  ;;  %v378_v39 = vld [vmem:[#allocation3 + $0x30] sm:$0xff]  ;;  %v380_v40 = vld [vmem:[#allocation3 + $0x40] sm:$0xff]  ;;  %v2838_v41 = vpack.c.bf16 %v385_v37, %v381_v36  ;;  %v383_v44 = vld [vmem:[#allocation3 + $0x58] sm:$0xff] }
  0x79   :  { %2833 = vmatpush1.bf16.msra.mxu1 %v2832_v26  ;;  %2835 = vmatprep.subr.bf16.mxu0 %v2834_v30  ;;  %v2844_v42 = vpack.c.bf16 %v378_v39, %v374_v38  ;;  %v384_v43 = vld [vmem:[#allocation3 + $0x60] sm:$0xff]  ;;  %v387_v45 = vld [vmem:[#allocation3 + $0x78] sm:$0xff]  ;;  %v136_v46 = vld [vmem:[#allocation13 + $0x8] sm:$0xff] }
  0x7a   :  { %2843 = vmatprep.subr.bf16.mxu1 %v2842_v35  ;;  %v2846_v47 = vpack.c.bf16 %v387_v45, %v383_v44  ;;  %v382_v48 = vld [vmem:[#allocation3 + $0x50] sm:$0xff]  ;;  %v644_v50 = vld [vmem:[#allocation4 + $0x8] sm:$0xff]  ;;  %v646_v52 = vld [vmem:[#allocation4 + $0x18] sm:$0xff]  ;;  %v2840_v53 = vpack.c.bf16 %v384_v43, %v380_v40 }
  0x7b   :  { %2762 = vmatmul.mubr.msk.f32.vlgmr.msra.gmra.mrb[0].mxu0 %vm181_vm0, %v135_v33  ;;  %v386_v49 = vld [vmem:[#allocation3 + $0x70] sm:$0xff]  ;;  %v648_v51 = vld [vmem:[#allocation4 + $0x28] sm:$0xff]  ;;  %v650_v54 = vld [vmem:[#allocation4 + $0x38] sm:$0xff] }
  0x7c   :  { %2766 = vmatmul.mubr.msk.f32.vlgmr.msra.gmra.mrb[0].mxu1 %vm181_vm0, %v135_v33  ;;  %2837 = vmatpush1.bf16.msra.mxu0 %v2836_v34  ;;  %v2848_v55 = vpack.c.bf16 %v386_v49, %v382_v48  ;;  %v3973_v56 = vpack.c.bf16 %v648_v51, %v644_v50  ;;  %v3976_v57 = vpack.c.bf16 %v650_v54, %v646_v52  ;;  %v137_v58 = vld [vmem:[#allocation13 + $0x10] sm:$0xff]  ;;  %v138_v59 = vld [vmem:[#allocation13 + $0x18] sm:$0xff]  ;;  %v643_v60 = vld [vmem:[#allocation4] sm:$0xff] }
  0x7d   :  { %264 = vmatprep.mubr.f32.mxu0 %v4765_v0  ;;  %353 = vmatprep.mubr.f32.mxu1 %v4765_v0  ;;  %v647_v61 = vld [vmem:[#allocation4 + $0x20] sm:$0xff]  ;;  %v645_v62 = vld [vmem:[#allocation4 + $0x10] sm:$0xff]  ;;  %v652_v2 = vld [vmem:[#allocation4 + $0x48] sm:$0xff] }
  0x7e   :  { %2839 = vmatprep.subr.bf16.mxu0 %v2838_v41  ;;  %2845 = vmatpush1.bf16.msra.mxu1 %v2844_v42  ;;  %v649_v63 = vld [vmem:[#allocation4 + $0x30] sm:$0xff]  ;;  %v656_v3 = vld [vmem:[#allocation4 + $0x68] sm:$0xff]  ;;  %v654_v4 = vld [vmem:[#allocation4 + $0x58] sm:$0xff]  ;;  %v3990_v7 = vpack.c.bf16 %v647_v61, %v643_v60 }
  0x7f   :  { %2763 = vmatmul.mubr.msk.f32.gmra.mrb[2].mxu0 %vm181_vm0, %v136_v46  ;;  %2847 = vmatprep.subr.bf16.mxu1 %v2846_v47  ;;  %v658_v5 = vld [vmem:[#allocation4 + $0x78] sm:$0xff]  ;;  %v139_v6 = vld [vmem:[#allocation16] sm:$0xff]  ;;  %v3993_v8 = vpack.c.bf16 %v649_v63, %v645_v62  ;;  %v3995_v9 = vpack.c.bf16 %v656_v3, %v652_v2  ;;  %v653_v12 = vld [vmem:[#allocation4 + $0x50] sm:$0xff] }
  0x80   :  { %2767 = vmatmul.mubr.msk.f32.gmra.mrb[2].mxu1 %vm181_vm0, %v136_v46  ;;  %270 = vmatprep.mubr.f32.mxu0 %v4765_v0  ;;  %v651_v10 = vld [vmem:[#allocation4 + $0x40] sm:$0xff]  ;;  %v3997_v13 = vpack.c.bf16 %v658_v5, %v654_v4  ;;  %v657_v14 = vld [vmem:[#allocation4 + $0x70] sm:$0xff]  ;;  %v660_v15 = vld [vmem:[#allocation4 + $0x88] sm:$0xff] }
  0x81   :  { %359 = vmatprep.mubr.f32.mxu1 %v4765_v0  ;;  %2841 = vmatpush1.bf16.msra.mxu0 %v2840_v53  ;;  %v655_v11 = vld [vmem:[#allocation4 + $0x60] sm:$0xff]  ;;  %v664_v16 = vld [vmem:[#allocation4 + $0xa8] sm:$0xff]  ;;  %v662_v17 = vld [vmem:[#allocation4 + $0x98] sm:$0xff]  ;;  %v4006_v21 = vpack.c.bf16 %v657_v14, %v653_v12 }
  0x82   :  { %2849 = vmatpush1.bf16.msra.mxu1 %v2848_v55  ;;  %2851 = vmatprep.subr.bf16.mxu0 %v3973_v56  ;;  %v666_v18 = vld [vmem:[#allocation4 + $0xb8] sm:$0xff]  ;;  %v4002_v19 = vpack.c.bf16 %v655_v11, %v651_v10  ;;  %v140_v20 = vld [vmem:[#allocation16 + $0x8] sm:$0xff]  ;;  %v4008_v22 = vpack.c.bf16 %v664_v16, %v660_v15  ;;  %v659_v23 = vld [vmem:[#allocation4 + $0x80] sm:$0xff] }
  0x83   :  { %2764 = vmatmul.mubr.msk.f32.gmra.mrb[4].mxu0 %vm181_vm0, %v137_v58  ;;  %2883 = vmatprep.subr.bf16.mxu1 %v3976_v57  ;;  %v663_v24 = vld [vmem:[#allocation4 + $0xa0] sm:$0xff]  ;;  %v661_v25 = vld [vmem:[#allocation4 + $0x90] sm:$0xff]  ;;  %v4011_v26 = vpack.c.bf16 %v666_v18, %v662_v17  ;;  %v668_v28 = vld [vmem:[#allocation4 + $0xc8] sm:$0xff] }
  0x84   :  { %2768 = vmatmul.mubr.msk.f32.gmra.mrb[4].mxu1 %vm181_vm0, %v137_v58  ;;  %276 = vmatprep.mubr.f32.mxu0 %v4765_v0  ;;  %v665_v27 = vld [vmem:[#allocation4 + $0xb0] sm:$0xff]  ;;  %v672_v29 = vld [vmem:[#allocation4 + $0xe8] sm:$0xff]  ;;  %v670_v30 = vld [vmem:[#allocation4 + $0xd8] sm:$0xff]  ;;  %v4017_v32 = vpack.c.bf16 %v663_v24, %v659_v23 }
  0x85   :  { %365 = vmatprep.mubr.f32.mxu1 %v4765_v0  ;;  %v674_v31 = vld [vmem:[#allocation4 + $0xf8] sm:$0xff]  ;;  %v141_v33 = vld [vmem:[#allocation16 + $0x10] sm:$0xff]  ;;  %v4022_v34 = vpack.c.bf16 %v665_v27, %v661_v25  ;;  %v4024_v35 = vpack.c.bf16 %v672_v29, %v668_v28  ;;  %v667_v36 = vld [vmem:[#allocation4 + $0xc0] sm:$0xff] }
  0x86   :  { %v671_v37 = vld [vmem:[#allocation4 + $0xe0] sm:$0xff]  ;;  %v669_v38 = vld [vmem:[#allocation4 + $0xd0] sm:$0xff]  ;;  %v4027_v39 = vpack.c.bf16 %v674_v31, %v670_v30  ;;  %v676_v41 = vld [vmem:[#allocation4 + $0x108] sm:$0xff] }
  0x87   :  { %2765 = vmatmul.mubr.msk.f32.gmra.mrb[6].mxu0 %vm181_vm0, %v138_v59  ;;  %v673_v40 = vld [vmem:[#allocation4 + $0xf0] sm:$0xff]  ;;  %v680_v42 = vld [vmem:[#allocation4 + $0x128] sm:$0xff]  ;;  %v678_v43 = vld [vmem:[#allocation4 + $0x118] sm:$0xff]  ;;  %v4033_v45 = vpack.c.bf16 %v671_v37, %v667_v36 }
  0x88   :  { %2769 = vmatmul.mubr.msk.f32.gmra.mrb[6].mxu1 %vm181_vm0, %v138_v59  ;;  %486 = vmatprep.mubr.f32.mxu0 %v4765_v0  ;;  %v682_v44 = vld [vmem:[#allocation4 + $0x138] sm:$0xff]  ;;  %v4038_v47 = vpack.c.bf16 %v673_v40, %v669_v38  ;;  %v4040_v48 = vpack.c.bf16 %v680_v42, %v676_v41  ;;  %v675_v49 = vld [vmem:[#allocation4 + $0x100] sm:$0xff]  ;;  %v677_v51 = vld [vmem:[#allocation4 + $0x110] sm:$0xff] }
  0x89   :  { %575 = vmatprep.mubr.f32.mxu1 %v4765_v0  ;;  %v142_v46 = vld [vmem:[#allocation16 + $0x18] sm:$0xff]  ;;  %v679_v50 = vld [vmem:[#allocation4 + $0x120] sm:$0xff]  ;;  %v4043_v52 = vpack.c.bf16 %v682_v44, %v678_v43  ;;  %v681_v53 = vld [vmem:[#allocation4 + $0x130] sm:$0xff] }
  0x8a   :  { %v684_v54 = vld [vmem:[#allocation4 + $0x148] sm:$0xff]  ;;  %v686_v58 = vld [vmem:[#allocation4 + $0x158] sm:$0xff]  ;;  %v4049_v60 = vpack.c.bf16 %v679_v50, %v675_v49  ;;  %v4054_v61 = vpack.c.bf16 %v681_v53, %v677_v51  ;;  %v683_v63 = vld [vmem:[#allocation4 + $0x140] sm:$0xff] }
  0x8b   :  { %2770 = vmatmul.mubr.msk.f32.vlgmr.msra.gmra.mrb[8].mxu0 %vm181_vm0, %v139_v6  ;;  %v688_v55 = vld [vmem:[#allocation4 + $0x168] sm:$0xff]  ;;  %v690_v59 = vld [vmem:[#allocation4 + $0x178] sm:$0xff]  ;;  %v687_v2 = vld [vmem:[#allocation4 + $0x160] sm:$0xff] }
  0x8c   :  { %2774 = vmatmul.mubr.msk.f32.vlgmr.msra.gmra.mrb[8].mxu1 %vm181_vm0, %v139_v6  ;;  %2853 = vmatpush1.bf16.msra.mxu0 %v3990_v7  ;;  %v4056_v62 = vpack.c.bf16 %v688_v55, %v684_v54  ;;  %v685_v3 = vld [vmem:[#allocation4 + $0x150] sm:$0xff]  ;;  %v4059_v4 = vpack.c.bf16 %v690_v59, %v686_v58  ;;  %v692_v6 = vld [vmem:[#allocation4 + $0x188] sm:$0xff]  ;;  %v694_v11 = vld [vmem:[#allocation4 + $0x198] sm:$0xff]  ;;  %v4064_v14 = vpack.c.bf16 %v687_v2, %v683_v63 }
  0x8d   :  { %2885 = vmatpush1.bf16.msra.mxu1 %v3993_v8  ;;  %2855 = vmatprep.subr.bf16.mxu0 %v3995_v9  ;;  %v689_v5 = vld [vmem:[#allocation4 + $0x170] sm:$0xff]  ;;  %v696_v10 = vld [vmem:[#allocation4 + $0x1a8] sm:$0xff]  ;;  %v698_v12 = vld [vmem:[#allocation4 + $0x1b8] sm:$0xff] }
  0x8e   :  { %2887 = vmatprep.subr.bf16.mxu1 %v3997_v13  ;;  %492 = vmatprep.mubr.f32.mxu0 %v4765_v0  ;;  %v4068_v15 = vpack.c.bf16 %v689_v5, %v685_v3  ;;  %v4070_v16 = vpack.c.bf16 %v696_v10, %v692_v6  ;;  %v691_v17 = vld [vmem:[#allocation4 + $0x180] sm:$0xff]  ;;  %v4073_v23 = vpack.c.bf16 %v698_v12, %v694_v11  ;;  %v697_v24 = vld [vmem:[#allocation4 + $0x1b0] sm:$0xff]  ;;  %v700_v25 = vld [vmem:[#allocation4 + $0x1c8] sm:$0xff] }
  0x8f   :  { %581 = vmatprep.mubr.f32.mxu1 %v4765_v0  ;;  %2771 = vmatmul.mubr.msk.f32.gmra.mrb[10].mxu0 %vm181_vm0, %v140_v20  ;;  %v695_v18 = vld [vmem:[#allocation4 + $0x1a0] sm:$0xff]  ;;  %v704_v27 = vld [vmem:[#allocation4 + $0x1e8] sm:$0xff]  ;;  %v702_v28 = vld [vmem:[#allocation4 + $0x1d8] sm:$0xff] }
  0x90   :  { %2857 = vmatpush1.bf16.msra.mxu0 %v4002_v19  ;;  %2775 = vmatmul.mubr.msk.f32.gmra.mrb[10].mxu1 %vm181_vm0, %v140_v20  ;;  %v693_v20 = vld [vmem:[#allocation4 + $0x190] sm:$0xff]  ;;  %v706_v29 = vld [vmem:[#allocation4 + $0x1f8] sm:$0xff]  ;;  %v4076_v30 = vpack.c.bf16 %v695_v18, %v691_v17  ;;  %v699_v36 = vld [vmem:[#allocation4 + $0x1c0] sm:$0xff] }
  0x91   :  { %2889 = vmatpush1.bf16.msra.mxu1 %v4006_v21  ;;  %2859 = vmatprep.subr.bf16.mxu0 %v4008_v22  ;;  %v4080_v31 = vpack.c.bf16 %v697_v24, %v693_v20  ;;  %v703_v37 = vld [vmem:[#allocation4 + $0x1e0] sm:$0xff]  ;;  %v701_v38 = vld [vmem:[#allocation4 + $0x1d0] sm:$0xff]  ;;  %v4085_v40 = vpack.c.bf16 %v706_v29, %v702_v28  ;;  %v895_v42 = vld [vmem:[#allocation5 + $0x8] sm:$0xff] }
  0x92   :  { %2891 = vmatprep.subr.bf16.mxu1 %v4011_v26  ;;  %498 = vmatprep.mubr.f32.mxu0 %v4765_v0  ;;  %v705_v41 = vld [vmem:[#allocation4 + $0x1f0] sm:$0xff]  ;;  %v899_v43 = vld [vmem:[#allocation5 + $0x28] sm:$0xff]  ;;  %v897_v44 = vld [vmem:[#allocation5 + $0x18] sm:$0xff]  ;;  %v4088_v49 = vpack.c.bf16 %v703_v37, %v699_v36 }
  0x93   :  { %587 = vmatprep.mubr.f32.mxu1 %v4765_v0  ;;  %2772 = vmatmul.mubr.msk.f32.gmra.mrb[12].mxu0 %vm181_vm0, %v141_v33  ;;  %v4092_v50 = vpack.c.bf16 %v705_v41, %v701_v38  ;;  %v4094_v51 = vpack.c.bf16 %v899_v43, %v895_v42  ;;  %v894_v53 = vld [vmem:[#allocation5] sm:$0xff]  ;;  %v896_v55 = vld [vmem:[#allocation5 + $0x10] sm:$0xff]  ;;  %v903_v63 = vld [vmem:[#allocation5 + $0x48] sm:$0xff] }
  0x94   :  { %2861 = vmatpush1.bf16.msra.mxu0 %v4017_v32  ;;  %2776 = vmatmul.mubr.msk.f32.gmra.mrb[12].mxu1 %vm181_vm0, %v141_v33  ;;  %v4082_v33 = vpack.c.bf16 %v704_v27, %v700_v25  ;;  %v898_v54 = vld [vmem:[#allocation5 + $0x20] sm:$0xff]  ;;  %v900_v59 = vld [vmem:[#allocation5 + $0x30] sm:$0xff]  ;;  %v907_v2 = vld [vmem:[#allocation5 + $0x68] sm:$0xff] }
  0x95   :  { %2893 = vmatpush1.bf16.msra.mxu1 %v4022_v34  ;;  %2863 = vmatprep.subr.bf16.mxu0 %v4024_v35  ;;  %v905_v3 = vld [vmem:[#allocation5 + $0x58] sm:$0xff]  ;;  %v4100_v6 = vpack.c.bf16 %v898_v54, %v894_v53  ;;  %v4105_v10 = vld [vmem:[%s4751_s0] sm:$0xff]  ;;  %v4109_v11 = vpack.c.bf16 %v900_v59, %v896_v55  ;;  %v4111_v12 = vpack.c.bf16 %v907_v2, %v903_v63  ;;  %v902_v17 = vld [vmem:[#allocation5 + $0x40] sm:$0xff] }
  0x96   :  { %2895 = vmatprep.subr.bf16.mxu1 %v4027_v39  ;;  %504 = vmatprep.mubr.f32.mxu0 %v4765_v0  ;;  %v909_v5 = vld [vmem:[#allocation5 + $0x78] sm:$0xff]  ;;  %v906_v18 = vld [vmem:[#allocation5 + $0x60] sm:$0xff]  ;;  %v904_v20 = vld [vmem:[#allocation5 + $0x50] sm:$0xff]  ;;  %vm2781_vm1 = vcmp.gt.s32.totalorder %v4105_v10, 0  ;;  %vm2785_vm2 = vcmp.gt.s32.totalorder %v4105_v10, 3  ;;  %vm2793_vm3 = vcmp.gt.s32.totalorder %v4105_v10, 2 }
  0x97   :  { %593 = vmatprep.mubr.f32.mxu1 %v4765_v0  ;;  %2773 = vmatmul.mubr.msk.f32.gmra.mrb[14].mxu0 %vm181_vm0, %v142_v46  ;;  %v4116_v24 = vpack.c.bf16 %v909_v5, %v905_v3  ;;  %v908_v25 = vld [vmem:[#allocation5 + $0x70] sm:$0xff]  ;;  %v911_v27 = vld [vmem:[#allocation5 + $0x88] sm:$0xff]  ;;  %v879_v29 = vsel %vm2781_vm1, 1, %v4764_v1  ;;  %v913_v36 = vld [vmem:[#allocation5 + $0x98] sm:$0xff]  ;;  %v4122_v38 = vpack.c.bf16 %v906_v18, %v902_v17  ;;  %v4125_v41 = vsel %vm2785_vm2, 1, %v4764_v1 }
  0x98   :  { %2865 = vmatpush1.bf16.msra.mxu0 %v4033_v45  ;;  %2777 = vmatmul.mubr.msk.f32.gmra.mrb[14].mxu1 %vm181_vm0, %v142_v46  ;;  %v901_v46 = vld [vmem:[#allocation5 + $0x38] sm:$0xff]  ;;  %v915_v28 = vld [vmem:[#allocation5 + $0xa8] sm:$0xff]  ;;  %v4129_v42 = vpack.c.bf16 %v908_v25, %v904_v20  ;;  %v912_v53 = vld [vmem:[#allocation5 + $0x90] sm:$0xff]  ;;  %v4144_v17 = vsel %vm2793_vm3, 1, %v4764_v1  ;;  %vm2789_vm4 = vcmp.gt.s32.totalorder %v4105_v10, 1 }
  0x99   :  { %2897 = vmatpush1.bf16.msra.mxu1 %v4038_v47  ;;  %2867 = vmatprep.subr.bf16.mxu0 %v4040_v48  ;;  %v4097_v58 = vpack.c.bf16 %v901_v46, %v897_v44  ;;  %v917_v37 = vld [vmem:[#allocation5 + $0xb8] sm:$0xff]  ;;  %v4131_v43 = vpack.c.bf16 %v915_v28, %v911_v27  ;;  %v910_v44 = vld [vmem:[#allocation5 + $0x80] sm:$0xff]  ;;  %v916_v55 = vld [vmem:[#allocation5 + $0xb0] sm:$0xff] }
  0x9a   :  { %2899 = vmatprep.subr.bf16.mxu1 %v4043_v52  ;;  %771 = vmatprep.mubr.f32.mxu0 %v4765_v0  ;;  %4811 = vst [vmem:[#allocation43_spill] sm:$0xff] %v4129_v42  ;;  %v914_v46 = vld [vmem:[#allocation5 + $0xa0] sm:$0xff]  ;;  %v4135_v54 = vpack.c.bf16 %v917_v37, %v913_v36  ;;  %v919_v59 = vld [vmem:[#allocation5 + $0xc8] sm:$0xff]  ;;  %v921_v2 = vld [vmem:[#allocation5 + $0xd8] sm:$0xff]  ;;  %v4148_v18 = vpack.c.bf16 %v916_v55, %v912_v53 }
  0x9b   :  { %842 = vmatprep.mubr.f32.mxu1 %v4765_v0  ;;  %881 = vperm.xlu0 %3440, %v879_v29   ;;  %4812 = vst [vmem:[#allocation44_spill] sm:$0xff] %v4131_v43  ;;  %v923_v63 = vld [vmem:[#allocation5 + $0xe8] sm:$0xff]  ;;  %v925_v3 = vld [vmem:[#allocation5 + $0xf8] sm:$0xff]  ;;  %v4141_v5 = vpack.c.bf16 %v914_v46, %v910_v44  ;;  %v918_v25 = vld [vmem:[#allocation5 + $0xc0] sm:$0xff] }
  0x9c   :  { %2869 = vmatpush1.bf16.msra.mxu0 %v4049_v60  ;;  %4813 = vst [vmem:[#allocation45_spill] sm:$0xff] %v4135_v54  ;;  %v4150_v20 = vpack.c.bf16 %v923_v63, %v919_v59  ;;  %v922_v27 = vld [vmem:[#allocation5 + $0xe0] sm:$0xff]  ;;  %v920_v28 = vld [vmem:[#allocation5 + $0xd0] sm:$0xff]  ;;  %v4153_v36 = vpack.c.bf16 %v925_v3, %v921_v2  ;;  %v927_v44 = vld [vmem:[#allocation5 + $0x108] sm:$0xff] }
  0x9d   :  { %2901 = vmatpush1.bf16.msra.mxu1 %v4054_v61  ;;  %2871 = vmatprep.subr.bf16.mxu0 %v4056_v62  ;;  %4814 = vst [vmem:[#allocation46_spill] sm:$0xff] %v4141_v5  ;;  %v924_v37 = vld [vmem:[#allocation5 + $0xf0] sm:$0xff]  ;;  %v931_v46 = vld [vmem:[#allocation5 + $0x128] sm:$0xff]  ;;  %v929_v1 = vld [vmem:[#allocation5 + $0x118] sm:$0xff]  ;;  %v4157_v53 = vpack.c.bf16 %v922_v27, %v918_v25 }
  0x9e   :  { %2903 = vmatprep.subr.bf16.mxu1 %v4059_v4  ;;  %4815 = vst [vmem:[#allocation47_spill] sm:$0xff] %v4150_v20  ;;  %4816 = vst [vmem:[#allocation48_spill] sm:$0xff] %v4153_v36  ;;  %v4161_v55 = vpack.c.bf16 %v924_v37, %v920_v28  ;;  %v4163_v59 = vpack.c.bf16 %v931_v46, %v927_v44  ;;  %v926_v63 = vld [vmem:[#allocation5 + $0x100] sm:$0xff]  ;;  %v928_v3 = vld [vmem:[#allocation5 + $0x110] sm:$0xff] }
  0x9f   :  { %1132 = vperm.xlu0 %3440, %v4125_v41   ;;  %4817 = vst [vmem:[#allocation49_spill] sm:$0xff] %v4157_v53  ;;  %v930_v2 = vld [vmem:[#allocation5 + $0x120] sm:$0xff]  ;;  %v937_v25 = vld [vmem:[#allocation5 + $0x158] sm:$0xff]  ;;  %v936_v44 = vld [vmem:[#allocation5 + $0x150] sm:$0xff] }
  0xa0   :  { %2873 = vmatpush1.bf16.msra.mxu0 %v4064_v14  ;;  %4818 = vst [vmem:[#allocation50_spill] sm:$0xff] %v4161_v55  ;;  %4819 = vst [vmem:[#allocation51_spill] sm:$0xff] %v4163_v59  ;;  %v941_v27 = vld [vmem:[#allocation5 + $0x178] sm:$0xff] }
  0xa1   :  { %2905 = vmatpush1.bf16.msra.mxu1 %v4068_v15  ;;  %2875 = vmatprep.subr.bf16.mxu0 %v4070_v16  ;;  %v4178_v46 = vpack.c.bf16 %v941_v27, %v937_v25  ;;  %v944_v25 = vld [vmem:[#allocation5 + $0x190] sm:$0xff] }
  0xa2   :  { %2907 = vmatprep.subr.bf16.mxu1 %v4073_v23 }
  0xa3   :  { %1888 = vperm.xlu0 %3440, %v4144_v17   ;;  %4823 = vst [vmem:[#allocation55_spill] sm:$0xff] %v4178_v46 }
  0xa4   :  { %2877 = vmatpush1.bf16.msra.mxu0 %v4076_v30 }
  0xa5   :  { %2909 = vmatpush1.bf16.msra.mxu1 %v4080_v31  ;;  %2879 = vmatprep.subr.bf16.mxu0 %v4082_v33 }
  0xa6   :  { %2911 = vmatprep.subr.bf16.mxu1 %v4085_v40 }
  0xa7   :  { %2642 = vperm.xlu0 %3440, %v879_v29   ;;  %v940_v29 = vld [vmem:[#allocation5 + $0x170] sm:$0xff] }
  0xa8   :  { %2881 = vmatpush1.bf16.msra.mxu0 %v4088_v49 }
  0xa9   :  { %2913 = vmatpush1.bf16.msra.mxu1 %v4092_v50  ;;  %2915 = vmatprep.subr.bf16.mxu0 %v4094_v51 }
  0xaa   :  { %2947 = vmatprep.subr.bf16.mxu1 %v4097_v58 }
  0xab   :  { %772 = vmatmul.mubr.f32.vlgmr.msra.gmra.mrb[0].mxu0 %v4765_v0 }
  0xac   :  { %843 = vmatmul.mubr.f32.vlgmr.msra.gmra.mrb[0].mxu1 %v4765_v0  ;;  %2917 = vmatpush1.bf16.msra.mxu0 %v4100_v6 }
  0xad   :  { %2949 = vmatpush1.bf16.msra.mxu1 %v4109_v11  ;;  %2919 = vmatprep.subr.bf16.mxu0 %v4111_v12 }
  0xae   :  { %2951 = vmatprep.subr.bf16.mxu1 %v4116_v24  ;;  %1022 = vmatprep.mubr.f32.mxu0 %v4765_v0 }
  0xaf   :  { %1093 = vmatprep.mubr.f32.mxu1 %v4765_v0  ;;  %v933_v0 = vld [vmem:[#allocation5 + $0x138] sm:$0xff] }
  0xb0   :  { %2921 = vmatpush1.bf16.msra.mxu0 %v4122_v38 }
  0xb1   :  { %2953 = vmatpush1.bf16.msra.mxu1 %v4129_v42  ;;  %2923 = vmatprep.subr.bf16.mxu0 %v4131_v43  ;;  %v932_v43 = vld [vmem:[#allocation5 + $0x130] sm:$0xff]  ;;  %v935_v42 = vld [vmem:[#allocation5 + $0x148] sm:$0xff] }
  0xb2   :  { %2955 = vmatprep.subr.bf16.mxu1 %v4135_v54  ;;  %v4166_v54 = vpack.c.bf16 %v933_v0, %v929_v1  ;;  %v4173_v28 = vpack.c.bf16 %v932_v43, %v928_v3  ;;  %v934_v0 = vld [vmem:[#allocation5 + $0x140] sm:$0xff] }
  0xb3   :  { %v938_v1 = vld [vmem:[#allocation5 + $0x160] sm:$0xff] }
  0xb4   :  { %2925 = vmatpush1.bf16.msra.mxu0 %v4141_v5  ;;  %4820 = vst [vmem:[#allocation52_spill] sm:$0xff] %v4166_v54  ;;  %v939_v5 = vld [vmem:[#allocation5 + $0x168] sm:$0xff]  ;;  %4822 = vst [vmem:[#allocation54_spill] sm:$0xff] %v4173_v28  ;;  %v946_v3 = vld [vmem:[#allocation5 + $0x1a0] sm:$0xff] }
  0xb5   :  { %2957 = vmatpush1.bf16.msra.mxu1 %v4148_v18  ;;  %2927 = vmatprep.subr.bf16.mxu0 %v4150_v20  ;;  %v4169_v20 = vpack.c.bf16 %v930_v2, %v926_v63  ;;  %v4175_v37 = vpack.c.bf16 %v939_v5, %v935_v42  ;;  %v945_v63 = vld [vmem:[#allocation5 + $0x198] sm:$0xff]  ;;  %v4185_v42 = vpack.c.bf16 %v940_v29, %v936_v44  ;;  %v942_v5 = vld [vmem:[#allocation5 + $0x180] sm:$0xff] }
  0xb6   :  { %2959 = vmatprep.subr.bf16.mxu1 %v4153_v36  ;;  %v943_v36 = vld [vmem:[#allocation5 + $0x188] sm:$0xff]  ;;  %v949_v2 = vld [vmem:[#allocation5 + $0x1b8] sm:$0xff]  ;;  %v950_v44 = vld [vmem:[#allocation5 + $0x1c0] sm:$0xff] }
  0xb7   :  { %4821 = vst [vmem:[#allocation53_spill] sm:$0xff] %v4169_v20  ;;  %v4190_v27 = vpack.c.bf16 %v949_v2, %v945_v63  ;;  %v954_v29 = vld [vmem:[#allocation5 + $0x1e0] sm:$0xff]  ;;  %v952_v2 = vld [vmem:[#allocation5 + $0x1d0] sm:$0xff] }
  0xb8   :  { %2929 = vmatpush1.bf16.msra.mxu0 %v4157_v53  ;;  %v947_v53 = vld [vmem:[#allocation5 + $0x1a8] sm:$0xff] }
  0xb9   :  { %2961 = vmatpush1.bf16.msra.mxu1 %v4161_v55  ;;  %2931 = vmatprep.subr.bf16.mxu0 %v4163_v59  ;;  %v4181_v55 = vpack.c.bf16 %v938_v1, %v934_v0  ;;  %v4187_v43 = vpack.c.bf16 %v947_v53, %v943_v36  ;;  %v951_v59 = vld [vmem:[#allocation5 + $0x1c8] sm:$0xff]  ;;  %v953_v0 = vld [vmem:[#allocation5 + $0x1d8] sm:$0xff] }
  0xba   :  { %2963 = vmatprep.subr.bf16.mxu1 %v4166_v54  ;;  %v948_v54 = vld [vmem:[#allocation5 + $0x1b0] sm:$0xff]  ;;  %v957_v1 = vld [vmem:[#allocation5 + $0x1f8] sm:$0xff] }
  0xbb   :  { %v4197_v36 = vpack.c.bf16 %v948_v54, %v944_v25  ;;  %v4202_v63 = vpack.c.bf16 %v957_v1, %v953_v0 }
  0xbc   :  { %2933 = vmatpush1.bf16.msra.mxu0 %v4169_v20  ;;  %v955_v20 = vld [vmem:[#allocation5 + $0x1e8] sm:$0xff] }
  0xbd   :  { %2965 = vmatpush1.bf16.msra.mxu1 %v4173_v28  ;;  %2935 = vmatprep.subr.bf16.mxu0 %v4175_v37  ;;  %v4193_v28 = vpack.c.bf16 %v946_v3, %v942_v5  ;;  %v4199_v53 = vpack.c.bf16 %v955_v20, %v951_v59  ;;  %v4205_v5 = vpack.c.bf16 %v954_v29, %v950_v44  ;;  %v4824_v20 = vmov 0.0  }
  0xbe   :  { %2967 = vmatprep.subr.bf16.mxu1 %v4178_v46  ;;  %v956_v46 = vld [vmem:[#allocation5 + $0x1f0] sm:$0xff] }
  0xbf   :  { %v4209_v54 = vpack.c.bf16 %v956_v46, %v952_v2 }
  0xc0   :  { %2937 = vmatpush1.bf16.msra.mxu0 %v4181_v55 }
  0xc1   :  { %2969 = vmatpush1.bf16.msra.mxu1 %v4185_v42  ;;  %2939 = vmatprep.subr.bf16.mxu0 %v4187_v43 }
  0xc2   :  { %2971 = vmatprep.subr.bf16.mxu1 %v4190_v27 }
  0xc4   :  { %2941 = vmatpush1.bf16.msra.mxu0 %v4193_v28 }
  0xc5   :  { %2973 = vmatpush1.bf16.msra.mxu1 %v4197_v36  ;;  %2943 = vmatprep.subr.bf16.mxu0 %v4199_v53 }
  0xc6   :  { %2975 = vmatprep.subr.bf16.mxu1 %v4202_v63 }
  0xc8   :  { %2945 = vmatpush1.bf16.msra.mxu0 %v4205_v5 }
  0xc9   :  { %2977 = vmatpush1.bf16.msra.mxu1 %v4209_v54  ;;  %2979 = vmatprep.subr.bf16.mxu0 %v3973_v56  ;;  %v4825_v56 = vmov 0  }
  0xca   :  { %3011 = vmatprep.subr.bf16.mxu1 %v3976_v57  ;;  %v1382_v57 = vsel %vm2789_vm4, 1, %v4825_v56 }
  0xcb   :  { %1023 = vmatmul.mubr.f32.vlgmr.msra.gmra.mrb[14].mxu0 %v4824_v20  ;;  %1384 = vperm.xlu1 %3441, %v1382_v57  }
  0xcc   :  { %1094 = vmatmul.mubr.f32.vlgmr.msra.gmra.mrb[14].mxu1 %v4824_v20  ;;  %2981 = vmatpush1.bf16.msra.mxu0 %v3990_v7  ;;  %v161_v7 = vlaneseq }
  0xcd   :  { %3013 = vmatpush1.bf16.msra.mxu1 %v3993_v8  ;;  %2983 = vmatprep.subr.bf16.mxu0 %v3995_v9 }
  0xce   :  { %3015 = vmatprep.subr.bf16.mxu1 %v3997_v13  ;;  %1274 = vmatprep.mubr.f32.mxu0 %v4824_v20  ;;  %v162_v8 = vshrl.u32 %v161_v7, 7  ;;  %v159_v13 = vld [vmem:[%s4758_s7] sm:$0xf] }
  0xcf   :  { %1345 = vmatprep.mubr.f32.mxu1 %v4824_v20  ;;  %1636 = vperm.xlu1 %3441, %v4144_v17  }
  0xd0   :  { %2985 = vmatpush1.bf16.msra.mxu0 %v4002_v19  ;;  %v163_v9 = vsub.s32 0, %v162_v8  ;;  %v167_v19 = vsub.s32 1, %v162_v8 }
  0xd1   :  { %3017 = vmatpush1.bf16.msra.mxu1 %v4006_v21  ;;  %2987 = vmatprep.subr.bf16.mxu0 %v4008_v22 }
  0xd2   :  { %3019 = vmatprep.subr.bf16.mxu1 %v4011_v26  ;;  %v4259_v21 = vrot.slane %v159_v13, %v163_v9  ;;  %v4261_v22 = vrot.slane %v159_v13, %v167_v19 }
  0xd3   :  { %2140 = vperm.xlu1 %3441, %v1382_v57  }
  0xd4   :  { %2989 = vmatpush1.bf16.msra.mxu0 %v4017_v32  ;;  %4826 = vst [vmem:[#allocation56_spill] sm:$0xff] %v4259_v21  ;;  %4827 = vst [vmem:[#allocation57_spill] sm:$0xff] %v4261_v22  ;;  %v175_v32 = vsub.s32 3, %v162_v8 }
  0xd5   :  { %3021 = vmatpush1.bf16.msra.mxu1 %v4022_v34  ;;  %2991 = vmatprep.subr.bf16.mxu0 %v4024_v35 }
  0xd6   :  { %3023 = vmatprep.subr.bf16.mxu1 %v4027_v39 }
  0xd7   :  { %2392 = vperm.xlu1 %3441, %v4125_v41  }
  0xd8   :  { %2993 = vmatpush1.bf16.msra.mxu0 %v4033_v45 }
  0xd9   :  { %3025 = vmatpush1.bf16.msra.mxu1 %v4038_v47  ;;  %2995 = vmatprep.subr.bf16.mxu0 %v4040_v48 }
  0xda   :  { %3027 = vmatprep.subr.bf16.mxu1 %v4043_v52 }
  0xdc   :  { %2997 = vmatpush1.bf16.msra.mxu0 %v4049_v60  ;;  %v4265_v60 = vrot.slane %v159_v13, %v175_v32 }
  0xdd   :  { %3029 = vmatpush1.bf16.msra.mxu1 %v4054_v61  ;;  %2999 = vmatprep.subr.bf16.mxu0 %v4056_v62  ;;  %v171_v61 = vsub.s32 2, %v162_v8 }
  0xde   :  { %3031 = vmatprep.subr.bf16.mxu1 %v4059_v4  ;;  %4828 = vst [vmem:[#allocation58_spill] sm:$0xff] %v4265_v60 }
  0xdf   :  { %v4268_v4 = vrot.slane %v159_v13, %v171_v61 }
  0xe0   :  { %3001 = vmatpush1.bf16.msra.mxu0 %v4064_v14 }
  0xe1   :  { %3033 = vmatpush1.bf16.msra.mxu1 %v4068_v15  ;;  %3003 = vmatprep.subr.bf16.mxu0 %v4070_v16  ;;  %4829 = vst [vmem:[#allocation59_spill] sm:$0xff] %v4268_v4 }
  0xe2   :  { %3035 = vmatprep.subr.bf16.mxu1 %v4073_v23 }
  0xe4   :  { %3005 = vmatpush1.bf16.msra.mxu0 %v4076_v30 }
  0xe5   :  { %3037 = vmatpush1.bf16.msra.mxu1 %v4080_v31  ;;  %3007 = vmatprep.subr.bf16.mxu0 %v4082_v33 }
  0xe6   :  { %3039 = vmatprep.subr.bf16.mxu1 %v4085_v40  ;;  %v388_v40 = vld [vmem:[%s4759_s8] sm:$0xf]  ;;  %s3818_s8 = smov [#allocation18]  }
  0xe7   :  { %v4274_v41 = vrot.slane %v388_v40, %v163_v9  ;;  %v4276_v46 = vrot.slane %v388_v40, %v167_v19  ;;  %v4283_v8 = vrot.slane %v388_v40, %v175_v32  ;;  %v4286_v13 = vrot.slane %v388_v40, %v171_v61  ;;  %v4833_v61 = vld [vmem:[#allocation43_spill] sm:$0xff]  ;;  %s2667_s24 = sshll.u32 %s3818_s8, 4  ;;  %s2668_s24 = int_to_ptr.vmem [resolvable:$true] %s2667_s24 }
  0xe8   :  { %3009 = vmatpush1.bf16.msra.mxu0 %v4088_v49  ;;  %v4841_v40 = vld [vmem:[#allocation51_spill] sm:$0xff]  ;;  %s3702_s25 = scalar_lea.vmem %s2668_s24, 512  ;;  %p3707_p7 = scmp.lt.s32.totalorder %s2668_s24, %s2668_s24 }
  0xe9   :  { %3041 = vmatpush1.bf16.msra.mxu1 %v4092_v50  ;;  %3043 = vmatprep.subr.bf16.mxu0 %v4094_v51  ;;  %4830 = vst [vmem:[#allocation60_spill] sm:$0xff] %v4274_v41  ;;  %4831 = vst [vmem:[#allocation61_spill] sm:$0xff] %v4276_v46  ;;  %p3703_p6 = scmp.ne.s32.totalorder %s2668_s24, %s3702_s25  ;;  %p3708_p8 = scmp.lt.s32.totalorder %s3702_s25, %s3702_s25 }
  0xea   :  { %3075 = vmatprep.subr.bf16.mxu1 %v4097_v58  ;;  %4832 = vst [vmem:[#allocation62_spill] sm:$0xff] %v4283_v8 }
  0xeb   :  { %p3709_p9 = por %p3708_p8, %p3707_p7 }
  0xed   :  { %p3710_p10 = pnand %p3709_p9, %p3703_p6 }
 0x11a   :  { %v882_v51 = vpop.permute.xlu0 %881 }
 0x11b   :  { %vm883_vm5 = vcmp.eq.s32.totalorder %v882_v51, 1 }
 0x11e   :  { %v1133_v51 = vpop.permute.xlu0 %1132 }
 0x11f   :  { %vm1134_vm6 = vcmp.eq.s32.totalorder %v1133_v51, 1  ;;  %v1676_v51 = vld [vmem:[#allocation4 + $0xd0] sm:$0xff] }
 0x17e   :  { %v773_v26 = vpop.f32.mrb[0].mxu0 }
 0x17f   :  { %v3362_v34 = vadd.f32 %v773_v26, %v4259_v21  ;;  %v844_v35 = vpop.f32.mrb[0].mxu1  ;;  %v775_v39 = vpop.f32.mrb[1].mxu0 }
 0x180   :  { %v3363_v45 = vadd.f32 %v775_v39, %v4261_v22  ;;  %v846_v47 = vpop.f32.mrb[1].mxu1  ;;  %v3370_v15 = vadd.f32 %v844_v35, %v4268_v4 }
 0x181   :  { %v2778_v48 = vmul.f32 -1.442695, %v3362_v34  ;;  %v3371_v62 = vadd.f32 %v846_v47, %v4265_v60 }
 0x182   :  { %v2779_v52 = vmul.f32 -1.442695, %v3363_v45 }
 0x183   :  { %3442 = vpow2.f32 %v2778_v48  ;;  %v2780_v14 = vmul.f32 -1.442695, %v3371_v62  ;;  %v4834_v62 = vld [vmem:[#allocation44_spill] sm:$0xff] }
 0x184   :  { %3444 = vpow2.f32 %v2779_v52 }
 0x185   :  { %3446 = vpow2.f32 %v2780_v14 }
 0x186   :  { %3448 = vtanh.f32 %v3370_v15 }
 0x18d   :  { %v3443_v16 = vpop.eup %3442 }
 0x18e   :  { %v3445_v23 = vpop.eup %3444  ;;  %v856_v30 = vadd.f32 1.0, %v3443_v16 }
 0x18f   :  { %v862_v31 = vadd.f32 1.0, %v3445_v23  ;;  %v3447_v33 = vpop.eup %3446  ;;  %v4839_v23 = vld [vmem:[#allocation49_spill] sm:$0xff] }
 0x190   :  { %3450 = vrcp.f32 %v856_v30  ;;  %v3449_v49 = vpop.eup %3448  ;;  %v869_v10 = vadd.f32 1.0, %v3447_v33 }
 0x191   :  { %3452 = vrcp.f32 %v862_v31 }
 0x192   :  { %3454 = vrcp.f32 %v869_v10  ;;  %v4844_v10 = vld [vmem:[#allocation54_spill] sm:$0xff] }
 0x19a   :  { %v3451_v50 = vpop.eup %3450 }
 0x19b   :  { %v3453_v58 = vpop.eup %3452  ;;  %v873_v17 = vmul.f32 %v3451_v50, %v3449_v49  ;;  %v4842_v49 = vld [vmem:[#allocation52_spill] sm:$0xff] }
 0x19c   :  { %v872_v59 = vmul.f32 0.0, %v3453_v58  ;;  %v3455_v19 = vpop.eup %3454  ;;  %v4843_v58 = vld [vmem:[#allocation53_spill] sm:$0xff] }
 0x19e   :  { %v1024_v3 = vpop.f32.mrb[14].mxu0  ;;  %v874_v25 = vadd.f32 %v873_v17, %v872_v59  ;;  %v4845_v17 = vld [vmem:[#allocation55_spill] sm:$0xff] }
 0x19f   :  { %v3384_v0 = vadd.f32 %v1024_v3, %v4274_v41  ;;  %v1095_v1 = vpop.f32.mrb[14].mxu1  ;;  %v1026_v44 = vpop.f32.mrb[15].mxu0 }
 0x1a0   :  { %3456 = vtanh.f32 %v874_v25  ;;  %v4280_v29 = vsel %vm883_vm5, %v874_v25, 0.0  ;;  %v3385_v2 = vadd.f32 %v1026_v44, %v4276_v46  ;;  %v1097_v56 = vpop.f32.mrb[15].mxu1  ;;  %v3392_v35 = vadd.f32 %v1095_v1, %v4286_v13  ;;  %v1656_v1 = vld [vmem:[#allocation4 + $0x30] sm:$0xff] }
 0x1a1   :  { %v2782_v57 = vmul.f32 -1.442695, %v3384_v0  ;;  %v3393_v9 = vadd.f32 %v1097_v56, %v4283_v8  ;;  %v1652_v0 = vld [vmem:[#allocation4 + $0x10] sm:$0xff]  ;;  %v1663_v56 = vld [vmem:[#allocation4 + $0x68] sm:$0xff] }
 0x1a2   :  { %v2783_v7 = vmul.f32 -1.442695, %v3385_v2  ;;  %v4345_v44 = vpack.c.bf16 %v1656_v1, %v1652_v0  ;;  %v1659_v2 = vld [vmem:[#allocation4 + $0x48] sm:$0xff]  ;;  %v1684_v0 = vld [vmem:[#allocation4 + $0x110] sm:$0xff] }
 0x1a3   :  { %3458 = vpow2.f32 %v2782_v57  ;;  %v2784_v34 = vmul.f32 -1.442695, %v3393_v9  ;;  %v1661_v57 = vld [vmem:[#allocation4 + $0x58] sm:$0xff]  ;;  %v1688_v1 = vld [vmem:[#allocation4 + $0x130] sm:$0xff] }
 0x1a4   :  { %3460 = vpow2.f32 %v2783_v7  ;;  %v4350_v7 = vpack.c.bf16 %v1663_v56, %v1659_v2  ;;  %v1665_v9 = vld [vmem:[#allocation4 + $0x78] sm:$0xff]  ;;  %v4393_v2 = vpack.c.bf16 %v1688_v1, %v1684_v0  ;;  %v1691_v56 = vld [vmem:[#allocation4 + $0x148] sm:$0xff]  ;;  %v1706_v0 = vld [vmem:[#allocation4 + $0x1c0] sm:$0xff] }
 0x1a5   :  { %3462 = vpow2.f32 %v2784_v34  ;;  %v4352_v34 = vpack.c.bf16 %v1665_v9, %v1661_v57  ;;  %v1695_v57 = vld [vmem:[#allocation4 + $0x168] sm:$0xff]  ;;  %v1693_v9 = vld [vmem:[#allocation4 + $0x158] sm:$0xff]  ;;  %v1710_v1 = vld [vmem:[#allocation4 + $0x1e0] sm:$0xff] }
 0x1a6   :  { %3464 = vtanh.f32 %v3392_v35 }
 0x1aa   :  { %v3457_v26 = vpop.eup %3456 }
 0x1ab   :  { %v876_v39 = vmul.f32 %v3457_v26, %v3455_v19  ;;  %v1658_v19 = vld [vmem:[#allocation4 + $0x40] sm:$0xff] }
 0x1ac   :  { %v1662_v26 = vld [vmem:[#allocation4 + $0x60] sm:$0xff] }
 0x1ad   :  { %v3459_v45 = vpop.eup %3458  ;;  %v4290_v47 = vsel %vm883_vm5, %v876_v39, 0.0  ;;  %2814 = vmatmul.mubr.msk.f32.vlgmr.msra.gmra.mrb[2].mxu0 %vm883_vm5, %v876_v39  ;;  %2815 = vmatmul.mubr.msk.f32.vlgmr.msra.gmra.mrb[2].mxu1 %vm883_vm5, %v876_v39  ;;  %v4354_v35 = vpack.c.bf16 %v1662_v26, %v1658_v19  ;;  %v1660_v39 = vld [vmem:[#allocation4 + $0x50] sm:$0xff]  ;;  %v4398_v19 = vpack.c.bf16 %v1695_v57, %v1691_v56  ;;  %v1697_v26 = vld [vmem:[#allocation4 + $0x178] sm:$0xff]  ;;  %v4426_v57 = vpack.c.bf16 %v1710_v1, %v1706_v0 }
 0x1ae   :  { %v3461_v32 = vpop.eup %3460  ;;  %v1107_v48 = vadd.f32 1.0, %v3459_v45  ;;  %887 = vst [vmem:[#allocation18] sm:$0xff] %v4290_v47  ;;  %3045 = vmatpush1.bf16.msra.mxu0 %v4100_v6  ;;  %3077 = vmatpush1.bf16.msra.mxu1 %v4109_v11  ;;  %v4835_v6 = vld [vmem:[#allocation45_spill] sm:$0xff]  ;;  %v4836_v11 = vld [vmem:[#allocation46_spill] sm:$0xff] }
 0x1af   :  { %v1113_v52 = vadd.f32 1.0, %v3461_v32  ;;  %3047 = vmatprep.subr.bf16.mxu0 %v4111_v12  ;;  %3079 = vmatprep.subr.bf16.mxu1 %v4116_v24  ;;  %v4837_v12 = vld [vmem:[#allocation47_spill] sm:$0xff]  ;;  %v4838_v24 = vld [vmem:[#allocation48_spill] sm:$0xff]  ;;  %v3463_v14 = vpop.eup %3462  ;;  %v1664_v45 = vld [vmem:[#allocation4 + $0x70] sm:$0xff] }
 0x1b0   :  { %3466 = vrcp.f32 %v1107_v48  ;;  %1526 = vmatprep.mubr.f32.mxu0 %v4824_v20  ;;  %1597 = vmatprep.mubr.f32.mxu1 %v4824_v20  ;;  %v3465_v15 = vpop.eup %3464  ;;  %v1120_v31 = vadd.f32 1.0, %v3463_v14  ;;  %v1667_v32 = vld [vmem:[#allocation4 + $0x88] sm:$0xff]  ;;  %v4357_v48 = vpack.c.bf16 %v1664_v45, %v1660_v39  ;;  %v1668_v14 = vld [vmem:[#allocation4 + $0x90] sm:$0xff]  ;;  %v1690_v39 = vld [vmem:[#allocation4 + $0x140] sm:$0xff] }
 0x1b1   :  { %3468 = vrcp.f32 %v1113_v52  ;;  %v1671_v52 = vld [vmem:[#allocation4 + $0xa8] sm:$0xff]  ;;  %v1694_v45 = vld [vmem:[#allocation4 + $0x160] sm:$0xff] }
 0x1b2   :  { %3049 = vmatpush1.bf16.msra.mxu0 %v4122_v38  ;;  %3081 = vmatpush1.bf16.msra.mxu1 %v4833_v61  ;;  %v4840_v38 = vld [vmem:[#allocation50_spill] sm:$0xff]  ;;  %3470 = vrcp.f32 %v1120_v31 }
 0x1b3   :  { %3051 = vmatprep.subr.bf16.mxu0 %v4834_v62  ;;  %3083 = vmatprep.subr.bf16.mxu1 %v4835_v6  ;;  %v1669_v61 = vld [vmem:[#allocation4 + $0x98] sm:$0xff]  ;;  %v4361_v6 = vpack.c.bf16 %v1671_v52, %v1667_v32  ;;  %v4400_v32 = vpack.c.bf16 %v1697_v26, %v1693_v9  ;;  %v4402_v52 = vpack.c.bf16 %v1694_v45, %v1690_v39  ;;  %v1708_v9 = vld [vmem:[#allocation4 + $0x1d0] sm:$0xff]  ;;  %v1903_v45 = vld [vmem:[#allocation5 + $0x8] sm:$0xff] }
 0x1b4   :  { %v1673_v62 = vld [vmem:[#allocation4 + $0xb8] sm:$0xff]  ;;  %v1712_v26 = vld [vmem:[#allocation4 + $0x1f0] sm:$0xff] }
 0x1b5   :  { %v4429_v39 = vpack.c.bf16 %v1712_v26, %v1708_v9 }
 0x1b6   :  { %3053 = vmatpush1.bf16.msra.mxu0 %v4836_v11  ;;  %3085 = vmatpush1.bf16.msra.mxu1 %v4148_v18  ;;  %v4363_v11 = vpack.c.bf16 %v1673_v62, %v1669_v61  ;;  %v1692_v61 = vld [vmem:[#allocation4 + $0x150] sm:$0xff] }
 0x1b7   :  { %3055 = vmatprep.subr.bf16.mxu0 %v4837_v12  ;;  %3087 = vmatprep.subr.bf16.mxu1 %v4838_v24  ;;  %v1666_v12 = vld [vmem:[#allocation4 + $0x80] sm:$0xff]  ;;  %v1696_v62 = vld [vmem:[#allocation4 + $0x170] sm:$0xff] }
 0x1b8   :  { %v1670_v24 = vld [vmem:[#allocation4 + $0xa0] sm:$0xff] }
 0x1ba   :  { %v3467_v16 = vpop.eup %3466  ;;  %3057 = vmatpush1.bf16.msra.mxu0 %v4839_v23  ;;  %3089 = vmatpush1.bf16.msra.mxu1 %v4840_v38  ;;  %v1675_v23 = vld [vmem:[#allocation4 + $0xc8] sm:$0xff] }
 0x1bb   :  { %v3469_v30 = vpop.eup %3468  ;;  %v1124_v33 = vmul.f32 %v3467_v16, %v3465_v15  ;;  %3059 = vmatprep.subr.bf16.mxu0 %v4841_v40  ;;  %3091 = vmatprep.subr.bf16.mxu1 %v4842_v49  ;;  %v4366_v15 = vpack.c.bf16 %v1670_v24, %v1666_v12  ;;  %v1672_v16 = vld [vmem:[#allocation4 + $0xb0] sm:$0xff]  ;;  %v1679_v38 = vld [vmem:[#allocation4 + $0xe8] sm:$0xff]  ;;  %v1681_v40 = vld [vmem:[#allocation4 + $0xf8] sm:$0xff]  ;;  %v4405_v12 = vpack.c.bf16 %v1696_v62, %v1692_v61 }
 0x1bc   :  { %v1123_v50 = vmul.f32 0.0, %v3469_v30  ;;  %v4370_v30 = vpack.c.bf16 %v1672_v16, %v1668_v14  ;;  %v4372_v31 = vpack.c.bf16 %v1679_v38, %v1675_v23  ;;  %v1674_v49 = vld [vmem:[#allocation4 + $0xc0] sm:$0xff]  ;;  %v1699_v24 = vld [vmem:[#allocation4 + $0x188] sm:$0xff]  ;;  %v1701_v16 = vld [vmem:[#allocation4 + $0x198] sm:$0xff] }
 0x1bd   :  { %v1703_v14 = vld [vmem:[#allocation4 + $0x1a8] sm:$0xff]  ;;  %v1705_v38 = vld [vmem:[#allocation4 + $0x1b8] sm:$0xff] }
 0x1be   :  { %v1125_v18 = vadd.f32 %v1124_v33, %v1123_v50  ;;  %3061 = vmatpush1.bf16.msra.mxu0 %v4843_v58  ;;  %3093 = vmatpush1.bf16.msra.mxu1 %v4844_v10  ;;  %v1677_v33 = vld [vmem:[#allocation4 + $0xd8] sm:$0xff]  ;;  %v1680_v58 = vld [vmem:[#allocation4 + $0xf0] sm:$0xff]  ;;  %v4410_v23 = vpack.c.bf16 %v1703_v14, %v1699_v24  ;;  %v1907_v61 = vld [vmem:[#allocation5 + $0x28] sm:$0xff] }
 0x1bf   :  { %3063 = vmatprep.subr.bf16.mxu0 %v4175_v37  ;;  %3095 = vmatprep.subr.bf16.mxu1 %v4845_v17  ;;  %v3471_v37 = vpop.eup %3470  ;;  %v4374_v50 = vpack.c.bf16 %v1681_v40, %v1677_v33  ;;  %v4381_v17 = vpack.c.bf16 %v1680_v58, %v1676_v51  ;;  %v1698_v33 = vld [vmem:[#allocation4 + $0x180] sm:$0xff]  ;;  %v1700_v51 = vld [vmem:[#allocation4 + $0x190] sm:$0xff]  ;;  %v1905_v62 = vld [vmem:[#allocation5 + $0x18] sm:$0xff]  ;;  %v4434_v24 = vpack.c.bf16 %v1907_v61, %v1903_v45 }
 0x1c0   :  { %3472 = vtanh.f32 %v1125_v18  ;;  %v4318_v59 = vsel %vm1134_vm6, %v1125_v18, 0.0  ;;  %v1678_v18 = vld [vmem:[#allocation4 + $0xe0] sm:$0xff]  ;;  %v1704_v58 = vld [vmem:[#allocation4 + $0x1b0] sm:$0xff]  ;;  %v1909_v14 = vld [vmem:[#allocation5 + $0x38] sm:$0xff] }
 0x1c1   :  { %v4377_v10 = vpack.c.bf16 %v1678_v18, %v1674_v49  ;;  %v1702_v40 = vld [vmem:[#allocation4 + $0x1a0] sm:$0xff]  ;;  %v4412_v49 = vpack.c.bf16 %v1705_v38, %v1701_v16  ;;  %v4436_v16 = vpack.c.bf16 %v1909_v14, %v1905_v62 }
 0x1c2   :  { %3065 = vmatpush1.bf16.msra.mxu0 %v4181_v55  ;;  %3097 = vmatpush1.bf16.msra.mxu1 %v4185_v42  ;;  %v4414_v18 = vpack.c.bf16 %v1702_v40, %v1698_v33 }
 0x1c3   :  { %3067 = vmatprep.subr.bf16.mxu0 %v4187_v43  ;;  %3099 = vmatprep.subr.bf16.mxu1 %v4190_v27  ;;  %v1655_v43 = vld [vmem:[#allocation4 + $0x28] sm:$0xff]  ;;  %v1653_v27 = vld [vmem:[#allocation4 + $0x18] sm:$0xff]  ;;  %4846 = vst [vmem:[#allocation43_spill] sm:$0xff] %v4436_v16 }
 0x1c6   :  { %3069 = vmatpush1.bf16.msra.mxu0 %v4193_v28  ;;  %3101 = vmatpush1.bf16.msra.mxu1 %v4197_v36  ;;  %v1651_v28 = vld [vmem:[#allocation4 + $0x8] sm:$0xff] }
 0x1c7   :  { %3071 = vmatprep.subr.bf16.mxu0 %v4199_v53  ;;  %3103 = vmatprep.subr.bf16.mxu1 %v4202_v63  ;;  %v4338_v36 = vpack.c.bf16 %v1655_v43, %v1651_v28  ;;  %v1657_v53 = vld [vmem:[#allocation4 + $0x38] sm:$0xff]  ;;  %v1650_v63 = vld [vmem:[#allocation4] sm:$0xff] }
 0x1c8   :  { %v1689_v43 = vld [vmem:[#allocation4 + $0x138] sm:$0xff] }
 0x1ca   :  { %v3473_v3 = vpop.eup %3472  ;;  %3073 = vmatpush1.bf16.msra.mxu0 %v4205_v5  ;;  %3105 = vmatpush1.bf16.msra.mxu1 %v4209_v54  ;;  %v1654_v5 = vld [vmem:[#allocation4 + $0x20] sm:$0xff]  ;;  %v4340_v54 = vpack.c.bf16 %v1657_v53, %v1653_v27 }
 0x1cb   :  { %v1127_v55 = vmul.f32 %v3473_v3, %v3471_v37  ;;  %v4342_v25 = vpack.c.bf16 %v1654_v5, %v1650_v63  ;;  %3107 = vmatprep.subr.bf16.mxu0 %v4338_v36  ;;  %v1683_v37 = vld [vmem:[#allocation4 + $0x108] sm:$0xff]  ;;  %v1682_v27 = vld [vmem:[#allocation4 + $0x100] sm:$0xff] }
 0x1cc   :  { %3139 = vmatprep.subr.bf16.mxu1 %v4340_v54  ;;  %v1687_v3 = vld [vmem:[#allocation4 + $0x128] sm:$0xff]  ;;  %v1686_v53 = vld [vmem:[#allocation4 + $0x120] sm:$0xff] }
 0x1cd   :  { %v4331_v42 = vsel %vm1134_vm6, %v1127_v55, 0.0  ;;  %2816 = vmatmul.mubr.msk.f32.vlgmr.msra.gmra.mrb[12].mxu0 %vm1134_vm6, %v1127_v55  ;;  %2817 = vmatmul.mubr.msk.f32.vlgmr.msra.gmra.mrb[12].mxu1 %vm1134_vm6, %v1127_v55  ;;  %v1685_v55 = vld [vmem:[#allocation4 + $0x118] sm:$0xff]  ;;  %v4386_v28 = vpack.c.bf16 %v1687_v3, %v1683_v37  ;;  %v4390_v5 = vpack.c.bf16 %v1686_v53, %v1682_v27  ;;  %v4417_v37 = vpack.c.bf16 %v1704_v58, %v1700_v51  ;;  %v1707_v3 = vld [vmem:[#allocation4 + $0x1c8] sm:$0xff] }
 0x1ce   :  { %1139 = vst [vmem:[#allocation19 + $0x18] sm:$0xff] %v4331_v42  ;;  %1778 = vmatprep.mubr.f32.mxu0 %v4824_v20  ;;  %1849 = vmatprep.mubr.f32.mxu1 %v4824_v20  ;;  %v4388_v63 = vpack.c.bf16 %v1689_v43, %v1685_v55  ;;  %v1711_v55 = vld [vmem:[#allocation4 + $0x1e8] sm:$0xff]  ;;  %v1709_v43 = vld [vmem:[#allocation4 + $0x1d8] sm:$0xff] }
 0x1cf   :  { %3109 = vmatpush1.bf16.msra.mxu0 %v4342_v25  ;;  %3141 = vmatpush1.bf16.msra.mxu1 %v4345_v44  ;;  %v4422_v27 = vpack.c.bf16 %v1711_v55, %v1707_v3  ;;  %v1713_v53 = vld [vmem:[#allocation4 + $0x1f8] sm:$0xff] }
 0x1d0   :  { %3111 = vmatprep.subr.bf16.mxu0 %v4350_v7  ;;  %3143 = vmatprep.subr.bf16.mxu1 %v4352_v34  ;;  %v4424_v56 = vpack.c.bf16 %v1713_v53, %v1709_v43 }
 0x1d3   :  { %3113 = vmatpush1.bf16.msra.mxu0 %v4354_v35  ;;  %3145 = vmatpush1.bf16.msra.mxu1 %v4357_v48 }
 0x1d4   :  { %3115 = vmatprep.subr.bf16.mxu0 %v4361_v6  ;;  %3147 = vmatprep.subr.bf16.mxu1 %v4363_v11 }
 0x1d7   :  { %3117 = vmatpush1.bf16.msra.mxu0 %v4366_v15  ;;  %3149 = vmatpush1.bf16.msra.mxu1 %v4370_v30 }
 0x1d8   :  { %3119 = vmatprep.subr.bf16.mxu0 %v4372_v31  ;;  %3151 = vmatprep.subr.bf16.mxu1 %v4374_v50 }
 0x1db   :  { %3121 = vmatpush1.bf16.msra.mxu0 %v4377_v10  ;;  %3153 = vmatpush1.bf16.msra.mxu1 %v4381_v17 }
 0x1dc   :  { %3123 = vmatprep.subr.bf16.mxu0 %v4386_v28  ;;  %3155 = vmatprep.subr.bf16.mxu1 %v4388_v63 }
 0x1df   :  { %3125 = vmatpush1.bf16.msra.mxu0 %v4390_v5  ;;  %3157 = vmatpush1.bf16.msra.mxu1 %v4393_v2 }
 0x1e0   :  { %3127 = vmatprep.subr.bf16.mxu0 %v4398_v19  ;;  %3159 = vmatprep.subr.bf16.mxu1 %v4400_v32 }
 0x1e3   :  { %3129 = vmatpush1.bf16.msra.mxu0 %v4402_v52  ;;  %3161 = vmatpush1.bf16.msra.mxu1 %v4405_v12 }
 0x1e4   :  { %3131 = vmatprep.subr.bf16.mxu0 %v4410_v23  ;;  %3163 = vmatprep.subr.bf16.mxu1 %v4412_v49 }
 0x1e7   :  { %3133 = vmatpush1.bf16.msra.mxu0 %v4414_v18  ;;  %3165 = vmatpush1.bf16.msra.mxu1 %v4417_v37 }
 0x1e8   :  { %3135 = vmatprep.subr.bf16.mxu0 %v4422_v27  ;;  %3167 = vmatprep.subr.bf16.mxu1 %v4424_v56 }
 0x1eb   :  { %3137 = vmatpush1.bf16.msra.mxu0 %v4426_v57  ;;  %3169 = vmatpush1.bf16.msra.mxu1 %v4429_v39 }
 0x1ec   :  { %3171 = vmatprep.subr.bf16.mxu0 %v4434_v24  ;;  %3203 = vmatprep.subr.bf16.mxu1 %v4436_v16 }
 0x280   :  { %v1276_v38 = vpop.f32.mrb[2].mxu0  ;;  %v1347_v33 = vpop.f32.mrb[2].mxu1 }
 0x281   :  { %v3364_v40 = vadd.f32 %v1276_v38, %v4259_v21  ;;  %v1278_v51 = vpop.f32.mrb[3].mxu0  ;;  %v1349_v58 = vpop.f32.mrb[3].mxu1  ;;  %v3372_v1 = vadd.f32 %v1347_v33, %v4268_v4  ;;  %v1913_v4 = vld [vmem:[#allocation5 + $0x58] sm:$0xff]  ;;  %v1919_v21 = vld [vmem:[#allocation5 + $0x88] sm:$0xff] }
 0x282   :  { %v3365_v3 = vadd.f32 %v1278_v51, %v4261_v22  ;;  %v3373_v53 = vadd.f32 %v1349_v58, %v4265_v60  ;;  %v1917_v60 = vld [vmem:[#allocation5 + $0x78] sm:$0xff] }
 0x283   :  { %v2786_v55 = vmul.f32 -1.442695, %v3364_v40  ;;  %v1385_v40 = vpop.permute.xlu1 %1384 }
 0x284   :  { %v2787_v43 = vmul.f32 -1.442695, %v3365_v3  ;;  %v2788_v0 = vmul.f32 -1.442695, %v3373_v53  ;;  %vm1386_vm7 = vcmp.eq.s32.totalorder %v1385_v40, 1  ;;  %v1922_v40 = vld [vmem:[#allocation5 + $0xa0] sm:$0xff] }
 0x285   :  { %3474 = vpow2.f32 %v2786_v55 }
 0x286   :  { %3476 = vpow2.f32 %v2787_v43 }
 0x287   :  { %3478 = vpow2.f32 %v2788_v0 }
 0x288   :  { %3480 = vtanh.f32 %v3372_v1 }
 0x28f   :  { %v3475_v9 = vpop.eup %3474 }
 0x290   :  { %v3477_v26 = vpop.eup %3476  ;;  %v1359_v45 = vadd.f32 1.0, %v3475_v9 }
 0x291   :  { %v1365_v61 = vadd.f32 1.0, %v3477_v26  ;;  %v3479_v62 = vpop.eup %3478 }
 0x292   :  { %3482 = vrcp.f32 %v1359_v45  ;;  %v3481_v14 = vpop.eup %3480  ;;  %v1372_v3 = vadd.f32 1.0, %v3479_v62 }
 0x293   :  { %3484 = vrcp.f32 %v1365_v61 }
 0x294   :  { %3486 = vrcp.f32 %v1372_v3  ;;  %v1904_v3 = vld [vmem:[#allocation5 + $0x10] sm:$0xff] }
 0x29c   :  { %v3483_v38 = vpop.eup %3482 }
 0x29d   :  { %v3485_v51 = vpop.eup %3484  ;;  %v1376_v55 = vmul.f32 %v3483_v38, %v3481_v14  ;;  %v1902_v38 = vld [vmem:[#allocation5] sm:$0xff] }
 0x29e   :  { %v1375_v58 = vmul.f32 %v3485_v51, %v4280_v29  ;;  %v1906_v51 = vld [vmem:[#allocation5 + $0x20] sm:$0xff] }
 0x2a0   :  { %v1377_v43 = vadd.f32 %v1376_v55, %v1375_v58  ;;  %v1528_v33 = vpop.f32.mrb[12].mxu0  ;;  %v1599_v53 = vpop.f32.mrb[12].mxu1  ;;  %v1908_v55 = vld [vmem:[#allocation5 + $0x30] sm:$0xff]  ;;  %v1911_v58 = vld [vmem:[#allocation5 + $0x48] sm:$0xff] }
 0x2a1   :  { %v3382_v0 = vadd.f32 %v1528_v33, %v4274_v41  ;;  %v1530_v1 = vpop.f32.mrb[13].mxu0  ;;  %v1601_v9 = vpop.f32.mrb[13].mxu1  ;;  %v1915_v41 = vld [vmem:[#allocation5 + $0x68] sm:$0xff] }
 0x2a2   :  { %3488 = vtanh.f32 %v1377_v43  ;;  %v4448_v26 = vsel %vm1386_vm7, %v1377_v43, %v4280_v29  ;;  %v3383_v45 = vadd.f32 %v1530_v1, %v4276_v46  ;;  %v3391_v14 = vadd.f32 %v1601_v9, %v4283_v8  ;;  %v3487_v33 = vpop.eup %3486  ;;  %v1914_v9 = vld [vmem:[#allocation5 + $0x60] sm:$0xff]  ;;  %v1912_v46 = vld [vmem:[#allocation5 + $0x50] sm:$0xff] }
 0x2a3   :  { %4847 = vst [vmem:[#allocation44_spill] sm:$0xff] %v4448_v26  ;;  %v2790_v61 = vmul.f32 -1.442695, %v3382_v0  ;;  %v3390_v1 = vadd.f32 %v1599_v53, %v4286_v13  ;;  %v4453_v0 = vpack.c.bf16 %v1906_v51, %v1902_v38  ;;  %v4459_v8 = vpack.c.bf16 %v1917_v60, %v1913_v4  ;;  %v1916_v26 = vld [vmem:[#allocation5 + $0x70] sm:$0xff]  ;;  %v1923_v53 = vld [vmem:[#allocation5 + $0xa8] sm:$0xff]  ;;  %v1921_v38 = vld [vmem:[#allocation5 + $0x98] sm:$0xff] }
 0x2a4   :  { %v2791_v62 = vmul.f32 -1.442695, %v3383_v45  ;;  %v2792_v29 = vmul.f32 -1.442695, %v3391_v14  ;;  %v4455_v45 = vpack.c.bf16 %v1908_v55, %v1904_v3  ;;  %v1925_v51 = vld [vmem:[#allocation5 + $0xb8] sm:$0xff] }
 0x2a5   :  { %3490 = vpow2.f32 %v2790_v61  ;;  %v1910_v61 = vld [vmem:[#allocation5 + $0x40] sm:$0xff]  ;;  %4849 = vst [vmem:[#allocation46_spill] sm:$0xff] %v4459_v8 }
 0x2a6   :  { %3492 = vpow2.f32 %v2791_v62  ;;  %v4457_v62 = vpack.c.bf16 %v1915_v41, %v1911_v58  ;;  %v4470_v4 = vpack.c.bf16 %v1914_v9, %v1910_v61  ;;  %v4472_v41 = vpack.c.bf16 %v1916_v26, %v1912_v46  ;;  %v1929_v61 = vld [vmem:[#allocation5 + $0xd8] sm:$0xff]  ;;  %v1926_v26 = vld [vmem:[#allocation5 + $0xc0] sm:$0xff] }
 0x2a7   :  { %3494 = vpow2.f32 %v2792_v29  ;;  %v4478_v58 = vpack.c.bf16 %v1925_v51, %v1921_v38  ;;  %v1924_v29 = vld [vmem:[#allocation5 + $0xb0] sm:$0xff]  ;;  %v1933_v9 = vld [vmem:[#allocation5 + $0xf8] sm:$0xff] }
 0x2a8   :  { %4848 = vst [vmem:[#allocation45_spill] sm:$0xff] %v4457_v62  ;;  %3496 = vtanh.f32 %v3390_v1  ;;  %4850 = vst [vmem:[#allocation47_spill] sm:$0xff] %v4470_v4  ;;  %v1931_v1 = vld [vmem:[#allocation5 + $0xe8] sm:$0xff]  ;;  %v4492_v38 = vpack.c.bf16 %v1933_v9, %v1929_v61  ;;  %v1928_v51 = vld [vmem:[#allocation5 + $0xd0] sm:$0xff] }
 0x2a9   :  { %4851 = vst [vmem:[#allocation48_spill] sm:$0xff] %v4472_v41  ;;  %4853 = vst [vmem:[#allocation50_spill] sm:$0xff] %v4478_v58  ;;  %v1936_v9 = vld [vmem:[#allocation5 + $0x110] sm:$0xff] }
 0x2aa   :  { %4857 = vst [vmem:[#allocation54_spill] sm:$0xff] %v4492_v38 }
 0x2ac   :  { %v3489_v22 = vpop.eup %3488 }
 0x2ad   :  { %v1379_v43 = vmul.f32 %v3489_v22, %v3487_v33  ;;  %v1920_v33 = vld [vmem:[#allocation5 + $0x90] sm:$0xff] }
 0x2af   :  { %v3491_v16 = vpop.eup %3490  ;;  %v4463_v14 = vsel %vm1386_vm7, %v1379_v43, %v4290_v47  ;;  %v1389_v22 = vsel %vm1386_vm7, %v1379_v43, 0.0  ;;  %v1918_v47 = vld [vmem:[#allocation5 + $0x80] sm:$0xff]  ;;  %v1927_v43 = vld [vmem:[#allocation5 + $0xc8] sm:$0xff] }
 0x2b0   :  { %v3493_v3 = vpop.eup %3492  ;;  %1391 = vst [vmem:[#allocation18 + $0x8] sm:$0xff] %v1389_v22  ;;  %v1611_v55 = vadd.f32 1.0, %v3491_v16  ;;  %1779 = vmatmul.mubr.f32.vlgmr.msra.gmra.mrb[4].mxu0 %v4463_v14  ;;  %1850 = vmatmul.mubr.f32.vlgmr.msra.gmra.mrb[4].mxu1 %v4463_v14  ;;  %v4476_v16 = vpack.c.bf16 %v1923_v53, %v1919_v21  ;;  %v4484_v46 = vpack.c.bf16 %v1922_v40, %v1918_v47  ;;  %v1930_v22 = vld [vmem:[#allocation5 + $0xe0] sm:$0xff] }
 0x2b1   :  { %v1617_v60 = vadd.f32 1.0, %v3493_v3  ;;  %3173 = vmatpush1.bf16.msra.mxu0 %v4453_v0  ;;  %3205 = vmatpush1.bf16.msra.mxu1 %v4455_v45  ;;  %v4486_v21 = vpack.c.bf16 %v1924_v29, %v1920_v33  ;;  %v4490_v53 = vpack.c.bf16 %v1931_v1, %v1927_v43  ;;  %v1932_v3 = vld [vmem:[#allocation5 + $0xf0] sm:$0xff]  ;;  %v4496_v47 = vpack.c.bf16 %v1930_v22, %v1926_v26  ;;  %v1934_v33 = vld [vmem:[#allocation5 + $0x100] sm:$0xff]  ;;  %v3495_v43 = vpop.eup %3494  ;;  %v1945_v26 = vld [vmem:[#allocation5 + $0x158] sm:$0xff] }
 0x2b2   :  { %3498 = vrcp.f32 %v1611_v55  ;;  %3175 = vmatprep.subr.bf16.mxu0 %v4457_v62  ;;  %3207 = vmatprep.subr.bf16.mxu1 %v4459_v8  ;;  %4852 = vst [vmem:[#allocation49_spill] sm:$0xff] %v4476_v16  ;;  %4854 = vst [vmem:[#allocation51_spill] sm:$0xff] %v4484_v46  ;;  %v1935_v55 = vld [vmem:[#allocation5 + $0x108] sm:$0xff]  ;;  %v4498_v40 = vpack.c.bf16 %v1932_v3, %v1928_v51  ;;  %v1938_v29 = vld [vmem:[#allocation5 + $0x120] sm:$0xff]  ;;  %v1624_v8 = vadd.f32 1.0, %v3495_v43 }
 0x2b3   :  { %3500 = vrcp.f32 %v1617_v60  ;;  %2030 = vmatprep.mubr.f32.mxu0 %v4824_v20  ;;  %2101 = vmatprep.mubr.f32.mxu1 %v4824_v20  ;;  %4855 = vst [vmem:[#allocation52_spill] sm:$0xff] %v4486_v21  ;;  %4856 = vst [vmem:[#allocation53_spill] sm:$0xff] %v4490_v53  ;;  %v1939_v60 = vld [vmem:[#allocation5 + $0x128] sm:$0xff]  ;;  %v1949_v22 = vld [vmem:[#allocation5 + $0x178] sm:$0xff] }
 0x2b4   :  { %4858 = vst [vmem:[#allocation55_spill] sm:$0xff] %v4496_v47  ;;  %4859 = vst [vmem:[#allocation63_spill] sm:$0xff] %v4498_v40  ;;  %v4502_v1 = vpack.c.bf16 %v1939_v60, %v1935_v55  ;;  %v4517_v43 = vpack.c.bf16 %v1949_v22, %v1945_v26  ;;  %3502 = vrcp.f32 %v1624_v8  ;;  %v1954_v26 = vld [vmem:[#allocation5 + $0x1a0] sm:$0xff] }
 0x2b5   :  { %3177 = vmatpush1.bf16.msra.mxu0 %v4470_v4  ;;  %3209 = vmatpush1.bf16.msra.mxu1 %v4472_v41  ;;  %v1937_v4 = vld [vmem:[#allocation5 + $0x118] sm:$0xff] }
 0x2b6   :  { %3179 = vmatprep.subr.bf16.mxu0 %v4476_v16  ;;  %3211 = vmatprep.subr.bf16.mxu1 %v4478_v58  ;;  %v1941_v41 = vld [vmem:[#allocation5 + $0x138] sm:$0xff]  ;;  %v1940_v58 = vld [vmem:[#allocation5 + $0x130] sm:$0xff]  ;;  %v3497_v16 = vpop.eup %3496  ;;  %4862 = vst [vmem:[#allocation66_spill] sm:$0xff] %v4517_v43 }
 0x2b7   :  { %v4504_v61 = vpack.c.bf16 %v1941_v41, %v1937_v4  ;;  %v4510_v55 = vpack.c.bf16 %v1940_v58, %v1936_v9  ;;  %v1942_v4 = vld [vmem:[#allocation5 + $0x140] sm:$0xff]  ;;  %v1637_v58 = vpop.permute.xlu1 %1636 }
 0x2b8   :  { %v1946_v41 = vld [vmem:[#allocation5 + $0x160] sm:$0xff]  ;;  %vm1638_vm8 = vcmp.eq.s32.totalorder %v1637_v58, 1 }
 0x2b9   :  { %3181 = vmatpush1.bf16.msra.mxu0 %v4484_v46  ;;  %3213 = vmatpush1.bf16.msra.mxu1 %v4486_v21  ;;  %v1943_v46 = vld [vmem:[#allocation5 + $0x148] sm:$0xff]  ;;  %4860 = vst [vmem:[#allocation64_spill] sm:$0xff] %v4510_v55 }
 0x2ba   :  { %3183 = vmatprep.subr.bf16.mxu0 %v4490_v53  ;;  %3215 = vmatprep.subr.bf16.mxu1 %v4492_v38  ;;  %v1947_v21 = vld [vmem:[#allocation5 + $0x168] sm:$0xff]  ;;  %v4508_v38 = vpack.c.bf16 %v1938_v29, %v1934_v33  ;;  %v1953_v33 = vld [vmem:[#allocation5 + $0x198] sm:$0xff] }
 0x2bb   :  { %v4515_v53 = vpack.c.bf16 %v1947_v21, %v1943_v46  ;;  %v1957_v29 = vld [vmem:[#allocation5 + $0x1b8] sm:$0xff]  ;;  %v1950_v21 = vld [vmem:[#allocation5 + $0x180] sm:$0xff] }
 0x2bc   :  { %v3499_v51 = vpop.eup %3498 }
 0x2bd   :  { %v3501_v3 = vpop.eup %3500  ;;  %v1628_v62 = vmul.f32 %v3499_v51, %v3497_v16  ;;  %3185 = vmatpush1.bf16.msra.mxu0 %v4496_v47  ;;  %3217 = vmatpush1.bf16.msra.mxu1 %v4498_v40  ;;  %4861 = vst [vmem:[#allocation65_spill] sm:$0xff] %v4515_v53  ;;  %v1944_v16 = vld [vmem:[#allocation5 + $0x150] sm:$0xff]  ;;  %v1951_v47 = vld [vmem:[#allocation5 + $0x188] sm:$0xff] }
 0x2be   :  { %v1627_v60 = vmul.f32 %v3501_v3, %v4318_v59  ;;  %3187 = vmatprep.subr.bf16.mxu0 %v4502_v1  ;;  %3219 = vmatprep.subr.bf16.mxu1 %v4504_v61  ;;  %v1948_v51 = vld [vmem:[#allocation5 + $0x170] sm:$0xff]  ;;  %v1955_v40 = vld [vmem:[#allocation5 + $0x1a8] sm:$0xff]  ;;  %v4521_v3 = vpack.c.bf16 %v1946_v41, %v1942_v4 }
 0x2bf   :  { %v4523_v46 = vpack.c.bf16 %v1948_v51, %v1944_v16  ;;  %v4531_v8 = vpack.c.bf16 %v1955_v40, %v1951_v47  ;;  %v1956_v4 = vld [vmem:[#allocation5 + $0x1b0] sm:$0xff]  ;;  %v1959_v41 = vld [vmem:[#allocation5 + $0x1c8] sm:$0xff]  ;;  %v1961_v51 = vld [vmem:[#allocation5 + $0x1d8] sm:$0xff] }
 0x2c0   :  { %v1629_v9 = vadd.f32 %v1628_v62, %v1627_v60  ;;  %v4533_v62 = vpack.c.bf16 %v1957_v29, %v1953_v33  ;;  %v1952_v60 = vld [vmem:[#allocation5 + $0x190] sm:$0xff]  ;;  %v1963_v16 = vld [vmem:[#allocation5 + $0x1e8] sm:$0xff]  ;;  %v1962_v33 = vld [vmem:[#allocation5 + $0x1e0] sm:$0xff] }
 0x2c1   :  { %3189 = vmatpush1.bf16.msra.mxu0 %v4508_v38  ;;  %3221 = vmatpush1.bf16.msra.mxu1 %v4510_v55  ;;  %v1965_v55 = vld [vmem:[#allocation5 + $0x1f8] sm:$0xff]  ;;  %v4543_v47 = vpack.c.bf16 %v1963_v16, %v1959_v41  ;;  %v1960_v29 = vld [vmem:[#allocation5 + $0x1d0] sm:$0xff] }
 0x2c2   :  { %3504 = vtanh.f32 %v1629_v9  ;;  %v4527_v22 = vsel %vm1638_vm8, %v1629_v9, %v4318_v59  ;;  %3191 = vmatprep.subr.bf16.mxu0 %v4515_v53  ;;  %3223 = vmatprep.subr.bf16.mxu1 %v4517_v43  ;;  %v4537_v59 = vpack.c.bf16 %v1954_v26, %v1950_v21  ;;  %v4539_v9 = vpack.c.bf16 %v1956_v4, %v1952_v60  ;;  %v1958_v53 = vld [vmem:[#allocation5 + $0x1c0] sm:$0xff]  ;;  %v1964_v43 = vld [vmem:[#allocation5 + $0x1f0] sm:$0xff]  ;;  %v3503_v60 = vpop.eup %3502 }
 0x2c3   :  { %v4545_v40 = vpack.c.bf16 %v1965_v55, %v1961_v51  ;;  %v4549_v21 = vpack.c.bf16 %v1962_v33, %v1958_v53  ;;  %v4551_v26 = vpack.c.bf16 %v1964_v43, %v1960_v29  ;;  %v4870_v16 = vld [vmem:[#allocation61_spill] sm:$0xff] }
 0x2c5   :  { %3193 = vmatpush1.bf16.msra.mxu0 %v4521_v3  ;;  %3225 = vmatpush1.bf16.msra.mxu1 %v4523_v46 }
 0x2c6   :  { %3195 = vmatprep.subr.bf16.mxu0 %v4531_v8  ;;  %3227 = vmatprep.subr.bf16.mxu1 %v4533_v62 }
 0x2c9   :  { %3197 = vmatpush1.bf16.msra.mxu0 %v4537_v59  ;;  %3229 = vmatpush1.bf16.msra.mxu1 %v4539_v9 }
 0x2ca   :  { %3199 = vmatprep.subr.bf16.mxu0 %v4543_v47  ;;  %3231 = vmatprep.subr.bf16.mxu1 %v4545_v40 }
 0x2cc   :  { %v3505_v4 = vpop.eup %3504 }
 0x2cd   :  { %v1631_v41 = vmul.f32 %v3505_v4, %v3503_v60  ;;  %3201 = vmatpush1.bf16.msra.mxu0 %v4549_v21  ;;  %3233 = vmatpush1.bf16.msra.mxu1 %v4551_v26  ;;  %v4871_v4 = vld [vmem:[#allocation62_spill] sm:$0xff] }
 0x2ce   :  { %3235 = vmatprep.subr.bf16.mxu0 %v4338_v36  ;;  %3267 = vmatprep.subr.bf16.mxu1 %v4340_v54 }
 0x2cf   :  { %v4561_v53 = vsel %vm1638_vm8, %v1631_v41, %v4331_v42  ;;  %v1641_v55 = vsel %vm1638_vm8, %v1631_v41, 0.0  ;;  %v4863_v42 = vld [vmem:[#allocation43_spill] sm:$0xff] }
 0x2d0   :  { %1643 = vst [vmem:[#allocation19 + $0x10] sm:$0xff] %v1641_v55  ;;  %2031 = vmatmul.mubr.f32.vlgmr.msra.gmra.mrb[10].mxu0 %v4561_v53  ;;  %2102 = vmatmul.mubr.f32.vlgmr.msra.gmra.mrb[10].mxu1 %v4561_v53 }
 0x2d1   :  { %3237 = vmatpush1.bf16.msra.mxu0 %v4342_v25  ;;  %3269 = vmatpush1.bf16.msra.mxu1 %v4345_v44  ;;  %v4864_v25 = vld [vmem:[#allocation56_spill] sm:$0xff] }
 0x2d2   :  { %3239 = vmatprep.subr.bf16.mxu0 %v4350_v7  ;;  %3271 = vmatprep.subr.bf16.mxu1 %v4352_v34 }
 0x2d3   :  { %2282 = vmatprep.mubr.f32.mxu0 %v4824_v20  ;;  %2353 = vmatprep.mubr.f32.mxu1 %v4824_v20 }
 0x2d5   :  { %3241 = vmatpush1.bf16.msra.mxu0 %v4354_v35  ;;  %3273 = vmatpush1.bf16.msra.mxu1 %v4357_v48  ;;  %v4865_v35 = vld [vmem:[#allocation57_spill] sm:$0xff] }
 0x2d6   :  { %3243 = vmatprep.subr.bf16.mxu0 %v4361_v6  ;;  %3275 = vmatprep.subr.bf16.mxu1 %v4363_v11 }
 0x2d9   :  { %3245 = vmatpush1.bf16.msra.mxu0 %v4366_v15  ;;  %3277 = vmatpush1.bf16.msra.mxu1 %v4370_v30  ;;  %v4866_v15 = vld [vmem:[#allocation58_spill] sm:$0xff] }
 0x2da   :  { %3247 = vmatprep.subr.bf16.mxu0 %v4372_v31  ;;  %3279 = vmatprep.subr.bf16.mxu1 %v4374_v50  ;;  %v4867_v50 = vld [vmem:[#allocation59_spill] sm:$0xff] }
 0x2dd   :  { %3249 = vmatpush1.bf16.msra.mxu0 %v4377_v10  ;;  %3281 = vmatpush1.bf16.msra.mxu1 %v4381_v17 }
 0x2de   :  { %3251 = vmatprep.subr.bf16.mxu0 %v4386_v28  ;;  %3283 = vmatprep.subr.bf16.mxu1 %v4388_v63 }
 0x2e1   :  { %3253 = vmatpush1.bf16.msra.mxu0 %v4390_v5  ;;  %3285 = vmatpush1.bf16.msra.mxu1 %v4393_v2 }
 0x2e2   :  { %3255 = vmatprep.subr.bf16.mxu0 %v4398_v19  ;;  %3287 = vmatprep.subr.bf16.mxu1 %v4400_v32 }
 0x2e5   :  { %3257 = vmatpush1.bf16.msra.mxu0 %v4402_v52  ;;  %3289 = vmatpush1.bf16.msra.mxu1 %v4405_v12 }
 0x2e6   :  { %3259 = vmatprep.subr.bf16.mxu0 %v4410_v23  ;;  %3291 = vmatprep.subr.bf16.mxu1 %v4412_v49  ;;  %v4868_v49 = vld [vmem:[#allocation44_spill] sm:$0xff] }
 0x2e9   :  { %3261 = vmatpush1.bf16.msra.mxu0 %v4414_v18  ;;  %3293 = vmatpush1.bf16.msra.mxu1 %v4417_v37  ;;  %v1889_v37 = vpop.permute.xlu0 %1888 }
 0x2ea   :  { %3263 = vmatprep.subr.bf16.mxu0 %v4422_v27  ;;  %3295 = vmatprep.subr.bf16.mxu1 %v4424_v56  ;;  %vm1890_vm9 = vcmp.eq.s32.totalorder %v1889_v37, 1 }
 0x2ed   :  { %3265 = vmatpush1.bf16.msra.mxu0 %v4426_v57  ;;  %3297 = vmatpush1.bf16.msra.mxu1 %v4429_v39  ;;  %v4869_v39 = vld [vmem:[#allocation60_spill] sm:$0xff] }
 0x2ee   :  { %3299 = vmatprep.subr.bf16.mxu0 %v4434_v24  ;;  %3331 = vmatprep.subr.bf16.mxu1 %v4863_v42 }
 0x383   :  { %v1780_v36 = vpop.f32.mrb[4].mxu0  ;;  %v1851_v54 = vpop.f32.mrb[4].mxu1 }
 0x384   :  { %v3366_v44 = vadd.f32 %v1780_v36, %v4864_v25  ;;  %v1782_v7 = vpop.f32.mrb[5].mxu0  ;;  %v1853_v34 = vpop.f32.mrb[5].mxu1  ;;  %v3374_v10 = vadd.f32 %v1851_v54, %v4867_v50 }
 0x385   :  { %v3367_v48 = vadd.f32 %v1782_v7, %v4865_v35  ;;  %v3375_v30 = vadd.f32 %v1853_v34, %v4866_v15 }
 0x386   :  { %v2794_v6 = vmul.f32 -1.442695, %v3366_v44 }
 0x387   :  { %v2795_v11 = vmul.f32 -1.442695, %v3367_v48  ;;  %v2796_v31 = vmul.f32 -1.442695, %v3375_v30 }
 0x388   :  { %3506 = vpow2.f32 %v2794_v6 }
 0x389   :  { %3508 = vpow2.f32 %v2795_v11 }
 0x38a   :  { %3510 = vpow2.f32 %v2796_v31  ;;  %v4872_v31 = vld [vmem:[#allocation45_spill] sm:$0xff] }
 0x38b   :  { %3512 = vtanh.f32 %v3374_v10  ;;  %v4874_v10 = vld [vmem:[#allocation47_spill] sm:$0xff] }
 0x392   :  { %v3507_v17 = vpop.eup %3506 }
 0x393   :  { %v3509_v28 = vpop.eup %3508  ;;  %v1863_v63 = vadd.f32 1.0, %v3507_v17  ;;  %v4875_v17 = vld [vmem:[#allocation48_spill] sm:$0xff] }
 0x394   :  { %v1869_v5 = vadd.f32 1.0, %v3509_v28  ;;  %v3511_v2 = vpop.eup %3510  ;;  %v4876_v28 = vld [vmem:[#allocation49_spill] sm:$0xff] }
 0x395   :  { %3514 = vrcp.f32 %v1863_v63  ;;  %v3513_v19 = vpop.eup %3512  ;;  %v1876_v23 = vadd.f32 1.0, %v3511_v2  ;;  %v4877_v63 = vld [vmem:[#allocation50_spill] sm:$0xff]  ;;  %v4880_v2 = vld [vmem:[#allocation53_spill] sm:$0xff] }
 0x396   :  { %3516 = vrcp.f32 %v1869_v5 }
 0x397   :  { %3518 = vrcp.f32 %v1876_v23 }
 0x39f   :  { %v3515_v32 = vpop.eup %3514 }
 0x3a0   :  { %v3517_v52 = vpop.eup %3516  ;;  %v1880_v12 = vmul.f32 %v3515_v32, %v3513_v19  ;;  %v4881_v19 = vld [vmem:[#allocation54_spill] sm:$0xff] }
 0x3a1   :  { %v1879_v18 = vmul.f32 %v3517_v52, %v4868_v49  ;;  %v3519_v55 = vpop.eup %3518 }
 0x3a3   :  { %v1881_v27 = vadd.f32 %v1880_v12, %v1879_v18  ;;  %v2032_v56 = vpop.f32.mrb[10].mxu0  ;;  %v2103_v57 = vpop.f32.mrb[10].mxu1  ;;  %v4883_v18 = vld [vmem:[#allocation63_spill] sm:$0xff] }
 0x3a4   :  { %v3380_v24 = vadd.f32 %v2032_v56, %v4869_v39  ;;  %v2034_v43 = vpop.f32.mrb[11].mxu0  ;;  %v2105_v58 = vpop.f32.mrb[11].mxu1  ;;  %v3388_v54 = vadd.f32 %v2103_v57, %v4286_v13  ;;  %v4884_v57 = vld [vmem:[#allocation64_spill] sm:$0xff] }
 0x3a5   :  { %v3381_v51 = vadd.f32 %v2034_v43, %v4870_v16  ;;  %3520 = vtanh.f32 %v1881_v27  ;;  %v4609_v33 = vsel %vm1890_vm9, %v1881_v27, %v4868_v49  ;;  %v3389_v41 = vadd.f32 %v2105_v58, %v4871_v4  ;;  %v4882_v49 = vld [vmem:[#allocation55_spill] sm:$0xff]  ;;  %v2141_v27 = vpop.permute.xlu1 %2140  ;;  %v4886_v43 = vld [vmem:[#allocation66_spill] sm:$0xff] }
 0x3a6   :  { %v2798_v29 = vmul.f32 -1.442695, %v3380_v24  ;;  %vm2142_vm10 = vcmp.eq.s32.totalorder %v2141_v27, 1  ;;  %v4885_v24 = vld [vmem:[#allocation65_spill] sm:$0xff] }
 0x3a7   :  { %v2799_v60 = vmul.f32 -1.442695, %v3381_v51  ;;  %v2800_v36 = vmul.f32 -1.442695, %v3389_v41 }
 0x3a8   :  { %3522 = vpow2.f32 %v2798_v29 }
 0x3a9   :  { %3524 = vpow2.f32 %v2799_v60 }
 0x3aa   :  { %3526 = vpow2.f32 %v2800_v36 }
 0x3ab   :  { %3528 = vtanh.f32 %v3388_v54 }
 0x3af   :  { %v3521_v42 = vpop.eup %3520 }
 0x3b0   :  { %v1883_v44 = vmul.f32 %v3521_v42, %v3519_v55 }
 0x3b2   :  { %v3523_v7 = vpop.eup %3522  ;;  %v4615_v34 = vsel %vm1890_vm9, %v1883_v44, %v4463_v14  ;;  %v1893_v48 = vsel %vm1890_vm9, %v1883_v44, 0.0  ;;  %v4873_v14 = vld [vmem:[#allocation46_spill] sm:$0xff] }
 0x3b3   :  { %v3525_v6 = vpop.eup %3524  ;;  %v2115_v11 = vadd.f32 1.0, %v3523_v7  ;;  %2283 = vmatmul.mubr.f32.vlgmr.msra.gmra.mrb[6].mxu0 %v4615_v34  ;;  %2354 = vmatmul.mubr.f32.vlgmr.msra.gmra.mrb[6].mxu1 %v4615_v34  ;;  %1895 = vst [vmem:[#allocation18 + $0x10] sm:$0xff] %v1893_v48  ;;  %v2393_v7 = vpop.permute.xlu1 %2392 }
 0x3b4   :  { %v2121_v30 = vadd.f32 1.0, %v3525_v6  ;;  %3301 = vmatpush1.bf16.msra.mxu0 %v4453_v0  ;;  %3333 = vmatpush1.bf16.msra.mxu1 %v4455_v45  ;;  %v4878_v0 = vld [vmem:[#allocation51_spill] sm:$0xff]  ;;  %v4879_v45 = vld [vmem:[#allocation52_spill] sm:$0xff]  ;;  %v3527_v5 = vpop.eup %3526  ;;  %vm2394_vm11 = vcmp.eq.s32.totalorder %v2393_v7, 1 }
 0x3b5   :  { %3530 = vrcp.f32 %v2115_v11  ;;  %3303 = vmatprep.subr.bf16.mxu0 %v4872_v31  ;;  %3335 = vmatprep.subr.bf16.mxu1 %v4873_v14  ;;  %v3529_v32 = vpop.eup %3528  ;;  %v2128_v23 = vadd.f32 1.0, %v3527_v5 }
 0x3b6   :  { %3532 = vrcp.f32 %v2121_v30  ;;  %2532 = vmatprep.mubr.f32.mxu0 %v4824_v20  ;;  %2603 = vmatprep.mubr.f32.mxu1 %v4824_v20 }
 0x3b7   :  { %3534 = vrcp.f32 %v2128_v23 }
 0x3b8   :  { %3305 = vmatpush1.bf16.msra.mxu0 %v4874_v10  ;;  %3337 = vmatpush1.bf16.msra.mxu1 %v4875_v17 }
 0x3b9   :  { %3307 = vmatprep.subr.bf16.mxu0 %v4876_v28  ;;  %3339 = vmatprep.subr.bf16.mxu1 %v4877_v63 }
 0x3bc   :  { %3309 = vmatpush1.bf16.msra.mxu0 %v4878_v0  ;;  %3341 = vmatpush1.bf16.msra.mxu1 %v4879_v45 }
 0x3bd   :  { %3311 = vmatprep.subr.bf16.mxu0 %v4880_v2  ;;  %3343 = vmatprep.subr.bf16.mxu1 %v4881_v19 }
 0x3bf   :  { %v3531_v52 = vpop.eup %3530 }
 0x3c0   :  { %v3533_v20 = vpop.eup %3532  ;;  %v2132_v12 = vmul.f32 %v3531_v52, %v3529_v32  ;;  %3313 = vmatpush1.bf16.msra.mxu0 %v4882_v49  ;;  %3345 = vmatpush1.bf16.msra.mxu1 %v4883_v18 }
 0x3c1   :  { %v2131_v37 = vmul.f32 %v3533_v20, %v4527_v22  ;;  %3315 = vmatprep.subr.bf16.mxu0 %v4502_v1  ;;  %3347 = vmatprep.subr.bf16.mxu1 %v4504_v61 }
 0x3c3   :  { %v2133_v56 = vadd.f32 %v2132_v12, %v2131_v37 }
 0x3c4   :  { %3317 = vmatpush1.bf16.msra.mxu0 %v4508_v38  ;;  %3349 = vmatpush1.bf16.msra.mxu1 %v4884_v57  ;;  %v3535_v38 = vpop.eup %3534 }
 0x3c5   :  { %3319 = vmatprep.subr.bf16.mxu0 %v4885_v24  ;;  %3351 = vmatprep.subr.bf16.mxu1 %v4886_v43  ;;  %3536 = vtanh.f32 %v2133_v56  ;;  %v4645_v58 = vsel %vm2142_vm10, %v2133_v56, %v4527_v22 }
 0x3c8   :  { %3321 = vmatpush1.bf16.msra.mxu0 %v4521_v3  ;;  %3353 = vmatpush1.bf16.msra.mxu1 %v4523_v46 }
 0x3c9   :  { %3323 = vmatprep.subr.bf16.mxu0 %v4531_v8  ;;  %3355 = vmatprep.subr.bf16.mxu1 %v4533_v62 }
 0x3cc   :  { %3325 = vmatpush1.bf16.msra.mxu0 %v4537_v59  ;;  %3357 = vmatpush1.bf16.msra.mxu1 %v4539_v9 }
 0x3cd   :  { %3327 = vmatprep.subr.bf16.mxu0 %v4543_v47  ;;  %3359 = vmatprep.subr.bf16.mxu1 %v4545_v40 }
 0x3cf   :  { %v3537_v1 = vpop.eup %3536 }
 0x3d0   :  { %3329 = vmatpush1.bf16.msra.mxu0 %v4549_v21  ;;  %3361 = vmatpush1.bf16.msra.mxu1 %v4551_v26  ;;  %v2135_v61 = vmul.f32 %v3537_v1, %v3535_v38 }
 0x3d2   :  { %v4659_v3 = vsel %vm2142_vm10, %v2135_v61, %v4561_v53  ;;  %v2145_v46 = vsel %vm2142_vm10, %v2135_v61, 0.0 }
 0x3d3   :  { %2533 = vmatmul.mubr.f32.vlgmr.msra.gmra.mrb[8].mxu0 %v4659_v3  ;;  %2604 = vmatmul.mubr.f32.vlgmr.msra.gmra.mrb[8].mxu1 %v4659_v3  ;;  %2147 = vst [vmem:[#allocation19 + $0x8] sm:$0xff] %v2145_v46 }
 0x486   :  { %v2284_v22 = vpop.f32.mrb[6].mxu0  ;;  %v2355_v8 = vpop.f32.mrb[6].mxu1 }
 0x487   :  { %v3368_v62 = vadd.f32 %v2284_v22, %v4864_v25  ;;  %v2286_v59 = vpop.f32.mrb[7].mxu0  ;;  %v2357_v9 = vpop.f32.mrb[7].mxu1  ;;  %v3376_v51 = vadd.f32 %v2355_v8, %v4867_v50 }
 0x488   :  { %v3369_v47 = vadd.f32 %v2286_v59, %v4865_v35  ;;  %v3377_v26 = vadd.f32 %v2357_v9, %v4866_v15 }
 0x489   :  { %v2802_v40 = vmul.f32 -1.442695, %v3368_v62 }
 0x48a   :  { %v2803_v21 = vmul.f32 -1.442695, %v3369_v47  ;;  %v2804_v53 = vmul.f32 -1.442695, %v3377_v26 }
 0x48b   :  { %3538 = vpow2.f32 %v2802_v40 }
 0x48c   :  { %3540 = vpow2.f32 %v2803_v21 }
 0x48d   :  { %3542 = vpow2.f32 %v2804_v53 }
 0x48e   :  { %3544 = vtanh.f32 %v3376_v51 }
 0x495   :  { %v3539_v29 = vpop.eup %3538 }
 0x496   :  { %v3541_v60 = vpop.eup %3540  ;;  %v2367_v41 = vadd.f32 1.0, %v3539_v29 }
 0x497   :  { %v2373_v55 = vadd.f32 1.0, %v3541_v60  ;;  %v3543_v25 = vpop.eup %3542 }
 0x498   :  { %3546 = vrcp.f32 %v2367_v41  ;;  %v3545_v42 = vpop.eup %3544  ;;  %v2380_v44 = vadd.f32 1.0, %v3543_v25 }
 0x499   :  { %3548 = vrcp.f32 %v2373_v55 }
 0x49a   :  { %3550 = vrcp.f32 %v2380_v44 }
 0x4a2   :  { %v3547_v35 = vpop.eup %3546 }
 0x4a3   :  { %v3549_v36 = vpop.eup %3548  ;;  %v2384_v54 = vmul.f32 %v3547_v35, %v3545_v42 }
 0x4a4   :  { %v2383_v15 = vmul.f32 %v3549_v36, %v4609_v33  ;;  %v3551_v0 = vpop.eup %3550 }
 0x4a6   :  { %v2385_v48 = vadd.f32 %v2384_v54, %v2383_v15  ;;  %v2534_v6 = vpop.f32.mrb[8].mxu0  ;;  %v2605_v50 = vpop.f32.mrb[8].mxu1 }
 0x4a7   :  { %v3378_v11 = vadd.f32 %v2534_v6, %v4869_v39  ;;  %v2536_v30 = vpop.f32.mrb[9].mxu0  ;;  %v2607_v31 = vpop.f32.mrb[9].mxu1  ;;  %v3386_v5 = vadd.f32 %v2605_v50, %v4286_v13 }
 0x4a8   :  { %3552 = vtanh.f32 %v2385_v48  ;;  %v3379_v14 = vadd.f32 %v2536_v30, %v4870_v16  ;;  %v2396_v10 = vsel %vm2394_vm11, %v2385_v48, %v4609_v33  ;;  %v3387_v63 = vadd.f32 %v2607_v31, %v4871_v4 }
 0x4a9   :  { %v2806_v17 = vmul.f32 -1.442695, %v3378_v11  ;;  %2659 = vst [vmem:[#allocation22] sm:$0xff] %v2396_v10 }
 0x4aa   :  { %v2807_v28 = vmul.f32 -1.442695, %v3379_v14  ;;  %v2808_v39 = vmul.f32 -1.442695, %v3387_v63 }
 0x4ab   :  { %3554 = vpow2.f32 %v2806_v17 }
 0x4ac   :  { %3556 = vpow2.f32 %v2807_v28 }
 0x4ad   :  { %3558 = vpow2.f32 %v2808_v39 }
 0x4ae   :  { %3560 = vtanh.f32 %v3386_v5 }
 0x4b2   :  { %v3553_v45 = vpop.eup %3552 }
 0x4b3   :  { %v2387_v2 = vmul.f32 %v3553_v45, %v3551_v0 }
 0x4b5   :  { %v3555_v16 = vpop.eup %3554  ;;  %v2397_v19 = vsel %vm2394_vm11, %v2387_v2, 0.0  ;;  %v2395_v33 = vsel %vm2394_vm11, %v2387_v2, %v4615_v34 }
 0x4b6   :  { %v3557_v32 = vpop.eup %3556  ;;  %v2617_v52 = vadd.f32 1.0, %v3555_v16  ;;  %2399 = vst [vmem:[#allocation18 + $0x18] sm:$0xff] %v2397_v19  ;;  %2656 = vst [vmem:[#allocation21] sm:$0xff] %v2395_v33 }
 0x4b7   :  { %v2623_v4 = vadd.f32 1.0, %v3557_v32 }
 0x4b8   :  { %3713 = shalt.err (!%p3710_p10)
}
 0x4b9   :  { %s3714_s1 = scalar_lea.hbm %s4760_s9, 512 }
 0x4ba   :  { %p3715_p11 = scmp.ne.s32.totalorder %s4760_s9, %s3714_s1  ;;  %p3718_p12 = scmp.lt.u32.totalorder %s3714_s1, %s4760_s9 }
 0x4bc   :  { %p3720_p13 = pnand %p3718_p12, %p3715_p11 }
 0x4be   :  { %3723 = shalt.err (!%p3720_p13)
}
 0x4bf   :  { %2673 = dma.vmem_to_hbm [thread:$0]  %s2668_s24, 512, %s4760_s9, [#allocation15], %s3809_s13, %s3809_s13, %s3810_s14   ;;  %3562 = vrcp.f32 %v2617_v52  ;;  %v3559_v13 = vpop.eup %3558  ;;  %v2643_v18 = vpop.permute.xlu0 %2642 }
 0x4c0   :  { %3564 = vrcp.f32 %v2623_v4  ;;  %v3561_v34 = vpop.eup %3560  ;;  %v2630_v49 = vadd.f32 1.0, %v3559_v13  ;;  %s3819_s17 = smov [#allocation22]   ;;  %vm2644_vm12 = vcmp.eq.s32.totalorder %v2643_v18, 1 }
 0x4c1   :  { %s2707_s3 = sshll.u32 %s3819_s17, 4  ;;  %s2708_s3 = int_to_ptr.vmem [resolvable:$true] %s2707_s3 }
 0x4c2   :  { %3566 = vrcp.f32 %v2630_v49  ;;  %s3724_s9 = scalar_lea.vmem %s2708_s3, 256  ;;  %p3729_p1 = scmp.lt.s32.totalorder %s2708_s3, %s2708_s3 }
 0x4c3   :  { %p3725_p0 = scmp.ne.s32.totalorder %s2708_s3, %s3724_s9  ;;  %p3730_p2 = scmp.lt.s32.totalorder %s3724_s9, %s3724_s9 }
 0x4c5   :  { %p3731_p3 = por %p3730_p2, %p3729_p1 }
 0x4c7   :  { %p3732_p4 = pnand %p3731_p3, %p3725_p0 }
 0x4c9   :  { %v3563_v20 = vpop.eup %3562 }
 0x4ca   :  { %v3565_v12 = vpop.eup %3564  ;;  %v2634_v23 = vmul.f32 %v3563_v20, %v3561_v34 }
 0x4cb   :  { %v2633_v37 = vmul.f32 %v3565_v12, %v4645_v58 }
 0x4cd   :  { %v2635_v27 = vadd.f32 %v2634_v23, %v2633_v37 }
 0x4cf   :  { %3568 = vtanh.f32 %v2635_v27  ;;  %v2646_v56 = vsel %vm2644_vm12, %v2635_v27, %v4645_v58 }
 0x4d0   :  { %2661 = vst [vmem:[#allocation22 + $0x8] sm:$0xff] %v2646_v56 }
 0x4d1   :  { %3735 = shalt.err (!%p3732_p4)
}
 0x4d2   :  { %s3736_s21 = scalar_lea.hbm %s4763_s12, 256 }
 0x4d3   :  { %p3737_p5 = scmp.ne.s32.totalorder %s4763_s12, %s3736_s21  ;;  %p3740_p6 = scmp.lt.u32.totalorder %s3736_s21, %s4763_s12 }
 0x4d5   :  { %p3742_p7 = pnand %p3740_p6, %p3737_p5 }
 0x4d7   :  { %3745 = shalt.err (!%p3742_p7)
}
 0x4d8   :  { %2713 = dma.vmem_to_hbm [thread:$0]  %s2708_s3, 256, %s4763_s12, [#allocation23], %s3809_s13, %s3809_s13, %s3810_s14   ;;  %v3567_v57 = vpop.eup %3566 }
 0x4d9   :  { %s3820_s7 = smov [#allocation19]   ;;  %v3569_v24 = vpop.eup %3568  ;;  %s3821_s8 = smov [#allocation21]  }
 0x4da   :  { %s2683_s18 = sshll.u32 %s3820_s7, 4  ;;  %s2695_s24 = sshll.u32 %s3821_s8, 4  ;;  %v2637_v43 = vmul.f32 %v3569_v24, %v3567_v57  ;;  %s2684_s18 = int_to_ptr.vmem [resolvable:$true] %s2683_s18  ;;  %s4714_s24 = int_to_ptr.vmem [resolvable:$true] %s2695_s24 }
 0x4db   :  { %s3746_s25 = scalar_lea.vmem %s2684_s18, 512  ;;  %p3751_p9 = scmp.lt.s32.totalorder %s2684_s18, %s2684_s18 }
 0x4dc   :  { %v2647_v58 = vsel %vm2644_vm12, %v2637_v43, 0.0  ;;  %v2645_v38 = vsel %vm2644_vm12, %v2637_v43, %v4659_v3  ;;  %p3747_p8 = scmp.ne.s32.totalorder %s2684_s18, %s3746_s25  ;;  %p3752_p10 = scmp.lt.s32.totalorder %s3746_s25, %s3746_s25 }
 0x4dd   :  { %2648 = vst [vmem:[#allocation19] sm:$0xff] %v2647_v58  ;;  %2658 = vst [vmem:[#allocation21 + $0x8] sm:$0xff] %v2645_v38 }
 0x4de   :  { %p3753_p11 = por %p3752_p10, %p3751_p9 }
 0x4e0   :  { %p3754_p12 = pnand %p3753_p11, %p3747_p8 }
 0x4e2   :  { %3757 = shalt.err (!%p3754_p12)
}
 0x4e3   :  { %s3758_s27 = scalar_lea.hbm %s4761_s10, 512 }
 0x4e4   :  { %p3759_p13 = scmp.ne.s32.totalorder %s4761_s10, %s3758_s27  ;;  %p3762_p0 = scmp.lt.u32.totalorder %s3758_s27, %s4761_s10 }
 0x4e6   :  { %p3764_p1 = pnand %p3762_p0, %p3759_p13 }
 0x4e8   :  { %3767 = shalt.err (!%p3764_p1)
}
 0x4e9   :  { %2689 = dma.vmem_to_hbm [thread:$0]  %s2684_s18, 512, %s4761_s10, [#allocation20], %s3809_s13, %s3809_s13, %s3810_s14  }
 0x4ea   :  { %s3768_s16 = scalar_lea.vmem %s4714_s24, 256  ;;  %p3773_p3 = scmp.lt.s32.totalorder %s4714_s24, %s4714_s24 }
 0x4eb   :  { %p3769_p2 = scmp.ne.s32.totalorder %s4714_s24, %s3768_s16  ;;  %p3774_p4 = scmp.lt.s32.totalorder %s3768_s16, %s3768_s16 }
 0x4ed   :  { %p3775_p5 = por %p3774_p4, %p3773_p3 }
 0x4ef   :  { %p3776_p6 = pnand %p3775_p5, %p3769_p2 }
 0x4f1   :  { %3779 = shalt.err (!%p3776_p6)
}
 0x4f2   :  { %s3780_s9 = scalar_lea.hbm %s4762_s11, 256 }
 0x4f3   :  { %p3781_p7 = scmp.ne.s32.totalorder %s4762_s11, %s3780_s9  ;;  %p3784_p8 = scmp.lt.u32.totalorder %s3780_s9, %s4762_s11 }
 0x4f5   :  { %p3786_p9 = pnand %p3784_p8, %p3781_p7 }
 0x4f7   :  { %3789 = shalt.err (!%p3786_p9)
}
 0x4f8   :  { %2701 = dma.vmem_to_hbm [thread:$0]  %s4714_s24, 256, %s4762_s11, [#allocation20], %s3809_s13, %s3809_s13, %s3810_s14  }
 0x4f9   :  { %3802 = dma.done.wait [#allocation15], 512  }
 0x4fa   :  { %3803 = vsyncadd [#allocation15], 4294966784 }
 0x4fb   :  { %3804 = dma.done.wait [#allocation20], 768  }
 0x4fc   :  { %3805 = vsyncadd [#allocation20], 4294966528 }
 0x4fd   :  { %3806 = dma.done.wait [#allocation23], 256  }
 0x4fe   :  { %3807 = vsyncadd [#allocation23], 4294967040 }
 0x4ff   :  { %2726 = vsyncpa [#allocation14], 1 }
 0x500   :  { %2727 = vsyncpa [#allocation17], 1 }
 0x501   :  { %2728 = vsyncpa [#allocation15], 1 }
 0x502   :  { %2729 = vsyncpa [#allocation20], 1 }
 0x503   :  { %2730 = vsyncpa [#allocation23], 1 }
 0x504   :  { %2731 = vsyncmov [#allocation6] }
 0x507   :  { %s2732_s6 = vpop.sfrf %2731 }
 0x508   :  { %p2810_p10 = scmp.ne.s32.totalorder %s2732_s6, 0 }
 0x50a   :  { %2736 = shalt.err (%p2810_p10)  }
 0x50b   :  { %2738 = vsyncmov [#allocation6 + $0x1] }
 0x50e   :  { %s2739_s23 = vpop.sfrf %2738 }
 0x50f   :  { %p2811_p11 = scmp.ne.s32.totalorder %s2739_s23, 0 }
 0x511   :  { %2743 = shalt.err (%p2811_p11)  }
 0x512   :  { %2745 = vsyncmov [#allocation6 + $0x2] }
 0x515   :  { %s2746_s11 = vpop.sfrf %2745 }
 0x516   :  { %p2812_p12 = scmp.ne.s32.totalorder %s2746_s11, 0 }
 0x518   :  { %2750 = shalt.err (%p2812_p12)  }
 0x519   :  { %2752 = vsyncmov [#allocation6 + $0x3] }
 0x51c   :  { %s2753_s13 = vpop.sfrf %2752 }
 0x51d   :  { %p2813_p13 = scmp.ne.s32.totalorder %s2753_s13, 0 }
 0x51f   :  { %2757 = shalt.err (%p2813_p13)  }

</bundles_post_ra>
